<compile_context>
chip_gen: v6e
topology: v6e:2x2x1
jax: 0.10.0
libtpu: 0.0.40
codegen_flags: <defaults>
</compile_context>

<pallas_src>
import functools

import jax
import jax.numpy as jnp
from jax.experimental import pallas as pl
from jax.experimental.pallas import tpu as pltpu


# ------------------------------ fused model kernel ------------------------------
def _make_fused_kernel(*, T: int, Bp: int, N: int, H: int, L: int, P: int):
    """Single-invocation kernel: L-layer LSTM (final hidden states) + MLP head."""

    def kernel(x_ref, wih0_ref, wihr_ref, whh_ref, b_ref,
               w1_ref, b1_ref, w2_ref, b2_ref, o_ref):
        # x_ref   : (T*Bp, Npad) bf16   time-major, batch/feature-padded input
        # wih0_ref: (Npad, 4H)   bf16   layer-0 input weights (transposed, padded)
        # wihr_ref: (max(L-1,1), H, 4H) bf16  input weights for layers 1..L-1
        # whh_ref : (L, H, 4H)   bf16   recurrent weights (transposed)
        # b_ref   : (L, 1, 4H)   f32    b_ih + b_hh
        # w1_ref  : (H, P) bf16   b1_ref: (1, P) f32
        # w2_ref  : (P, N) bf16   b2_ref: (1, N) f32
        # o_ref   : (L*Bp, N) f32  rows ordered (layer, padded batch)

        # Layer-0 input projection for ALL timesteps in one MXU call (bias folded in).
        xproj0 = (jnp.dot(x_ref[...], wih0_ref[...],
                          preferred_element_type=jnp.float32)
                  + b_ref[0])                                      # (T*Bp, 4H) f32

        # Load weights once as values (bf16 MXU operands); hoist bias broadcasts.
        whh_w = [whh_ref[l] for l in range(L)]                     # (H, 4H)
        wih_w = [None] + [wihr_ref[l - 1] for l in range(1, L)]    # (H, 4H)
        bias_b = [jnp.broadcast_to(b_ref[l], (Bp, 4 * H)) for l in range(1, L)]

        h = [jnp.zeros((Bp, H), jnp.float32) for _ in range(L)]
        c = [jnp.zeros((Bp, H), jnp.float32) for _ in range(L)]

        def cell(gates, c_prev):
            # One full-vreg sigmoid + one full-vreg tanh (EUP slot), then slice.
            sg = jax.nn.sigmoid(gates)
            tg = jnp.tanh(gates)
            i_g = sg[:, 0:H]
            f_g = sg[:, H:2 * H]
            o_g = sg[:, 3 * H:4 * H]
            g_g = tg[:, 2 * H:3 * H]
            c_new = f_g * c_prev + i_g * g_g                       # f32 state
            h_new = o_g * jnp.tanh(c_new)
            return h_new, c_new

        # Wavefront schedule over diagonals d = l + t.  Cell (l, t) needs only
        # h_l(t-1) and h_{l-1}(t), both produced on diagonal d-1, so all cells on a
        # diagonal are independent and their small matmuls overlap in the MXU pipeline.
        for d in range(T + L - 1):
            h_prev = list(h)                                       # diagonal d-1 state
            for l in range(max(0, d - T + 1), min(L, d + 1)):
                t = d - l
                rec = jnp.dot(h_prev[l].astype(jnp.bfloat16), whh_w[l],
                              preferred_element_type=jnp.float32)  # (Bp, 4H)
                if l == 0:
                    gates = xproj0[t * Bp:(t + 1) * Bp, :] + rec
                else:
                    inp = jnp.dot(h_prev[l - 1].astype(jnp.bfloat16), wih_w[l],
                                  preferred_element_type=jnp.float32)
                    gates = inp + rec + bias_b[l - 1]
                h[l], c[l] = cell(gates, c[l])

        # Head: relu -> fc_1 -> relu -> fc over all (layer, padded-batch) rows at once.
        h_mat = jnp.concatenate(h, axis=0)                         # (L*Bp, H)
        z = jnp.maximum(h_mat, 0.0).astype(jnp.bfloat16)
        z = (jnp.dot(z, w1_ref[...], preferred_element_type=jnp.float32)
             + b1_ref[...])
        z = jnp.maximum(z, 0.0).astype(jnp.bfloat16)
        o_ref[...] = (jnp.dot(z, w2_ref[...], preferred_element_type=jnp.float32)
                      + b2_ref[...])

    return kernel


# ------------------------- one-time parameter packing ---------------------------
def pack_lstm_model_params(params, *, hidden_size, num_layers, num_nodes):
    """Transpose / pad / stack / bf16-cast all weights ONCE (not per forward call)."""
    H, L, N = hidden_size, num_layers, num_nodes
    N_pad = ((max(N, 8) + 7) // 8) * 8

    Wih0 = params["lstm"][0][0]                                     # (4H, N)
    wih0 = jnp.pad(Wih0.T, ((0, N_pad - N), (0, 0))).astype(jnp.bfloat16)  # (Npad,4H)
    whh = jnp.stack([params["lstm"][l][1].T for l in range(L)]
                    ).astype(jnp.bfloat16)                          # (L, H, 4H)
    bias = jnp.stack([(params["lstm"][l][2] + params["lstm"][l][3])[None, :]
                      for l in range(L)]).astype(jnp.float32)       # (L, 1, 4H)
    if L > 1:
        wihr = jnp.stack([params["lstm"][l][0].T for l in range(1, L)]
                         ).astype(jnp.bfloat16)                     # (L-1, H, 4H)
    else:
        wihr = jnp.zeros((1, H, 4 * H), jnp.bfloat16)               # dummy (unused)

    W1, b1 = params["fc_1"]                                         # (P, H), (P,)
    W2, b2 = params["fc"]                                           # (N, P), (N,)
    return {
        "wih0": wih0, "wihr": wihr, "whh": whh, "bias": bias,
        "w1t": W1.T.astype(jnp.bfloat16), "b1": b1[None, :].astype(jnp.float32),
        "w2t": W2.T.astype(jnp.bfloat16), "b2": b2[None, :].astype(jnp.float32),
    }


# ----------------------------------- wrapper ------------------------------------
def lstm_model_forward(x, packed, *, hidden_size, num_layers):
    """x: (B, T, num_nodes) float32. Returns (B, num_layers, num_nodes)."""
    B, T, N = x.shape
    H, L = hidden_size, num_layers
    Bp = ((max(B, 8) + 7) // 8) * 8          # pad batch to one f32 sublane tile
    N_pad = packed["wih0"].shape[0]
    P = packed["w1t"].shape[1]

    # Time-major, batch-padded, feature-padded, bf16 input (row = t*Bp + b).
    x_tm = jnp.transpose(x, (1, 0, 2))                              # (T, B, N)
    x_tm = jnp.pad(x_tm, ((0, 0), (0, Bp - B), (0, N_pad - N)))     # (T, Bp, Npad)
    x_tm = x_tm.reshape(T * Bp, N_pad).astype(jnp.bfloat16)

    flops = (2 * T * Bp * N_pad * 4 * H                             # layer-0 xproj
             + 2 * (2 * L - 1) * T * Bp * H * 4 * H                 # recurrence + l>0 input
             + 2 * L * Bp * (H * P + P * N))                        # MLP head
    transcendentals = 9 * L * T * Bp * H
    bytes_accessed = (2 * (T * Bp * N_pad + N_pad * 4 * H + (2 * L - 1) * H * 4 * H
                           + H * P + P * N)
                      + 4 * (L * 4 * H + P + N + L * Bp * N))

    kernel = _make_fused_kernel(T=T, Bp=Bp, N=N, H=H, L=L, P=P)
    vmem = pl.BlockSpec(memory_space=pltpu.MemorySpace.VMEM)
    out_lb = pl.pallas_call(
        kernel,
        out_shape=jax.ShapeDtypeStruct((L * Bp, N), jnp.float32),
        in_specs=[vmem] * 9,
        out_specs=vmem,
        cost_estimate=pl.CostEstimate(flops=flops,
                                      transcendentals=transcendentals,
                                      bytes_accessed=bytes_accessed),
        compiler_params=pltpu.CompilerParams(vmem_limit_bytes=32 * 1024 * 1024),
    )(x_tm, packed["wih0"], packed["wihr"], packed["whh"], packed["bias"],
      packed["w1t"], packed["b1"], packed["w2t"], packed["b2"])

    # Rows are (layer, padded batch): drop pad rows, then reproduce torch's
    # h.permute(1, 0, 2) -> (B, L, N).
    out = out_lb.reshape(L, Bp, N)[:, :B, :]
    return jnp.transpose(out, (1, 0, 2))


# ------------------------------ pure-JAX reference -----------------------------
def ref_forward(x, params, *, hidden_size, num_layers):
    B, T, N = x.shape
    H = hidden_size
    inp = x
    h_list = []
    for l in range(num_layers):
        Wih, Whh, bih, bhh = params["lstm"][l]
        h = jnp.zeros((B, H), jnp.float32)
        c = jnp.zeros((B, H), jnp.float32)
        outs = []
        for t in range(T):
            gates = inp[:, t, :] @ Wih.T + bih + h @ Whh.T + bhh
            i = jax.nn.sigmoid(gates[:, 0:H])
            f = jax.nn.sigmoid(gates[:, H:2 * H])
            g = jnp.tanh(gates[:, 2 * H:3 * H])
            o = jax.nn.sigmoid(gates[:, 3 * H:4 * H])
            c = f * c + i * g
            h = o * jnp.tanh(c)
            outs.append(h)
        inp = jnp.stack(outs, axis=1)
        h_list.append(h)
    h_fin = jnp.stack(h_list, axis=0)              # (L, B, H)
    out = jnp.transpose(h_fin, (1, 0, 2))          # (B, L, H)
    out = jnp.maximum(out, 0.0)
    W1, b1 = params["fc_1"]
    W2, b2 = params["fc"]
    out = jnp.maximum(out @ W1.T + b1, 0.0)
    return out @ W2.T + b2


# ----------------------------------- main --------------------------------------
if __name__ == "__main__":
    # Module hyper-params (nn.LSTM num_layers == out_timesteps in the PyTorch module).
    in_timesteps = 8      # sequence length T
    out_timesteps = 4     # == nn.LSTM num_layers
    num_nodes = 16        # input feature size & final output size
    hidden_size = 32

    B, T, N, H, L = 2, in_timesteps, num_nodes, hidden_size, out_timesteps

    key = jax.random.PRNGKey(0)
    keys = jax.random.split(key, 4 * L + 5)
    scale = 0.1

    lstm_params = []
    ki = 0
    for l in range(L):
        in_dim = N if l == 0 else H
        Wih = scale * jax.random.normal(keys[ki], (4 * H, in_dim), jnp.float32); ki += 1
        Whh = scale * jax.random.normal(keys[ki], (4 * H, H), jnp.float32); ki += 1
        bih = scale * jax.random.normal(keys[ki], (4 * H,), jnp.float32); ki += 1
        bhh = scale * jax.random.normal(keys[ki], (4 * H,), jnp.float32); ki += 1
        lstm_params.append((Wih, Whh, bih, bhh))

    W1 = scale * jax.random.normal(keys[ki], (784, H), jnp.float32); ki += 1
    b1 = scale * jax.random.normal(keys[ki], (784,), jnp.float32); ki += 1
    W2 = scale * jax.random.normal(keys[ki], (N, 784), jnp.float32); ki += 1
    b2 = scale * jax.random.normal(keys[ki], (N,), jnp.float32); ki += 1

    params = {"lstm": lstm_params, "fc_1": (W1, b1), "fc": (W2, b2)}

    x = jax.random.normal(keys[ki], (B, T, N), jnp.float32)

    # One-time weight packing (hoisted out of the forward pass).
    packed = jax.tree_util.tree_map(
        jax.block_until_ready,
        pack_lstm_model_params(params, hidden_size=H, num_layers=L, num_nodes=N))

    fwd = jax.jit(functools.partial(lstm_model_forward, hidden_size=H, num_layers=L))
    out = jax.block_until_ready(fwd(x, packed))
    assert out.shape == (B, L, N), out.shape

    ref = jax.block_until_ready(ref_forward(x, params, hidden_size=H, num_layers=L))
    # bf16 MXU operands => looser tolerance than the pure-f32 reference.
    assert jnp.allclose(out, ref, rtol=3e-2, atol=3e-2), float(jnp.max(jnp.abs(out - ref)))

    print("KERNEL_OK")
</pallas_src>

<mosaic_0001>
module attributes {stable_mosaic.version = 11 : i64} {
  func.func @kernel(%arg0: memref<64x16xbf16, #tpu.memory_space<vmem>>, %arg1: memref<16x128xbf16, #tpu.memory_space<vmem>>, %arg2: memref<3x32x128xbf16, #tpu.memory_space<vmem>>, %arg3: memref<4x32x128xbf16, #tpu.memory_space<vmem>>, %arg4: memref<4x1x128xf32, #tpu.memory_space<vmem>>, %arg5: memref<32x784xbf16, #tpu.memory_space<vmem>>, %arg6: memref<1x784xf32, #tpu.memory_space<vmem>>, %arg7: memref<784x16xbf16, #tpu.memory_space<vmem>>, %arg8: memref<1x16xf32, #tpu.memory_space<vmem>>, %arg9: memref<32x16xf32, #tpu.memory_space<vmem>>) attributes {dimension_semantics = [], scalar_prefetch = 0 : i64, scratch_operands = 0 : i64, tpu.core_type = #tpu.core_type<tc>} {
    %c0 = arith.constant 0 : index
    %c0_0 = arith.constant 0 : index
    %0 = vector.load %arg0[%c0, %c0_0] : memref<64x16xbf16, #tpu.memory_space<vmem>>, vector<64x16xbf16>
    %c0_1 = arith.constant 0 : index
    %c0_2 = arith.constant 0 : index
    %1 = vector.load %arg1[%c0_1, %c0_2] : memref<16x128xbf16, #tpu.memory_space<vmem>>, vector<16x128xbf16>
    %cst = arith.constant dense<0.000000e+00> : vector<64x128xf32>
    %2 = tpu.matmul %0, %1, %cst {dimension_numbers = #tpu.dot_dimension_numbers<[1], [0], [0], [1], [0, 0, 1, 1], [], []>} : vector<64x16xbf16>, vector<16x128xbf16>, vector<64x128xf32> -> vector<64x128xf32>
    %c0_3 = arith.constant 0 : index
    %c0_4 = arith.constant 0 : index
    %c0_5 = arith.constant 0 : index
    %3 = vector.load %arg4[%c0_3, %c0_4, %c0_5] : memref<4x1x128xf32, #tpu.memory_space<vmem>>, vector<1x1x128xf32>
    %4 = vector.shape_cast %3 : vector<1x1x128xf32> to vector<1x128xf32>
    %5 = vector.broadcast %4 : vector<1x128xf32> to vector<64x128xf32>
    %6 = arith.addf %2, %5 : vector<64x128xf32>
    %c0_6 = arith.constant 0 : index
    %c0_7 = arith.constant 0 : index
    %c0_8 = arith.constant 0 : index
    %7 = vector.load %arg3[%c0_6, %c0_7, %c0_8] : memref<4x32x128xbf16, #tpu.memory_space<vmem>>, vector<1x32x128xbf16>
    %8 = vector.shape_cast %7 : vector<1x32x128xbf16> to vector<32x128xbf16>
    %c1 = arith.constant 1 : index
    %c0_9 = arith.constant 0 : index
    %c0_10 = arith.constant 0 : index
    %9 = vector.load %arg3[%c1, %c0_9, %c0_10] : memref<4x32x128xbf16, #tpu.memory_space<vmem>>, vector<1x32x128xbf16>
    %10 = vector.shape_cast %9 : vector<1x32x128xbf16> to vector<32x128xbf16>
    %c2 = arith.constant 2 : index
    %c0_11 = arith.constant 0 : index
    %c0_12 = arith.constant 0 : index
    %11 = vector.load %arg3[%c2, %c0_11, %c0_12] : memref<4x32x128xbf16, #tpu.memory_space<vmem>>, vector<1x32x128xbf16>
    %12 = vector.shape_cast %11 : vector<1x32x128xbf16> to vector<32x128xbf16>
    %c3 = arith.constant 3 : index
    %c0_13 = arith.constant 0 : index
    %c0_14 = arith.constant 0 : index
    %13 = vector.load %arg3[%c3, %c0_13, %c0_14] : memref<4x32x128xbf16, #tpu.memory_space<vmem>>, vector<1x32x128xbf16>
    %14 = vector.shape_cast %13 : vector<1x32x128xbf16> to vector<32x128xbf16>
    %c0_15 = arith.constant 0 : index
    %c0_16 = arith.constant 0 : index
    %c0_17 = arith.constant 0 : index
    %15 = vector.load %arg2[%c0_15, %c0_16, %c0_17] : memref<3x32x128xbf16, #tpu.memory_space<vmem>>, vector<1x32x128xbf16>
    %16 = vector.shape_cast %15 : vector<1x32x128xbf16> to vector<32x128xbf16>
    %c1_18 = arith.constant 1 : index
    %c0_19 = arith.constant 0 : index
    %c0_20 = arith.constant 0 : index
    %17 = vector.load %arg2[%c1_18, %c0_19, %c0_20] : memref<3x32x128xbf16, #tpu.memory_space<vmem>>, vector<1x32x128xbf16>
    %18 = vector.shape_cast %17 : vector<1x32x128xbf16> to vector<32x128xbf16>
    %c2_21 = arith.constant 2 : index
    %c0_22 = arith.constant 0 : index
    %c0_23 = arith.constant 0 : index
    %19 = vector.load %arg2[%c2_21, %c0_22, %c0_23] : memref<3x32x128xbf16, #tpu.memory_space<vmem>>, vector<1x32x128xbf16>
    %20 = vector.shape_cast %19 : vector<1x32x128xbf16> to vector<32x128xbf16>
    %c1_24 = arith.constant 1 : index
    %c0_25 = arith.constant 0 : index
    %c0_26 = arith.constant 0 : index
    %21 = vector.load %arg4[%c1_24, %c0_25, %c0_26] : memref<4x1x128xf32, #tpu.memory_space<vmem>>, vector<1x1x128xf32>
    %22 = vector.shape_cast %21 : vector<1x1x128xf32> to vector<1x128xf32>
    %23 = vector.shape_cast %22 : vector<1x128xf32> to vector<1x128xf32>
    %24 = vector.broadcast %23 : vector<1x128xf32> to vector<8x128xf32>
    %c2_27 = arith.constant 2 : index
    %c0_28 = arith.constant 0 : index
    %c0_29 = arith.constant 0 : index
    %25 = vector.load %arg4[%c2_27, %c0_28, %c0_29] : memref<4x1x128xf32, #tpu.memory_space<vmem>>, vector<1x1x128xf32>
    %26 = vector.shape_cast %25 : vector<1x1x128xf32> to vector<1x128xf32>
    %27 = vector.shape_cast %26 : vector<1x128xf32> to vector<1x128xf32>
    %28 = vector.broadcast %27 : vector<1x128xf32> to vector<8x128xf32>
    %c3_30 = arith.constant 3 : index
    %c0_31 = arith.constant 0 : index
    %c0_32 = arith.constant 0 : index
    %29 = vector.load %arg4[%c3_30, %c0_31, %c0_32] : memref<4x1x128xf32, #tpu.memory_space<vmem>>, vector<1x1x128xf32>
    %30 = vector.shape_cast %29 : vector<1x1x128xf32> to vector<1x128xf32>
    %31 = vector.shape_cast %30 : vector<1x128xf32> to vector<1x128xf32>
    %32 = vector.broadcast %31 : vector<1x128xf32> to vector<8x128xf32>
    %cst_33 = arith.constant 0.000000e+00 : f32
    %33 = vector.broadcast %cst_33 : f32 to vector<8x32xf32>
    %cst_34 = arith.constant 0.000000e+00 : f32
    %34 = vector.broadcast %cst_34 : f32 to vector<8x32xf32>
    %cst_35 = arith.constant 0.000000e+00 : f32
    %35 = vector.broadcast %cst_35 : f32 to vector<8x32xf32>
    %cst_36 = arith.constant 0.000000e+00 : f32
    %36 = vector.broadcast %cst_36 : f32 to vector<8x32xf32>
    %cst_37 = arith.constant 0.000000e+00 : f32
    %37 = vector.broadcast %cst_37 : f32 to vector<8x32xf32>
    %cst_38 = arith.constant 0.000000e+00 : f32
    %38 = vector.broadcast %cst_38 : f32 to vector<8x32xf32>
    %cst_39 = arith.constant 0.000000e+00 : f32
    %39 = vector.broadcast %cst_39 : f32 to vector<8x32xf32>
    %cst_40 = arith.constant 0.000000e+00 : f32
    %40 = vector.broadcast %cst_40 : f32 to vector<8x32xf32>
    %41 = arith.truncf %33 : vector<8x32xf32> to vector<8x32xbf16>
    %cst_41 = arith.constant dense<0.000000e+00> : vector<8x128xf32>
    %42 = tpu.matmul %41, %8, %cst_41 {dimension_numbers = #tpu.dot_dimension_numbers<[1], [0], [0], [1], [0, 0, 1, 1], [], []>} : vector<8x32xbf16>, vector<32x128xbf16>, vector<8x128xf32> -> vector<8x128xf32>
    %43 = vector.extract_strided_slice %6 {offsets = [0, 0], sizes = [8, 128], strides = [1, 1]} : vector<64x128xf32> to vector<8x128xf32>
    %44 = arith.addf %43, %42 : vector<8x128xf32>
    %45 = arith.negf %44 : vector<8x128xf32>
    %46 = math.exp %45 : vector<8x128xf32>
    %cst_42 = arith.constant 1.000000e+00 : f32
    %47 = vector.broadcast %cst_42 : f32 to vector<8x128xf32>
    %48 = arith.addf %47, %46 : vector<8x128xf32>
    %49 = arith.divf %47, %48 : vector<8x128xf32>
    %50 = math.tanh %44 : vector<8x128xf32>
    %51 = vector.extract_strided_slice %49 {offsets = [0, 0], sizes = [8, 32], strides = [1, 1]} : vector<8x128xf32> to vector<8x32xf32>
    %52 = vector.extract_strided_slice %49 {offsets = [0, 32], sizes = [8, 32], strides = [1, 1]} : vector<8x128xf32> to vector<8x32xf32>
    %53 = vector.extract_strided_slice %49 {offsets = [0, 96], sizes = [8, 32], strides = [1, 1]} : vector<8x128xf32> to vector<8x32xf32>
    %54 = vector.extract_strided_slice %50 {offsets = [0, 64], sizes = [8, 32], strides = [1, 1]} : vector<8x128xf32> to vector<8x32xf32>
    %55 = arith.mulf %52, %37 : vector<8x32xf32>
    %56 = arith.mulf %51, %54 : vector<8x32xf32>
    %57 = arith.addf %55, %56 : vector<8x32xf32>
    %58 = math.tanh %57 : vector<8x32xf32>
    %59 = arith.mulf %53, %58 : vector<8x32xf32>
    %60 = arith.truncf %59 : vector<8x32xf32> to vector<8x32xbf16>
    %cst_43 = arith.constant dense<0.000000e+00> : vector<8x128xf32>
    %61 = tpu.matmul %60, %8, %cst_43 {dimension_numbers = #tpu.dot_dimension_numbers<[1], [0], [0], [1], [0, 0, 1, 1], [], []>} : vector<8x32xbf16>, vector<32x128xbf16>, vector<8x128xf32> -> vector<8x128xf32>
    %62 = vector.extract_strided_slice %6 {offsets = [8, 0], sizes = [8, 128], strides = [1, 1]} : vector<64x128xf32> to vector<8x128xf32>
    %63 = arith.addf %62, %61 : vector<8x128xf32>
    %64 = arith.negf %63 : vector<8x128xf32>
    %65 = math.exp %64 : vector<8x128xf32>
    %cst_44 = arith.constant 1.000000e+00 : f32
    %66 = vector.broadcast %cst_44 : f32 to vector<8x128xf32>
    %67 = arith.addf %66, %65 : vector<8x128xf32>
    %68 = arith.divf %66, %67 : vector<8x128xf32>
    %69 = math.tanh %63 : vector<8x128xf32>
    %70 = vector.extract_strided_slice %68 {offsets = [0, 0], sizes = [8, 32], strides = [1, 1]} : vector<8x128xf32> to vector<8x32xf32>
    %71 = vector.extract_strided_slice %68 {offsets = [0, 32], sizes = [8, 32], strides = [1, 1]} : vector<8x128xf32> to vector<8x32xf32>
    %72 = vector.extract_strided_slice %68 {offsets = [0, 96], sizes = [8, 32], strides = [1, 1]} : vector<8x128xf32> to vector<8x32xf32>
    %73 = vector.extract_strided_slice %69 {offsets = [0, 64], sizes = [8, 32], strides = [1, 1]} : vector<8x128xf32> to vector<8x32xf32>
    %74 = arith.mulf %71, %57 : vector<8x32xf32>
    %75 = arith.mulf %70, %73 : vector<8x32xf32>
    %76 = arith.addf %74, %75 : vector<8x32xf32>
    %77 = math.tanh %76 : vector<8x32xf32>
    %78 = arith.mulf %72, %77 : vector<8x32xf32>
    %79 = arith.truncf %34 : vector<8x32xf32> to vector<8x32xbf16>
    %cst_45 = arith.constant dense<0.000000e+00> : vector<8x128xf32>
    %80 = tpu.matmul %79, %10, %cst_45 {dimension_numbers = #tpu.dot_dimension_numbers<[1], [0], [0], [1], [0, 0, 1, 1], [], []>} : vector<8x32xbf16>, vector<32x128xbf16>, vector<8x128xf32> -> vector<8x128xf32>
    %81 = arith.truncf %59 : vector<8x32xf32> to vector<8x32xbf16>
    %cst_46 = arith.constant dense<0.000000e+00> : vector<8x128xf32>
    %82 = tpu.matmul %81, %16, %cst_46 {dimension_numbers = #tpu.dot_dimension_numbers<[1], [0], [0], [1], [0, 0, 1, 1], [], []>} : vector<8x32xbf16>, vector<32x128xbf16>, vector<8x128xf32> -> vector<8x128xf32>
    %83 = arith.addf %82, %80 : vector<8x128xf32>
    %84 = arith.addf %83, %24 : vector<8x128xf32>
    %85 = arith.negf %84 : vector<8x128xf32>
    %86 = math.exp %85 : vector<8x128xf32>
    %cst_47 = arith.constant 1.000000e+00 : f32
    %87 = vector.broadcast %cst_47 : f32 to vector<8x128xf32>
    %88 = arith.addf %87, %86 : vector<8x128xf32>
    %89 = arith.divf %87, %88 : vector<8x128xf32>
    %90 = math.tanh %84 : vector<8x128xf32>
    %91 = vector.extract_strided_slice %89 {offsets = [0, 0], sizes = [8, 32], strides = [1, 1]} : vector<8x128xf32> to vector<8x32xf32>
    %92 = vector.extract_strided_slice %89 {offsets = [0, 32], sizes = [8, 32], strides = [1, 1]} : vector<8x128xf32> to vector<8x32xf32>
    %93 = vector.extract_strided_slice %89 {offsets = [0, 96], sizes = [8, 32], strides = [1, 1]} : vector<8x128xf32> to vector<8x32xf32>
    %94 = vector.extract_strided_slice %90 {offsets = [0, 64], sizes = [8, 32], strides = [1, 1]} : vector<8x128xf32> to vector<8x32xf32>
    %95 = arith.mulf %92, %38 : vector<8x32xf32>
    %96 = arith.mulf %91, %94 : vector<8x32xf32>
    %97 = arith.addf %95, %96 : vector<8x32xf32>
    %98 = math.tanh %97 : vector<8x32xf32>
    %99 = arith.mulf %93, %98 : vector<8x32xf32>
    %100 = arith.truncf %78 : vector<8x32xf32> to vector<8x32xbf16>
    %cst_48 = arith.constant dense<0.000000e+00> : vector<8x128xf32>
    %101 = tpu.matmul %100, %8, %cst_48 {dimension_numbers = #tpu.dot_dimension_numbers<[1], [0], [0], [1], [0, 0, 1, 1], [], []>} : vector<8x32xbf16>, vector<32x128xbf16>, vector<8x128xf32> -> vector<8x128xf32>
    %102 = vector.extract_strided_slice %6 {offsets = [16, 0], sizes = [8, 128], strides = [1, 1]} : vector<64x128xf32> to vector<8x128xf32>
    %103 = arith.addf %102, %101 : vector<8x128xf32>
    %104 = arith.negf %103 : vector<8x128xf32>
    %105 = math.exp %104 : vector<8x128xf32>
    %cst_49 = arith.constant 1.000000e+00 : f32
    %106 = vector.broadcast %cst_49 : f32 to vector<8x128xf32>
    %107 = arith.addf %106, %105 : vector<8x128xf32>
    %108 = arith.divf %106, %107 : vector<8x128xf32>
    %109 = math.tanh %103 : vector<8x128xf32>
    %110 = vector.extract_strided_slice %108 {offsets = [0, 0], sizes = [8, 32], strides = [1, 1]} : vector<8x128xf32> to vector<8x32xf32>
    %111 = vector.extract_strided_slice %108 {offsets = [0, 32], sizes = [8, 32], strides = [1, 1]} : vector<8x128xf32> to vector<8x32xf32>
    %112 = vector.extract_strided_slice %108 {offsets = [0, 96], sizes = [8, 32], strides = [1, 1]} : vector<8x128xf32> to vector<8x32xf32>
    %113 = vector.extract_strided_slice %109 {offsets = [0, 64], sizes = [8, 32], strides = [1, 1]} : vector<8x128xf32> to vector<8x32xf32>
    %114 = arith.mulf %111, %76 : vector<8x32xf32>
    %115 = arith.mulf %110, %113 : vector<8x32xf32>
    %116 = arith.addf %114, %115 : vector<8x32xf32>
    %117 = math.tanh %116 : vector<8x32xf32>
    %118 = arith.mulf %112, %117 : vector<8x32xf32>
    %119 = arith.truncf %99 : vector<8x32xf32> to vector<8x32xbf16>
    %cst_50 = arith.constant dense<0.000000e+00> : vector<8x128xf32>
    %120 = tpu.matmul %119, %10, %cst_50 {dimension_numbers = #tpu.dot_dimension_numbers<[1], [0], [0], [1], [0, 0, 1, 1], [], []>} : vector<8x32xbf16>, vector<32x128xbf16>, vector<8x128xf32> -> vector<8x128xf32>
    %121 = arith.truncf %78 : vector<8x32xf32> to vector<8x32xbf16>
    %cst_51 = arith.constant dense<0.000000e+00> : vector<8x128xf32>
    %122 = tpu.matmul %121, %16, %cst_51 {dimension_numbers = #tpu.dot_dimension_numbers<[1], [0], [0], [1], [0, 0, 1, 1], [], []>} : vector<8x32xbf16>, vector<32x128xbf16>, vector<8x128xf32> -> vector<8x128xf32>
    %123 = arith.addf %122, %120 : vector<8x128xf32>
    %124 = arith.addf %123, %24 : vector<8x128xf32>
    %125 = arith.negf %124 : vector<8x128xf32>
    %126 = math.exp %125 : vector<8x128xf32>
    %cst_52 = arith.constant 1.000000e+00 : f32
    %127 = vector.broadcast %cst_52 : f32 to vector<8x128xf32>
    %128 = arith.addf %127, %126 : vector<8x128xf32>
    %129 = arith.divf %127, %128 : vector<8x128xf32>
    %130 = math.tanh %124 : vector<8x128xf32>
    %131 = vector.extract_strided_slice %129 {offsets = [0, 0], sizes = [8, 32], strides = [1, 1]} : vector<8x128xf32> to vector<8x32xf32>
    %132 = vector.extract_strided_slice %129 {offsets = [0, 32], sizes = [8, 32], strides = [1, 1]} : vector<8x128xf32> to vector<8x32xf32>
    %133 = vector.extract_strided_slice %129 {offsets = [0, 96], sizes = [8, 32], strides = [1, 1]} : vector<8x128xf32> to vector<8x32xf32>
    %134 = vector.extract_strided_slice %130 {offsets = [0, 64], sizes = [8, 32], strides = [1, 1]} : vector<8x128xf32> to vector<8x32xf32>
    %135 = arith.mulf %132, %97 : vector<8x32xf32>
    %136 = arith.mulf %131, %134 : vector<8x32xf32>
    %137 = arith.addf %135, %136 : vector<8x32xf32>
    %138 = math.tanh %137 : vector<8x32xf32>
    %139 = arith.mulf %133, %138 : vector<8x32xf32>
    %140 = arith.truncf %35 : vector<8x32xf32> to vector<8x32xbf16>
    %cst_53 = arith.constant dense<0.000000e+00> : vector<8x128xf32>
    %141 = tpu.matmul %140, %12, %cst_53 {dimension_numbers = #tpu.dot_dimension_numbers<[1], [0], [0], [1], [0, 0, 1, 1], [], []>} : vector<8x32xbf16>, vector<32x128xbf16>, vector<8x128xf32> -> vector<8x128xf32>
    %142 = arith.truncf %99 : vector<8x32xf32> to vector<8x32xbf16>
    %cst_54 = arith.constant dense<0.000000e+00> : vector<8x128xf32>
    %143 = tpu.matmul %142, %18, %cst_54 {dimension_numbers = #tpu.dot_dimension_numbers<[1], [0], [0], [1], [0, 0, 1, 1], [], []>} : vector<8x32xbf16>, vector<32x128xbf16>, vector<8x128xf32> -> vector<8x128xf32>
    %144 = arith.addf %143, %141 : vector<8x128xf32>
    %145 = arith.addf %144, %28 : vector<8x128xf32>
    %146 = arith.negf %145 : vector<8x128xf32>
    %147 = math.exp %146 : vector<8x128xf32>
    %cst_55 = arith.constant 1.000000e+00 : f32
    %148 = vector.broadcast %cst_55 : f32 to vector<8x128xf32>
    %149 = arith.addf %148, %147 : vector<8x128xf32>
    %150 = arith.divf %148, %149 : vector<8x128xf32>
    %151 = math.tanh %145 : vector<8x128xf32>
    %152 = vector.extract_strided_slice %150 {offsets = [0, 0], sizes = [8, 32], strides = [1, 1]} : vector<8x128xf32> to vector<8x32xf32>
    %153 = vector.extract_strided_slice %150 {offsets = [0, 32], sizes = [8, 32], strides = [1, 1]} : vector<8x128xf32> to vector<8x32xf32>
    %154 = vector.extract_strided_slice %150 {offsets = [0, 96], sizes = [8, 32], strides = [1, 1]} : vector<8x128xf32> to vector<8x32xf32>
    %155 = vector.extract_strided_slice %151 {offsets = [0, 64], sizes = [8, 32], strides = [1, 1]} : vector<8x128xf32> to vector<8x32xf32>
    %156 = arith.mulf %153, %39 : vector<8x32xf32>
    %157 = arith.mulf %152, %155 : vector<8x32xf32>
    %158 = arith.addf %156, %157 : vector<8x32xf32>
    %159 = math.tanh %158 : vector<8x32xf32>
    %160 = arith.mulf %154, %159 : vector<8x32xf32>
    %161 = arith.truncf %118 : vector<8x32xf32> to vector<8x32xbf16>
    %cst_56 = arith.constant dense<0.000000e+00> : vector<8x128xf32>
    %162 = tpu.matmul %161, %8, %cst_56 {dimension_numbers = #tpu.dot_dimension_numbers<[1], [0], [0], [1], [0, 0, 1, 1], [], []>} : vector<8x32xbf16>, vector<32x128xbf16>, vector<8x128xf32> -> vector<8x128xf32>
    %163 = vector.extract_strided_slice %6 {offsets = [24, 0], sizes = [8, 128], strides = [1, 1]} : vector<64x128xf32> to vector<8x128xf32>
    %164 = arith.addf %163, %162 : vector<8x128xf32>
    %165 = arith.negf %164 : vector<8x128xf32>
    %166 = math.exp %165 : vector<8x128xf32>
    %cst_57 = arith.constant 1.000000e+00 : f32
    %167 = vector.broadcast %cst_57 : f32 to vector<8x128xf32>
    %168 = arith.addf %167, %166 : vector<8x128xf32>
    %169 = arith.divf %167, %168 : vector<8x128xf32>
    %170 = math.tanh %164 : vector<8x128xf32>
    %171 = vector.extract_strided_slice %169 {offsets = [0, 0], sizes = [8, 32], strides = [1, 1]} : vector<8x128xf32> to vector<8x32xf32>
    %172 = vector.extract_strided_slice %169 {offsets = [0, 32], sizes = [8, 32], strides = [1, 1]} : vector<8x128xf32> to vector<8x32xf32>
    %173 = vector.extract_strided_slice %169 {offsets = [0, 96], sizes = [8, 32], strides = [1, 1]} : vector<8x128xf32> to vector<8x32xf32>
    %174 = vector.extract_strided_slice %170 {offsets = [0, 64], sizes = [8, 32], strides = [1, 1]} : vector<8x128xf32> to vector<8x32xf32>
    %175 = arith.mulf %172, %116 : vector<8x32xf32>
    %176 = arith.mulf %171, %174 : vector<8x32xf32>
    %177 = arith.addf %175, %176 : vector<8x32xf32>
    %178 = math.tanh %177 : vector<8x32xf32>
    %179 = arith.mulf %173, %178 : vector<8x32xf32>
    %180 = arith.truncf %139 : vector<8x32xf32> to vector<8x32xbf16>
    %cst_58 = arith.constant dense<0.000000e+00> : vector<8x128xf32>
    %181 = tpu.matmul %180, %10, %cst_58 {dimension_numbers = #tpu.dot_dimension_numbers<[1], [0], [0], [1], [0, 0, 1, 1], [], []>} : vector<8x32xbf16>, vector<32x128xbf16>, vector<8x128xf32> -> vector<8x128xf32>
    %182 = arith.truncf %118 : vector<8x32xf32> to vector<8x32xbf16>
    %cst_59 = arith.constant dense<0.000000e+00> : vector<8x128xf32>
    %183 = tpu.matmul %182, %16, %cst_59 {dimension_numbers = #tpu.dot_dimension_numbers<[1], [0], [0], [1], [0, 0, 1, 1], [], []>} : vector<8x32xbf16>, vector<32x128xbf16>, vector<8x128xf32> -> vector<8x128xf32>
    %184 = arith.addf %183, %181 : vector<8x128xf32>
    %185 = arith.addf %184, %24 : vector<8x128xf32>
    %186 = arith.negf %185 : vector<8x128xf32>
    %187 = math.exp %186 : vector<8x128xf32>
    %cst_60 = arith.constant 1.000000e+00 : f32
    %188 = vector.broadcast %cst_60 : f32 to vector<8x128xf32>
    %189 = arith.addf %188, %187 : vector<8x128xf32>
    %190 = arith.divf %188, %189 : vector<8x128xf32>
    %191 = math.tanh %185 : vector<8x128xf32>
    %192 = vector.extract_strided_slice %190 {offsets = [0, 0], sizes = [8, 32], strides = [1, 1]} : vector<8x128xf32> to vector<8x32xf32>
    %193 = vector.extract_strided_slice %190 {offsets = [0, 32], sizes = [8, 32], strides = [1, 1]} : vector<8x128xf32> to vector<8x32xf32>
    %194 = vector.extract_strided_slice %190 {offsets = [0, 96], sizes = [8, 32], strides = [1, 1]} : vector<8x128xf32> to vector<8x32xf32>
    %195 = vector.extract_strided_slice %191 {offsets = [0, 64], sizes = [8, 32], strides = [1, 1]} : vector<8x128xf32> to vector<8x32xf32>
    %196 = arith.mulf %193, %137 : vector<8x32xf32>
    %197 = arith.mulf %192, %195 : vector<8x32xf32>
    %198 = arith.addf %196, %197 : vector<8x32xf32>
    %199 = math.tanh %198 : vector<8x32xf32>
    %200 = arith.mulf %194, %199 : vector<8x32xf32>
    %201 = arith.truncf %160 : vector<8x32xf32> to vector<8x32xbf16>
    %cst_61 = arith.constant dense<0.000000e+00> : vector<8x128xf32>
    %202 = tpu.matmul %201, %12, %cst_61 {dimension_numbers = #tpu.dot_dimension_numbers<[1], [0], [0], [1], [0, 0, 1, 1], [], []>} : vector<8x32xbf16>, vector<32x128xbf16>, vector<8x128xf32> -> vector<8x128xf32>
    %203 = arith.truncf %139 : vector<8x32xf32> to vector<8x32xbf16>
    %cst_62 = arith.constant dense<0.000000e+00> : vector<8x128xf32>
    %204 = tpu.matmul %203, %18, %cst_62 {dimension_numbers = #tpu.dot_dimension_numbers<[1], [0], [0], [1], [0, 0, 1, 1], [], []>} : vector<8x32xbf16>, vector<32x128xbf16>, vector<8x128xf32> -> vector<8x128xf32>
    %205 = arith.addf %204, %202 : vector<8x128xf32>
    %206 = arith.addf %205, %28 : vector<8x128xf32>
    %207 = arith.negf %206 : vector<8x128xf32>
    %208 = math.exp %207 : vector<8x128xf32>
    %cst_63 = arith.constant 1.000000e+00 : f32
    %209 = vector.broadcast %cst_63 : f32 to vector<8x128xf32>
    %210 = arith.addf %209, %208 : vector<8x128xf32>
    %211 = arith.divf %209, %210 : vector<8x128xf32>
    %212 = math.tanh %206 : vector<8x128xf32>
    %213 = vector.extract_strided_slice %211 {offsets = [0, 0], sizes = [8, 32], strides = [1, 1]} : vector<8x128xf32> to vector<8x32xf32>
    %214 = vector.extract_strided_slice %211 {offsets = [0, 32], sizes = [8, 32], strides = [1, 1]} : vector<8x128xf32> to vector<8x32xf32>
    %215 = vector.extract_strided_slice %211 {offsets = [0, 96], sizes = [8, 32], strides = [1, 1]} : vector<8x128xf32> to vector<8x32xf32>
    %216 = vector.extract_strided_slice %212 {offsets = [0, 64], sizes = [8, 32], strides = [1, 1]} : vector<8x128xf32> to vector<8x32xf32>
    %217 = arith.mulf %214, %158 : vector<8x32xf32>
    %218 = arith.mulf %213, %216 : vector<8x32xf32>
    %219 = arith.addf %217, %218 : vector<8x32xf32>
    %220 = math.tanh %219 : vector<8x32xf32>
    %221 = arith.mulf %215, %220 : vector<8x32xf32>
    %222 = arith.truncf %36 : vector<8x32xf32> to vector<8x32xbf16>
    %cst_64 = arith.constant dense<0.000000e+00> : vector<8x128xf32>
    %223 = tpu.matmul %222, %14, %cst_64 {dimension_numbers = #tpu.dot_dimension_numbers<[1], [0], [0], [1], [0, 0, 1, 1], [], []>} : vector<8x32xbf16>, vector<32x128xbf16>, vector<8x128xf32> -> vector<8x128xf32>
    %224 = arith.truncf %160 : vector<8x32xf32> to vector<8x32xbf16>
    %cst_65 = arith.constant dense<0.000000e+00> : vector<8x128xf32>
    %225 = tpu.matmul %224, %20, %cst_65 {dimension_numbers = #tpu.dot_dimension_numbers<[1], [0], [0], [1], [0, 0, 1, 1], [], []>} : vector<8x32xbf16>, vector<32x128xbf16>, vector<8x128xf32> -> vector<8x128xf32>
    %226 = arith.addf %225, %223 : vector<8x128xf32>
    %227 = arith.addf %226, %32 : vector<8x128xf32>
    %228 = arith.negf %227 : vector<8x128xf32>
    %229 = math.exp %228 : vector<8x128xf32>
    %cst_66 = arith.constant 1.000000e+00 : f32
    %230 = vector.broadcast %cst_66 : f32 to vector<8x128xf32>
    %231 = arith.addf %230, %229 : vector<8x128xf32>
    %232 = arith.divf %230, %231 : vector<8x128xf32>
    %233 = math.tanh %227 : vector<8x128xf32>
    %234 = vector.extract_strided_slice %232 {offsets = [0, 0], sizes = [8, 32], strides = [1, 1]} : vector<8x128xf32> to vector<8x32xf32>
    %235 = vector.extract_strided_slice %232 {offsets = [0, 32], sizes = [8, 32], strides = [1, 1]} : vector<8x128xf32> to vector<8x32xf32>
    %236 = vector.extract_strided_slice %232 {offsets = [0, 96], sizes = [8, 32], strides = [1, 1]} : vector<8x128xf32> to vector<8x32xf32>
    %237 = vector.extract_strided_slice %233 {offsets = [0, 64], sizes = [8, 32], strides = [1, 1]} : vector<8x128xf32> to vector<8x32xf32>
    %238 = arith.mulf %235, %40 : vector<8x32xf32>
    %239 = arith.mulf %234, %237 : vector<8x32xf32>
    %240 = arith.addf %238, %239 : vector<8x32xf32>
    %241 = math.tanh %240 : vector<8x32xf32>
    %242 = arith.mulf %236, %241 : vector<8x32xf32>
    %243 = arith.truncf %179 : vector<8x32xf32> to vector<8x32xbf16>
    %cst_67 = arith.constant dense<0.000000e+00> : vector<8x128xf32>
    %244 = tpu.matmul %243, %8, %cst_67 {dimension_numbers = #tpu.dot_dimension_numbers<[1], [0], [0], [1], [0, 0, 1, 1], [], []>} : vector<8x32xbf16>, vector<32x128xbf16>, vector<8x128xf32> -> vector<8x128xf32>
    %245 = vector.extract_strided_slice %6 {offsets = [32, 0], sizes = [8, 128], strides = [1, 1]} : vector<64x128xf32> to vector<8x128xf32>
    %246 = arith.addf %245, %244 : vector<8x128xf32>
    %247 = arith.negf %246 : vector<8x128xf32>
    %248 = math.exp %247 : vector<8x128xf32>
    %cst_68 = arith.constant 1.000000e+00 : f32
    %249 = vector.broadcast %cst_68 : f32 to vector<8x128xf32>
    %250 = arith.addf %249, %248 : vector<8x128xf32>
    %251 = arith.divf %249, %250 : vector<8x128xf32>
    %252 = math.tanh %246 : vector<8x128xf32>
    %253 = vector.extract_strided_slice %251 {offsets = [0, 0], sizes = [8, 32], strides = [1, 1]} : vector<8x128xf32> to vector<8x32xf32>
    %254 = vector.extract_strided_slice %251 {offsets = [0, 32], sizes = [8, 32], strides = [1, 1]} : vector<8x128xf32> to vector<8x32xf32>
    %255 = vector.extract_strided_slice %251 {offsets = [0, 96], sizes = [8, 32], strides = [1, 1]} : vector<8x128xf32> to vector<8x32xf32>
    %256 = vector.extract_strided_slice %252 {offsets = [0, 64], sizes = [8, 32], strides = [1, 1]} : vector<8x128xf32> to vector<8x32xf32>
    %257 = arith.mulf %254, %177 : vector<8x32xf32>
    %258 = arith.mulf %253, %256 : vector<8x32xf32>
    %259 = arith.addf %257, %258 : vector<8x32xf32>
    %260 = math.tanh %259 : vector<8x32xf32>
    %261 = arith.mulf %255, %260 : vector<8x32xf32>
    %262 = arith.truncf %200 : vector<8x32xf32> to vector<8x32xbf16>
    %cst_69 = arith.constant dense<0.000000e+00> : vector<8x128xf32>
    %263 = tpu.matmul %262, %10, %cst_69 {dimension_numbers = #tpu.dot_dimension_numbers<[1], [0], [0], [1], [0, 0, 1, 1], [], []>} : vector<8x32xbf16>, vector<32x128xbf16>, vector<8x128xf32> -> vector<8x128xf32>
    %264 = arith.truncf %179 : vector<8x32xf32> to vector<8x32xbf16>
    %cst_70 = arith.constant dense<0.000000e+00> : vector<8x128xf32>
    %265 = tpu.matmul %264, %16, %cst_70 {dimension_numbers = #tpu.dot_dimension_numbers<[1], [0], [0], [1], [0, 0, 1, 1], [], []>} : vector<8x32xbf16>, vector<32x128xbf16>, vector<8x128xf32> -> vector<8x128xf32>
    %266 = arith.addf %265, %263 : vector<8x128xf32>
    %267 = arith.addf %266, %24 : vector<8x128xf32>
    %268 = arith.negf %267 : vector<8x128xf32>
    %269 = math.exp %268 : vector<8x128xf32>
    %cst_71 = arith.constant 1.000000e+00 : f32
    %270 = vector.broadcast %cst_71 : f32 to vector<8x128xf32>
    %271 = arith.addf %270, %269 : vector<8x128xf32>
    %272 = arith.divf %270, %271 : vector<8x128xf32>
    %273 = math.tanh %267 : vector<8x128xf32>
    %274 = vector.extract_strided_slice %272 {offsets = [0, 0], sizes = [8, 32], strides = [1, 1]} : vector<8x128xf32> to vector<8x32xf32>
    %275 = vector.extract_strided_slice %272 {offsets = [0, 32], sizes = [8, 32], strides = [1, 1]} : vector<8x128xf32> to vector<8x32xf32>
    %276 = vector.extract_strided_slice %272 {offsets = [0, 96], sizes = [8, 32], strides = [1, 1]} : vector<8x128xf32> to vector<8x32xf32>
    %277 = vector.extract_strided_slice %273 {offsets = [0, 64], sizes = [8, 32], strides = [1, 1]} : vector<8x128xf32> to vector<8x32xf32>
    %278 = arith.mulf %275, %198 : vector<8x32xf32>
    %279 = arith.mulf %274, %277 : vector<8x32xf32>
    %280 = arith.addf %278, %279 : vector<8x32xf32>
    %281 = math.tanh %280 : vector<8x32xf32>
    %282 = arith.mulf %276, %281 : vector<8x32xf32>
    %283 = arith.truncf %221 : vector<8x32xf32> to vector<8x32xbf16>
    %cst_72 = arith.constant dense<0.000000e+00> : vector<8x128xf32>
    %284 = tpu.matmul %283, %12, %cst_72 {dimension_numbers = #tpu.dot_dimension_numbers<[1], [0], [0], [1], [0, 0, 1, 1], [], []>} : vector<8x32xbf16>, vector<32x128xbf16>, vector<8x128xf32> -> vector<8x128xf32>
    %285 = arith.truncf %200 : vector<8x32xf32> to vector<8x32xbf16>
    %cst_73 = arith.constant dense<0.000000e+00> : vector<8x128xf32>
    %286 = tpu.matmul %285, %18, %cst_73 {dimension_numbers = #tpu.dot_dimension_numbers<[1], [0], [0], [1], [0, 0, 1, 1], [], []>} : vector<8x32xbf16>, vector<32x128xbf16>, vector<8x128xf32> -> vector<8x128xf32>
    %287 = arith.addf %286, %284 : vector<8x128xf32>
    %288 = arith.addf %287, %28 : vector<8x128xf32>
    %289 = arith.negf %288 : vector<8x128xf32>
    %290 = math.exp %289 : vector<8x128xf32>
    %cst_74 = arith.constant 1.000000e+00 : f32
    %291 = vector.broadcast %cst_74 : f32 to vector<8x128xf32>
    %292 = arith.addf %291, %290 : vector<8x128xf32>
    %293 = arith.divf %291, %292 : vector<8x128xf32>
    %294 = math.tanh %288 : vector<8x128xf32>
    %295 = vector.extract_strided_slice %293 {offsets = [0, 0], sizes = [8, 32], strides = [1, 1]} : vector<8x128xf32> to vector<8x32xf32>
    %296 = vector.extract_strided_slice %293 {offsets = [0, 32], sizes = [8, 32], strides = [1, 1]} : vector<8x128xf32> to vector<8x32xf32>
    %297 = vector.extract_strided_slice %293 {offsets = [0, 96], sizes = [8, 32], strides = [1, 1]} : vector<8x128xf32> to vector<8x32xf32>
    %298 = vector.extract_strided_slice %294 {offsets = [0, 64], sizes = [8, 32], strides = [1, 1]} : vector<8x128xf32> to vector<8x32xf32>
    %299 = arith.mulf %296, %219 : vector<8x32xf32>
    %300 = arith.mulf %295, %298 : vector<8x32xf32>
    %301 = arith.addf %299, %300 : vector<8x32xf32>
    %302 = math.tanh %301 : vector<8x32xf32>
    %303 = arith.mulf %297, %302 : vector<8x32xf32>
    %304 = arith.truncf %242 : vector<8x32xf32> to vector<8x32xbf16>
    %cst_75 = arith.constant dense<0.000000e+00> : vector<8x128xf32>
    %305 = tpu.matmul %304, %14, %cst_75 {dimension_numbers = #tpu.dot_dimension_numbers<[1], [0], [0], [1], [0, 0, 1, 1], [], []>} : vector<8x32xbf16>, vector<32x128xbf16>, vector<8x128xf32> -> vector<8x128xf32>
    %306 = arith.truncf %221 : vector<8x32xf32> to vector<8x32xbf16>
    %cst_76 = arith.constant dense<0.000000e+00> : vector<8x128xf32>
    %307 = tpu.matmul %306, %20, %cst_76 {dimension_numbers = #tpu.dot_dimension_numbers<[1], [0], [0], [1], [0, 0, 1, 1], [], []>} : vector<8x32xbf16>, vector<32x128xbf16>, vector<8x128xf32> -> vector<8x128xf32>
    %308 = arith.addf %307, %305 : vector<8x128xf32>
    %309 = arith.addf %308, %32 : vector<8x128xf32>
    %310 = arith.negf %309 : vector<8x128xf32>
    %311 = math.exp %310 : vector<8x128xf32>
    %cst_77 = arith.constant 1.000000e+00 : f32
    %312 = vector.broadcast %cst_77 : f32 to vector<8x128xf32>
    %313 = arith.addf %312, %311 : vector<8x128xf32>
    %314 = arith.divf %312, %313 : vector<8x128xf32>
    %315 = math.tanh %309 : vector<8x128xf32>
    %316 = vector.extract_strided_slice %314 {offsets = [0, 0], sizes = [8, 32], strides = [1, 1]} : vector<8x128xf32> to vector<8x32xf32>
    %317 = vector.extract_strided_slice %314 {offsets = [0, 32], sizes = [8, 32], strides = [1, 1]} : vector<8x128xf32> to vector<8x32xf32>
    %318 = vector.extract_strided_slice %314 {offsets = [0, 96], sizes = [8, 32], strides = [1, 1]} : vector<8x128xf32> to vector<8x32xf32>
    %319 = vector.extract_strided_slice %315 {offsets = [0, 64], sizes = [8, 32], strides = [1, 1]} : vector<8x128xf32> to vector<8x32xf32>
    %320 = arith.mulf %317, %240 : vector<8x32xf32>
    %321 = arith.mulf %316, %319 : vector<8x32xf32>
    %322 = arith.addf %320, %321 : vector<8x32xf32>
    %323 = math.tanh %322 : vector<8x32xf32>
    %324 = arith.mulf %318, %323 : vector<8x32xf32>
    %325 = arith.truncf %261 : vector<8x32xf32> to vector<8x32xbf16>
    %cst_78 = arith.constant dense<0.000000e+00> : vector<8x128xf32>
    %326 = tpu.matmul %325, %8, %cst_78 {dimension_numbers = #tpu.dot_dimension_numbers<[1], [0], [0], [1], [0, 0, 1, 1], [], []>} : vector<8x32xbf16>, vector<32x128xbf16>, vector<8x128xf32> -> vector<8x128xf32>
    %327 = vector.extract_strided_slice %6 {offsets = [40, 0], sizes = [8, 128], strides = [1, 1]} : vector<64x128xf32> to vector<8x128xf32>
    %328 = arith.addf %327, %326 : vector<8x128xf32>
    %329 = arith.negf %328 : vector<8x128xf32>
    %330 = math.exp %329 : vector<8x128xf32>
    %cst_79 = arith.constant 1.000000e+00 : f32
    %331 = vector.broadcast %cst_79 : f32 to vector<8x128xf32>
    %332 = arith.addf %331, %330 : vector<8x128xf32>
    %333 = arith.divf %331, %332 : vector<8x128xf32>
    %334 = math.tanh %328 : vector<8x128xf32>
    %335 = vector.extract_strided_slice %333 {offsets = [0, 0], sizes = [8, 32], strides = [1, 1]} : vector<8x128xf32> to vector<8x32xf32>
    %336 = vector.extract_strided_slice %333 {offsets = [0, 32], sizes = [8, 32], strides = [1, 1]} : vector<8x128xf32> to vector<8x32xf32>
    %337 = vector.extract_strided_slice %333 {offsets = [0, 96], sizes = [8, 32], strides = [1, 1]} : vector<8x128xf32> to vector<8x32xf32>
    %338 = vector.extract_strided_slice %334 {offsets = [0, 64], sizes = [8, 32], strides = [1, 1]} : vector<8x128xf32> to vector<8x32xf32>
    %339 = arith.mulf %336, %259 : vector<8x32xf32>
    %340 = arith.mulf %335, %338 : vector<8x32xf32>
    %341 = arith.addf %339, %340 : vector<8x32xf32>
    %342 = math.tanh %341 : vector<8x32xf32>
    %343 = arith.mulf %337, %342 : vector<8x32xf32>
    %344 = arith.truncf %282 : vector<8x32xf32> to vector<8x32xbf16>
    %cst_80 = arith.constant dense<0.000000e+00> : vector<8x128xf32>
    %345 = tpu.matmul %344, %10, %cst_80 {dimension_numbers = #tpu.dot_dimension_numbers<[1], [0], [0], [1], [0, 0, 1, 1], [], []>} : vector<8x32xbf16>, vector<32x128xbf16>, vector<8x128xf32> -> vector<8x128xf32>
    %346 = arith.truncf %261 : vector<8x32xf32> to vector<8x32xbf16>
    %cst_81 = arith.constant dense<0.000000e+00> : vector<8x128xf32>
    %347 = tpu.matmul %346, %16, %cst_81 {dimension_numbers = #tpu.dot_dimension_numbers<[1], [0], [0], [1], [0, 0, 1, 1], [], []>} : vector<8x32xbf16>, vector<32x128xbf16>, vector<8x128xf32> -> vector<8x128xf32>
    %348 = arith.addf %347, %345 : vector<8x128xf32>
    %349 = arith.addf %348, %24 : vector<8x128xf32>
    %350 = arith.negf %349 : vector<8x128xf32>
    %351 = math.exp %350 : vector<8x128xf32>
    %cst_82 = arith.constant 1.000000e+00 : f32
    %352 = vector.broadcast %cst_82 : f32 to vector<8x128xf32>
    %353 = arith.addf %352, %351 : vector<8x128xf32>
    %354 = arith.divf %352, %353 : vector<8x128xf32>
    %355 = math.tanh %349 : vector<8x128xf32>
    %356 = vector.extract_strided_slice %354 {offsets = [0, 0], sizes = [8, 32], strides = [1, 1]} : vector<8x128xf32> to vector<8x32xf32>
    %357 = vector.extract_strided_slice %354 {offsets = [0, 32], sizes = [8, 32], strides = [1, 1]} : vector<8x128xf32> to vector<8x32xf32>
    %358 = vector.extract_strided_slice %354 {offsets = [0, 96], sizes = [8, 32], strides = [1, 1]} : vector<8x128xf32> to vector<8x32xf32>
    %359 = vector.extract_strided_slice %355 {offsets = [0, 64], sizes = [8, 32], strides = [1, 1]} : vector<8x128xf32> to vector<8x32xf32>
    %360 = arith.mulf %357, %280 : vector<8x32xf32>
    %361 = arith.mulf %356, %359 : vector<8x32xf32>
    %362 = arith.addf %360, %361 : vector<8x32xf32>
    %363 = math.tanh %362 : vector<8x32xf32>
    %364 = arith.mulf %358, %363 : vector<8x32xf32>
    %365 = arith.truncf %303 : vector<8x32xf32> to vector<8x32xbf16>
    %cst_83 = arith.constant dense<0.000000e+00> : vector<8x128xf32>
    %366 = tpu.matmul %365, %12, %cst_83 {dimension_numbers = #tpu.dot_dimension_numbers<[1], [0], [0], [1], [0, 0, 1, 1], [], []>} : vector<8x32xbf16>, vector<32x128xbf16>, vector<8x128xf32> -> vector<8x128xf32>
    %367 = arith.truncf %282 : vector<8x32xf32> to vector<8x32xbf16>
    %cst_84 = arith.constant dense<0.000000e+00> : vector<8x128xf32>
    %368 = tpu.matmul %367, %18, %cst_84 {dimension_numbers = #tpu.dot_dimension_numbers<[1], [0], [0], [1], [0, 0, 1, 1], [], []>} : vector<8x32xbf16>, vector<32x128xbf16>, vector<8x128xf32> -> vector<8x128xf32>
    %369 = arith.addf %368, %366 : vector<8x128xf32>
    %370 = arith.addf %369, %28 : vector<8x128xf32>
    %371 = arith.negf %370 : vector<8x128xf32>
    %372 = math.exp %371 : vector<8x128xf32>
    %cst_85 = arith.constant 1.000000e+00 : f32
    %373 = vector.broadcast %cst_85 : f32 to vector<8x128xf32>
    %374 = arith.addf %373, %372 : vector<8x128xf32>
    %375 = arith.divf %373, %374 : vector<8x128xf32>
    %376 = math.tanh %370 : vector<8x128xf32>
    %377 = vector.extract_strided_slice %375 {offsets = [0, 0], sizes = [8, 32], strides = [1, 1]} : vector<8x128xf32> to vector<8x32xf32>
    %378 = vector.extract_strided_slice %375 {offsets = [0, 32], sizes = [8, 32], strides = [1, 1]} : vector<8x128xf32> to vector<8x32xf32>
    %379 = vector.extract_strided_slice %375 {offsets = [0, 96], sizes = [8, 32], strides = [1, 1]} : vector<8x128xf32> to vector<8x32xf32>
    %380 = vector.extract_strided_slice %376 {offsets = [0, 64], sizes = [8, 32], strides = [1, 1]} : vector<8x128xf32> to vector<8x32xf32>
    %381 = arith.mulf %378, %301 : vector<8x32xf32>
    %382 = arith.mulf %377, %380 : vector<8x32xf32>
    %383 = arith.addf %381, %382 : vector<8x32xf32>
    %384 = math.tanh %383 : vector<8x32xf32>
    %385 = arith.mulf %379, %384 : vector<8x32xf32>
    %386 = arith.truncf %324 : vector<8x32xf32> to vector<8x32xbf16>
    %cst_86 = arith.constant dense<0.000000e+00> : vector<8x128xf32>
    %387 = tpu.matmul %386, %14, %cst_86 {dimension_numbers = #tpu.dot_dimension_numbers<[1], [0], [0], [1], [0, 0, 1, 1], [], []>} : vector<8x32xbf16>, vector<32x128xbf16>, vector<8x128xf32> -> vector<8x128xf32>
    %388 = arith.truncf %303 : vector<8x32xf32> to vector<8x32xbf16>
    %cst_87 = arith.constant dense<0.000000e+00> : vector<8x128xf32>
    %389 = tpu.matmul %388, %20, %cst_87 {dimension_numbers = #tpu.dot_dimension_numbers<[1], [0], [0], [1], [0, 0, 1, 1], [], []>} : vector<8x32xbf16>, vector<32x128xbf16>, vector<8x128xf32> -> vector<8x128xf32>
    %390 = arith.addf %389, %387 : vector<8x128xf32>
    %391 = arith.addf %390, %32 : vector<8x128xf32>
    %392 = arith.negf %391 : vector<8x128xf32>
    %393 = math.exp %392 : vector<8x128xf32>
    %cst_88 = arith.constant 1.000000e+00 : f32
    %394 = vector.broadcast %cst_88 : f32 to vector<8x128xf32>
    %395 = arith.addf %394, %393 : vector<8x128xf32>
    %396 = arith.divf %394, %395 : vector<8x128xf32>
    %397 = math.tanh %391 : vector<8x128xf32>
    %398 = vector.extract_strided_slice %396 {offsets = [0, 0], sizes = [8, 32], strides = [1, 1]} : vector<8x128xf32> to vector<8x32xf32>
    %399 = vector.extract_strided_slice %396 {offsets = [0, 32], sizes = [8, 32], strides = [1, 1]} : vector<8x128xf32> to vector<8x32xf32>
    %400 = vector.extract_strided_slice %396 {offsets = [0, 96], sizes = [8, 32], strides = [1, 1]} : vector<8x128xf32> to vector<8x32xf32>
    %401 = vector.extract_strided_slice %397 {offsets = [0, 64], sizes = [8, 32], strides = [1, 1]} : vector<8x128xf32> to vector<8x32xf32>
    %402 = arith.mulf %399, %322 : vector<8x32xf32>
    %403 = arith.mulf %398, %401 : vector<8x32xf32>
    %404 = arith.addf %402, %403 : vector<8x32xf32>
    %405 = math.tanh %404 : vector<8x32xf32>
    %406 = arith.mulf %400, %405 : vector<8x32xf32>
    %407 = arith.truncf %343 : vector<8x32xf32> to vector<8x32xbf16>
    %cst_89 = arith.constant dense<0.000000e+00> : vector<8x128xf32>
    %408 = tpu.matmul %407, %8, %cst_89 {dimension_numbers = #tpu.dot_dimension_numbers<[1], [0], [0], [1], [0, 0, 1, 1], [], []>} : vector<8x32xbf16>, vector<32x128xbf16>, vector<8x128xf32> -> vector<8x128xf32>
    %409 = vector.extract_strided_slice %6 {offsets = [48, 0], sizes = [8, 128], strides = [1, 1]} : vector<64x128xf32> to vector<8x128xf32>
    %410 = arith.addf %409, %408 : vector<8x128xf32>
    %411 = arith.negf %410 : vector<8x128xf32>
    %412 = math.exp %411 : vector<8x128xf32>
    %cst_90 = arith.constant 1.000000e+00 : f32
    %413 = vector.broadcast %cst_90 : f32 to vector<8x128xf32>
    %414 = arith.addf %413, %412 : vector<8x128xf32>
    %415 = arith.divf %413, %414 : vector<8x128xf32>
    %416 = math.tanh %410 : vector<8x128xf32>
    %417 = vector.extract_strided_slice %415 {offsets = [0, 0], sizes = [8, 32], strides = [1, 1]} : vector<8x128xf32> to vector<8x32xf32>
    %418 = vector.extract_strided_slice %415 {offsets = [0, 32], sizes = [8, 32], strides = [1, 1]} : vector<8x128xf32> to vector<8x32xf32>
    %419 = vector.extract_strided_slice %415 {offsets = [0, 96], sizes = [8, 32], strides = [1, 1]} : vector<8x128xf32> to vector<8x32xf32>
    %420 = vector.extract_strided_slice %416 {offsets = [0, 64], sizes = [8, 32], strides = [1, 1]} : vector<8x128xf32> to vector<8x32xf32>
    %421 = arith.mulf %418, %341 : vector<8x32xf32>
    %422 = arith.mulf %417, %420 : vector<8x32xf32>
    %423 = arith.addf %421, %422 : vector<8x32xf32>
    %424 = math.tanh %423 : vector<8x32xf32>
    %425 = arith.mulf %419, %424 : vector<8x32xf32>
    %426 = arith.truncf %364 : vector<8x32xf32> to vector<8x32xbf16>
    %cst_91 = arith.constant dense<0.000000e+00> : vector<8x128xf32>
    %427 = tpu.matmul %426, %10, %cst_91 {dimension_numbers = #tpu.dot_dimension_numbers<[1], [0], [0], [1], [0, 0, 1, 1], [], []>} : vector<8x32xbf16>, vector<32x128xbf16>, vector<8x128xf32> -> vector<8x128xf32>
    %428 = arith.truncf %343 : vector<8x32xf32> to vector<8x32xbf16>
    %cst_92 = arith.constant dense<0.000000e+00> : vector<8x128xf32>
    %429 = tpu.matmul %428, %16, %cst_92 {dimension_numbers = #tpu.dot_dimension_numbers<[1], [0], [0], [1], [0, 0, 1, 1], [], []>} : vector<8x32xbf16>, vector<32x128xbf16>, vector<8x128xf32> -> vector<8x128xf32>
    %430 = arith.addf %429, %427 : vector<8x128xf32>
    %431 = arith.addf %430, %24 : vector<8x128xf32>
    %432 = arith.negf %431 : vector<8x128xf32>
    %433 = math.exp %432 : vector<8x128xf32>
    %cst_93 = arith.constant 1.000000e+00 : f32
    %434 = vector.broadcast %cst_93 : f32 to vector<8x128xf32>
    %435 = arith.addf %434, %433 : vector<8x128xf32>
    %436 = arith.divf %434, %435 : vector<8x128xf32>
    %437 = math.tanh %431 : vector<8x128xf32>
    %438 = vector.extract_strided_slice %436 {offsets = [0, 0], sizes = [8, 32], strides = [1, 1]} : vector<8x128xf32> to vector<8x32xf32>
    %439 = vector.extract_strided_slice %436 {offsets = [0, 32], sizes = [8, 32], strides = [1, 1]} : vector<8x128xf32> to vector<8x32xf32>
    %440 = vector.extract_strided_slice %436 {offsets = [0, 96], sizes = [8, 32], strides = [1, 1]} : vector<8x128xf32> to vector<8x32xf32>
    %441 = vector.extract_strided_slice %437 {offsets = [0, 64], sizes = [8, 32], strides = [1, 1]} : vector<8x128xf32> to vector<8x32xf32>
    %442 = arith.mulf %439, %362 : vector<8x32xf32>
    %443 = arith.mulf %438, %441 : vector<8x32xf32>
    %444 = arith.addf %442, %443 : vector<8x32xf32>
    %445 = math.tanh %444 : vector<8x32xf32>
    %446 = arith.mulf %440, %445 : vector<8x32xf32>
    %447 = arith.truncf %385 : vector<8x32xf32> to vector<8x32xbf16>
    %cst_94 = arith.constant dense<0.000000e+00> : vector<8x128xf32>
    %448 = tpu.matmul %447, %12, %cst_94 {dimension_numbers = #tpu.dot_dimension_numbers<[1], [0], [0], [1], [0, 0, 1, 1], [], []>} : vector<8x32xbf16>, vector<32x128xbf16>, vector<8x128xf32> -> vector<8x128xf32>
    %449 = arith.truncf %364 : vector<8x32xf32> to vector<8x32xbf16>
    %cst_95 = arith.constant dense<0.000000e+00> : vector<8x128xf32>
    %450 = tpu.matmul %449, %18, %cst_95 {dimension_numbers = #tpu.dot_dimension_numbers<[1], [0], [0], [1], [0, 0, 1, 1], [], []>} : vector<8x32xbf16>, vector<32x128xbf16>, vector<8x128xf32> -> vector<8x128xf32>
    %451 = arith.addf %450, %448 : vector<8x128xf32>
    %452 = arith.addf %451, %28 : vector<8x128xf32>
    %453 = arith.negf %452 : vector<8x128xf32>
    %454 = math.exp %453 : vector<8x128xf32>
    %cst_96 = arith.constant 1.000000e+00 : f32
    %455 = vector.broadcast %cst_96 : f32 to vector<8x128xf32>
    %456 = arith.addf %455, %454 : vector<8x128xf32>
    %457 = arith.divf %455, %456 : vector<8x128xf32>
    %458 = math.tanh %452 : vector<8x128xf32>
    %459 = vector.extract_strided_slice %457 {offsets = [0, 0], sizes = [8, 32], strides = [1, 1]} : vector<8x128xf32> to vector<8x32xf32>
    %460 = vector.extract_strided_slice %457 {offsets = [0, 32], sizes = [8, 32], strides = [1, 1]} : vector<8x128xf32> to vector<8x32xf32>
    %461 = vector.extract_strided_slice %457 {offsets = [0, 96], sizes = [8, 32], strides = [1, 1]} : vector<8x128xf32> to vector<8x32xf32>
    %462 = vector.extract_strided_slice %458 {offsets = [0, 64], sizes = [8, 32], strides = [1, 1]} : vector<8x128xf32> to vector<8x32xf32>
    %463 = arith.mulf %460, %383 : vector<8x32xf32>
    %464 = arith.mulf %459, %462 : vector<8x32xf32>
    %465 = arith.addf %463, %464 : vector<8x32xf32>
    %466 = math.tanh %465 : vector<8x32xf32>
    %467 = arith.mulf %461, %466 : vector<8x32xf32>
    %468 = arith.truncf %406 : vector<8x32xf32> to vector<8x32xbf16>
    %cst_97 = arith.constant dense<0.000000e+00> : vector<8x128xf32>
    %469 = tpu.matmul %468, %14, %cst_97 {dimension_numbers = #tpu.dot_dimension_numbers<[1], [0], [0], [1], [0, 0, 1, 1], [], []>} : vector<8x32xbf16>, vector<32x128xbf16>, vector<8x128xf32> -> vector<8x128xf32>
    %470 = arith.truncf %385 : vector<8x32xf32> to vector<8x32xbf16>
    %cst_98 = arith.constant dense<0.000000e+00> : vector<8x128xf32>
    %471 = tpu.matmul %470, %20, %cst_98 {dimension_numbers = #tpu.dot_dimension_numbers<[1], [0], [0], [1], [0, 0, 1, 1], [], []>} : vector<8x32xbf16>, vector<32x128xbf16>, vector<8x128xf32> -> vector<8x128xf32>
    %472 = arith.addf %471, %469 : vector<8x128xf32>
    %473 = arith.addf %472, %32 : vector<8x128xf32>
    %474 = arith.negf %473 : vector<8x128xf32>
    %475 = math.exp %474 : vector<8x128xf32>
    %cst_99 = arith.constant 1.000000e+00 : f32
    %476 = vector.broadcast %cst_99 : f32 to vector<8x128xf32>
    %477 = arith.addf %476, %475 : vector<8x128xf32>
    %478 = arith.divf %476, %477 : vector<8x128xf32>
    %479 = math.tanh %473 : vector<8x128xf32>
    %480 = vector.extract_strided_slice %478 {offsets = [0, 0], sizes = [8, 32], strides = [1, 1]} : vector<8x128xf32> to vector<8x32xf32>
    %481 = vector.extract_strided_slice %478 {offsets = [0, 32], sizes = [8, 32], strides = [1, 1]} : vector<8x128xf32> to vector<8x32xf32>
    %482 = vector.extract_strided_slice %478 {offsets = [0, 96], sizes = [8, 32], strides = [1, 1]} : vector<8x128xf32> to vector<8x32xf32>
    %483 = vector.extract_strided_slice %479 {offsets = [0, 64], sizes = [8, 32], strides = [1, 1]} : vector<8x128xf32> to vector<8x32xf32>
    %484 = arith.mulf %481, %404 : vector<8x32xf32>
    %485 = arith.mulf %480, %483 : vector<8x32xf32>
    %486 = arith.addf %484, %485 : vector<8x32xf32>
    %487 = math.tanh %486 : vector<8x32xf32>
    %488 = arith.mulf %482, %487 : vector<8x32xf32>
    %489 = arith.truncf %425 : vector<8x32xf32> to vector<8x32xbf16>
    %cst_100 = arith.constant dense<0.000000e+00> : vector<8x128xf32>
    %490 = tpu.matmul %489, %8, %cst_100 {dimension_numbers = #tpu.dot_dimension_numbers<[1], [0], [0], [1], [0, 0, 1, 1], [], []>} : vector<8x32xbf16>, vector<32x128xbf16>, vector<8x128xf32> -> vector<8x128xf32>
    %491 = vector.extract_strided_slice %6 {offsets = [56, 0], sizes = [8, 128], strides = [1, 1]} : vector<64x128xf32> to vector<8x128xf32>
    %492 = arith.addf %491, %490 : vector<8x128xf32>
    %493 = arith.negf %492 : vector<8x128xf32>
    %494 = math.exp %493 : vector<8x128xf32>
    %cst_101 = arith.constant 1.000000e+00 : f32
    %495 = vector.broadcast %cst_101 : f32 to vector<8x128xf32>
    %496 = arith.addf %495, %494 : vector<8x128xf32>
    %497 = arith.divf %495, %496 : vector<8x128xf32>
    %498 = math.tanh %492 : vector<8x128xf32>
    %499 = vector.extract_strided_slice %497 {offsets = [0, 0], sizes = [8, 32], strides = [1, 1]} : vector<8x128xf32> to vector<8x32xf32>
    %500 = vector.extract_strided_slice %497 {offsets = [0, 32], sizes = [8, 32], strides = [1, 1]} : vector<8x128xf32> to vector<8x32xf32>
    %501 = vector.extract_strided_slice %497 {offsets = [0, 96], sizes = [8, 32], strides = [1, 1]} : vector<8x128xf32> to vector<8x32xf32>
    %502 = vector.extract_strided_slice %498 {offsets = [0, 64], sizes = [8, 32], strides = [1, 1]} : vector<8x128xf32> to vector<8x32xf32>
    %503 = arith.mulf %500, %423 : vector<8x32xf32>
    %504 = arith.mulf %499, %502 : vector<8x32xf32>
    %505 = arith.addf %503, %504 : vector<8x32xf32>
    %506 = math.tanh %505 : vector<8x32xf32>
    %507 = arith.mulf %501, %506 : vector<8x32xf32>
    %508 = arith.truncf %446 : vector<8x32xf32> to vector<8x32xbf16>
    %cst_102 = arith.constant dense<0.000000e+00> : vector<8x128xf32>
    %509 = tpu.matmul %508, %10, %cst_102 {dimension_numbers = #tpu.dot_dimension_numbers<[1], [0], [0], [1], [0, 0, 1, 1], [], []>} : vector<8x32xbf16>, vector<32x128xbf16>, vector<8x128xf32> -> vector<8x128xf32>
    %510 = arith.truncf %425 : vector<8x32xf32> to vector<8x32xbf16>
    %cst_103 = arith.constant dense<0.000000e+00> : vector<8x128xf32>
    %511 = tpu.matmul %510, %16, %cst_103 {dimension_numbers = #tpu.dot_dimension_numbers<[1], [0], [0], [1], [0, 0, 1, 1], [], []>} : vector<8x32xbf16>, vector<32x128xbf16>, vector<8x128xf32> -> vector<8x128xf32>
    %512 = arith.addf %511, %509 : vector<8x128xf32>
    %513 = arith.addf %512, %24 : vector<8x128xf32>
    %514 = arith.negf %513 : vector<8x128xf32>
    %515 = math.exp %514 : vector<8x128xf32>
    %cst_104 = arith.constant 1.000000e+00 : f32
    %516 = vector.broadcast %cst_104 : f32 to vector<8x128xf32>
    %517 = arith.addf %516, %515 : vector<8x128xf32>
    %518 = arith.divf %516, %517 : vector<8x128xf32>
    %519 = math.tanh %513 : vector<8x128xf32>
    %520 = vector.extract_strided_slice %518 {offsets = [0, 0], sizes = [8, 32], strides = [1, 1]} : vector<8x128xf32> to vector<8x32xf32>
    %521 = vector.extract_strided_slice %518 {offsets = [0, 32], sizes = [8, 32], strides = [1, 1]} : vector<8x128xf32> to vector<8x32xf32>
    %522 = vector.extract_strided_slice %518 {offsets = [0, 96], sizes = [8, 32], strides = [1, 1]} : vector<8x128xf32> to vector<8x32xf32>
    %523 = vector.extract_strided_slice %519 {offsets = [0, 64], sizes = [8, 32], strides = [1, 1]} : vector<8x128xf32> to vector<8x32xf32>
    %524 = arith.mulf %521, %444 : vector<8x32xf32>
    %525 = arith.mulf %520, %523 : vector<8x32xf32>
    %526 = arith.addf %524, %525 : vector<8x32xf32>
    %527 = math.tanh %526 : vector<8x32xf32>
    %528 = arith.mulf %522, %527 : vector<8x32xf32>
    %529 = arith.truncf %467 : vector<8x32xf32> to vector<8x32xbf16>
    %cst_105 = arith.constant dense<0.000000e+00> : vector<8x128xf32>
    %530 = tpu.matmul %529, %12, %cst_105 {dimension_numbers = #tpu.dot_dimension_numbers<[1], [0], [0], [1], [0, 0, 1, 1], [], []>} : vector<8x32xbf16>, vector<32x128xbf16>, vector<8x128xf32> -> vector<8x128xf32>
    %531 = arith.truncf %446 : vector<8x32xf32> to vector<8x32xbf16>
    %cst_106 = arith.constant dense<0.000000e+00> : vector<8x128xf32>
    %532 = tpu.matmul %531, %18, %cst_106 {dimension_numbers = #tpu.dot_dimension_numbers<[1], [0], [0], [1], [0, 0, 1, 1], [], []>} : vector<8x32xbf16>, vector<32x128xbf16>, vector<8x128xf32> -> vector<8x128xf32>
    %533 = arith.addf %532, %530 : vector<8x128xf32>
    %534 = arith.addf %533, %28 : vector<8x128xf32>
    %535 = arith.negf %534 : vector<8x128xf32>
    %536 = math.exp %535 : vector<8x128xf32>
    %cst_107 = arith.constant 1.000000e+00 : f32
    %537 = vector.broadcast %cst_107 : f32 to vector<8x128xf32>
    %538 = arith.addf %537, %536 : vector<8x128xf32>
    %539 = arith.divf %537, %538 : vector<8x128xf32>
    %540 = math.tanh %534 : vector<8x128xf32>
    %541 = vector.extract_strided_slice %539 {offsets = [0, 0], sizes = [8, 32], strides = [1, 1]} : vector<8x128xf32> to vector<8x32xf32>
    %542 = vector.extract_strided_slice %539 {offsets = [0, 32], sizes = [8, 32], strides = [1, 1]} : vector<8x128xf32> to vector<8x32xf32>
    %543 = vector.extract_strided_slice %539 {offsets = [0, 96], sizes = [8, 32], strides = [1, 1]} : vector<8x128xf32> to vector<8x32xf32>
    %544 = vector.extract_strided_slice %540 {offsets = [0, 64], sizes = [8, 32], strides = [1, 1]} : vector<8x128xf32> to vector<8x32xf32>
    %545 = arith.mulf %542, %465 : vector<8x32xf32>
    %546 = arith.mulf %541, %544 : vector<8x32xf32>
    %547 = arith.addf %545, %546 : vector<8x32xf32>
    %548 = math.tanh %547 : vector<8x32xf32>
    %549 = arith.mulf %543, %548 : vector<8x32xf32>
    %550 = arith.truncf %488 : vector<8x32xf32> to vector<8x32xbf16>
    %cst_108 = arith.constant dense<0.000000e+00> : vector<8x128xf32>
    %551 = tpu.matmul %550, %14, %cst_108 {dimension_numbers = #tpu.dot_dimension_numbers<[1], [0], [0], [1], [0, 0, 1, 1], [], []>} : vector<8x32xbf16>, vector<32x128xbf16>, vector<8x128xf32> -> vector<8x128xf32>
    %552 = arith.truncf %467 : vector<8x32xf32> to vector<8x32xbf16>
    %cst_109 = arith.constant dense<0.000000e+00> : vector<8x128xf32>
    %553 = tpu.matmul %552, %20, %cst_109 {dimension_numbers = #tpu.dot_dimension_numbers<[1], [0], [0], [1], [0, 0, 1, 1], [], []>} : vector<8x32xbf16>, vector<32x128xbf16>, vector<8x128xf32> -> vector<8x128xf32>
    %554 = arith.addf %553, %551 : vector<8x128xf32>
    %555 = arith.addf %554, %32 : vector<8x128xf32>
    %556 = arith.negf %555 : vector<8x128xf32>
    %557 = math.exp %556 : vector<8x128xf32>
    %cst_110 = arith.constant 1.000000e+00 : f32
    %558 = vector.broadcast %cst_110 : f32 to vector<8x128xf32>
    %559 = arith.addf %558, %557 : vector<8x128xf32>
    %560 = arith.divf %558, %559 : vector<8x128xf32>
    %561 = math.tanh %555 : vector<8x128xf32>
    %562 = vector.extract_strided_slice %560 {offsets = [0, 0], sizes = [8, 32], strides = [1, 1]} : vector<8x128xf32> to vector<8x32xf32>
    %563 = vector.extract_strided_slice %560 {offsets = [0, 32], sizes = [8, 32], strides = [1, 1]} : vector<8x128xf32> to vector<8x32xf32>
    %564 = vector.extract_strided_slice %560 {offsets = [0, 96], sizes = [8, 32], strides = [1, 1]} : vector<8x128xf32> to vector<8x32xf32>
    %565 = vector.extract_strided_slice %561 {offsets = [0, 64], sizes = [8, 32], strides = [1, 1]} : vector<8x128xf32> to vector<8x32xf32>
    %566 = arith.mulf %563, %486 : vector<8x32xf32>
    %567 = arith.mulf %562, %565 : vector<8x32xf32>
    %568 = arith.addf %566, %567 : vector<8x32xf32>
    %569 = math.tanh %568 : vector<8x32xf32>
    %570 = arith.mulf %564, %569 : vector<8x32xf32>
    %571 = arith.truncf %528 : vector<8x32xf32> to vector<8x32xbf16>
    %cst_111 = arith.constant dense<0.000000e+00> : vector<8x128xf32>
    %572 = tpu.matmul %571, %10, %cst_111 {dimension_numbers = #tpu.dot_dimension_numbers<[1], [0], [0], [1], [0, 0, 1, 1], [], []>} : vector<8x32xbf16>, vector<32x128xbf16>, vector<8x128xf32> -> vector<8x128xf32>
    %573 = arith.truncf %507 : vector<8x32xf32> to vector<8x32xbf16>
    %cst_112 = arith.constant dense<0.000000e+00> : vector<8x128xf32>
    %574 = tpu.matmul %573, %16, %cst_112 {dimension_numbers = #tpu.dot_dimension_numbers<[1], [0], [0], [1], [0, 0, 1, 1], [], []>} : vector<8x32xbf16>, vector<32x128xbf16>, vector<8x128xf32> -> vector<8x128xf32>
    %575 = arith.addf %574, %572 : vector<8x128xf32>
    %576 = arith.addf %575, %24 : vector<8x128xf32>
    %577 = arith.negf %576 : vector<8x128xf32>
    %578 = math.exp %577 : vector<8x128xf32>
    %cst_113 = arith.constant 1.000000e+00 : f32
    %579 = vector.broadcast %cst_113 : f32 to vector<8x128xf32>
    %580 = arith.addf %579, %578 : vector<8x128xf32>
    %581 = arith.divf %579, %580 : vector<8x128xf32>
    %582 = math.tanh %576 : vector<8x128xf32>
    %583 = vector.extract_strided_slice %581 {offsets = [0, 0], sizes = [8, 32], strides = [1, 1]} : vector<8x128xf32> to vector<8x32xf32>
    %584 = vector.extract_strided_slice %581 {offsets = [0, 32], sizes = [8, 32], strides = [1, 1]} : vector<8x128xf32> to vector<8x32xf32>
    %585 = vector.extract_strided_slice %581 {offsets = [0, 96], sizes = [8, 32], strides = [1, 1]} : vector<8x128xf32> to vector<8x32xf32>
    %586 = vector.extract_strided_slice %582 {offsets = [0, 64], sizes = [8, 32], strides = [1, 1]} : vector<8x128xf32> to vector<8x32xf32>
    %587 = arith.mulf %584, %526 : vector<8x32xf32>
    %588 = arith.mulf %583, %586 : vector<8x32xf32>
    %589 = arith.addf %587, %588 : vector<8x32xf32>
    %590 = math.tanh %589 : vector<8x32xf32>
    %591 = arith.mulf %585, %590 : vector<8x32xf32>
    %592 = arith.truncf %549 : vector<8x32xf32> to vector<8x32xbf16>
    %cst_114 = arith.constant dense<0.000000e+00> : vector<8x128xf32>
    %593 = tpu.matmul %592, %12, %cst_114 {dimension_numbers = #tpu.dot_dimension_numbers<[1], [0], [0], [1], [0, 0, 1, 1], [], []>} : vector<8x32xbf16>, vector<32x128xbf16>, vector<8x128xf32> -> vector<8x128xf32>
    %594 = arith.truncf %528 : vector<8x32xf32> to vector<8x32xbf16>
    %cst_115 = arith.constant dense<0.000000e+00> : vector<8x128xf32>
    %595 = tpu.matmul %594, %18, %cst_115 {dimension_numbers = #tpu.dot_dimension_numbers<[1], [0], [0], [1], [0, 0, 1, 1], [], []>} : vector<8x32xbf16>, vector<32x128xbf16>, vector<8x128xf32> -> vector<8x128xf32>
    %596 = arith.addf %595, %593 : vector<8x128xf32>
    %597 = arith.addf %596, %28 : vector<8x128xf32>
    %598 = arith.negf %597 : vector<8x128xf32>
    %599 = math.exp %598 : vector<8x128xf32>
    %cst_116 = arith.constant 1.000000e+00 : f32
    %600 = vector.broadcast %cst_116 : f32 to vector<8x128xf32>
    %601 = arith.addf %600, %599 : vector<8x128xf32>
    %602 = arith.divf %600, %601 : vector<8x128xf32>
    %603 = math.tanh %597 : vector<8x128xf32>
    %604 = vector.extract_strided_slice %602 {offsets = [0, 0], sizes = [8, 32], strides = [1, 1]} : vector<8x128xf32> to vector<8x32xf32>
    %605 = vector.extract_strided_slice %602 {offsets = [0, 32], sizes = [8, 32], strides = [1, 1]} : vector<8x128xf32> to vector<8x32xf32>
    %606 = vector.extract_strided_slice %602 {offsets = [0, 96], sizes = [8, 32], strides = [1, 1]} : vector<8x128xf32> to vector<8x32xf32>
    %607 = vector.extract_strided_slice %603 {offsets = [0, 64], sizes = [8, 32], strides = [1, 1]} : vector<8x128xf32> to vector<8x32xf32>
    %608 = arith.mulf %605, %547 : vector<8x32xf32>
    %609 = arith.mulf %604, %607 : vector<8x32xf32>
    %610 = arith.addf %608, %609 : vector<8x32xf32>
    %611 = math.tanh %610 : vector<8x32xf32>
    %612 = arith.mulf %606, %611 : vector<8x32xf32>
    %613 = arith.truncf %570 : vector<8x32xf32> to vector<8x32xbf16>
    %cst_117 = arith.constant dense<0.000000e+00> : vector<8x128xf32>
    %614 = tpu.matmul %613, %14, %cst_117 {dimension_numbers = #tpu.dot_dimension_numbers<[1], [0], [0], [1], [0, 0, 1, 1], [], []>} : vector<8x32xbf16>, vector<32x128xbf16>, vector<8x128xf32> -> vector<8x128xf32>
    %615 = arith.truncf %549 : vector<8x32xf32> to vector<8x32xbf16>
    %cst_118 = arith.constant dense<0.000000e+00> : vector<8x128xf32>
    %616 = tpu.matmul %615, %20, %cst_118 {dimension_numbers = #tpu.dot_dimension_numbers<[1], [0], [0], [1], [0, 0, 1, 1], [], []>} : vector<8x32xbf16>, vector<32x128xbf16>, vector<8x128xf32> -> vector<8x128xf32>
    %617 = arith.addf %616, %614 : vector<8x128xf32>
    %618 = arith.addf %617, %32 : vector<8x128xf32>
    %619 = arith.negf %618 : vector<8x128xf32>
    %620 = math.exp %619 : vector<8x128xf32>
    %cst_119 = arith.constant 1.000000e+00 : f32
    %621 = vector.broadcast %cst_119 : f32 to vector<8x128xf32>
    %622 = arith.addf %621, %620 : vector<8x128xf32>
    %623 = arith.divf %621, %622 : vector<8x128xf32>
    %624 = math.tanh %618 : vector<8x128xf32>
    %625 = vector.extract_strided_slice %623 {offsets = [0, 0], sizes = [8, 32], strides = [1, 1]} : vector<8x128xf32> to vector<8x32xf32>
    %626 = vector.extract_strided_slice %623 {offsets = [0, 32], sizes = [8, 32], strides = [1, 1]} : vector<8x128xf32> to vector<8x32xf32>
    %627 = vector.extract_strided_slice %623 {offsets = [0, 96], sizes = [8, 32], strides = [1, 1]} : vector<8x128xf32> to vector<8x32xf32>
    %628 = vector.extract_strided_slice %624 {offsets = [0, 64], sizes = [8, 32], strides = [1, 1]} : vector<8x128xf32> to vector<8x32xf32>
    %629 = arith.mulf %626, %568 : vector<8x32xf32>
    %630 = arith.mulf %625, %628 : vector<8x32xf32>
    %631 = arith.addf %629, %630 : vector<8x32xf32>
    %632 = math.tanh %631 : vector<8x32xf32>
    %633 = arith.mulf %627, %632 : vector<8x32xf32>
    %634 = arith.truncf %612 : vector<8x32xf32> to vector<8x32xbf16>
    %cst_120 = arith.constant dense<0.000000e+00> : vector<8x128xf32>
    %635 = tpu.matmul %634, %12, %cst_120 {dimension_numbers = #tpu.dot_dimension_numbers<[1], [0], [0], [1], [0, 0, 1, 1], [], []>} : vector<8x32xbf16>, vector<32x128xbf16>, vector<8x128xf32> -> vector<8x128xf32>
    %636 = arith.truncf %591 : vector<8x32xf32> to vector<8x32xbf16>
    %cst_121 = arith.constant dense<0.000000e+00> : vector<8x128xf32>
    %637 = tpu.matmul %636, %18, %cst_121 {dimension_numbers = #tpu.dot_dimension_numbers<[1], [0], [0], [1], [0, 0, 1, 1], [], []>} : vector<8x32xbf16>, vector<32x128xbf16>, vector<8x128xf32> -> vector<8x128xf32>
    %638 = arith.addf %637, %635 : vector<8x128xf32>
    %639 = arith.addf %638, %28 : vector<8x128xf32>
    %640 = arith.negf %639 : vector<8x128xf32>
    %641 = math.exp %640 : vector<8x128xf32>
    %cst_122 = arith.constant 1.000000e+00 : f32
    %642 = vector.broadcast %cst_122 : f32 to vector<8x128xf32>
    %643 = arith.addf %642, %641 : vector<8x128xf32>
    %644 = arith.divf %642, %643 : vector<8x128xf32>
    %645 = math.tanh %639 : vector<8x128xf32>
    %646 = vector.extract_strided_slice %644 {offsets = [0, 0], sizes = [8, 32], strides = [1, 1]} : vector<8x128xf32> to vector<8x32xf32>
    %647 = vector.extract_strided_slice %644 {offsets = [0, 32], sizes = [8, 32], strides = [1, 1]} : vector<8x128xf32> to vector<8x32xf32>
    %648 = vector.extract_strided_slice %644 {offsets = [0, 96], sizes = [8, 32], strides = [1, 1]} : vector<8x128xf32> to vector<8x32xf32>
    %649 = vector.extract_strided_slice %645 {offsets = [0, 64], sizes = [8, 32], strides = [1, 1]} : vector<8x128xf32> to vector<8x32xf32>
    %650 = arith.mulf %647, %610 : vector<8x32xf32>
    %651 = arith.mulf %646, %649 : vector<8x32xf32>
    %652 = arith.addf %650, %651 : vector<8x32xf32>
    %653 = math.tanh %652 : vector<8x32xf32>
    %654 = arith.mulf %648, %653 : vector<8x32xf32>
    %655 = arith.truncf %633 : vector<8x32xf32> to vector<8x32xbf16>
    %cst_123 = arith.constant dense<0.000000e+00> : vector<8x128xf32>
    %656 = tpu.matmul %655, %14, %cst_123 {dimension_numbers = #tpu.dot_dimension_numbers<[1], [0], [0], [1], [0, 0, 1, 1], [], []>} : vector<8x32xbf16>, vector<32x128xbf16>, vector<8x128xf32> -> vector<8x128xf32>
    %657 = arith.truncf %612 : vector<8x32xf32> to vector<8x32xbf16>
    %cst_124 = arith.constant dense<0.000000e+00> : vector<8x128xf32>
    %658 = tpu.matmul %657, %20, %cst_124 {dimension_numbers = #tpu.dot_dimension_numbers<[1], [0], [0], [1], [0, 0, 1, 1], [], []>} : vector<8x32xbf16>, vector<32x128xbf16>, vector<8x128xf32> -> vector<8x128xf32>
    %659 = arith.addf %658, %656 : vector<8x128xf32>
    %660 = arith.addf %659, %32 : vector<8x128xf32>
    %661 = arith.negf %660 : vector<8x128xf32>
    %662 = math.exp %661 : vector<8x128xf32>
    %cst_125 = arith.constant 1.000000e+00 : f32
    %663 = vector.broadcast %cst_125 : f32 to vector<8x128xf32>
    %664 = arith.addf %663, %662 : vector<8x128xf32>
    %665 = arith.divf %663, %664 : vector<8x128xf32>
    %666 = math.tanh %660 : vector<8x128xf32>
    %667 = vector.extract_strided_slice %665 {offsets = [0, 0], sizes = [8, 32], strides = [1, 1]} : vector<8x128xf32> to vector<8x32xf32>
    %668 = vector.extract_strided_slice %665 {offsets = [0, 32], sizes = [8, 32], strides = [1, 1]} : vector<8x128xf32> to vector<8x32xf32>
    %669 = vector.extract_strided_slice %665 {offsets = [0, 96], sizes = [8, 32], strides = [1, 1]} : vector<8x128xf32> to vector<8x32xf32>
    %670 = vector.extract_strided_slice %666 {offsets = [0, 64], sizes = [8, 32], strides = [1, 1]} : vector<8x128xf32> to vector<8x32xf32>
    %671 = arith.mulf %668, %631 : vector<8x32xf32>
    %672 = arith.mulf %667, %670 : vector<8x32xf32>
    %673 = arith.addf %671, %672 : vector<8x32xf32>
    %674 = math.tanh %673 : vector<8x32xf32>
    %675 = arith.mulf %669, %674 : vector<8x32xf32>
    %676 = arith.truncf %675 : vector<8x32xf32> to vector<8x32xbf16>
    %cst_126 = arith.constant dense<0.000000e+00> : vector<8x128xf32>
    %677 = tpu.matmul %676, %14, %cst_126 {dimension_numbers = #tpu.dot_dimension_numbers<[1], [0], [0], [1], [0, 0, 1, 1], [], []>} : vector<8x32xbf16>, vector<32x128xbf16>, vector<8x128xf32> -> vector<8x128xf32>
    %678 = arith.truncf %654 : vector<8x32xf32> to vector<8x32xbf16>
    %cst_127 = arith.constant dense<0.000000e+00> : vector<8x128xf32>
    %679 = tpu.matmul %678, %20, %cst_127 {dimension_numbers = #tpu.dot_dimension_numbers<[1], [0], [0], [1], [0, 0, 1, 1], [], []>} : vector<8x32xbf16>, vector<32x128xbf16>, vector<8x128xf32> -> vector<8x128xf32>
    %680 = arith.addf %679, %677 : vector<8x128xf32>
    %681 = arith.addf %680, %32 : vector<8x128xf32>
    %682 = arith.negf %681 : vector<8x128xf32>
    %683 = math.exp %682 : vector<8x128xf32>
    %cst_128 = arith.constant 1.000000e+00 : f32
    %684 = vector.broadcast %cst_128 : f32 to vector<8x128xf32>
    %685 = arith.addf %684, %683 : vector<8x128xf32>
    %686 = arith.divf %684, %685 : vector<8x128xf32>
    %687 = math.tanh %681 : vector<8x128xf32>
    %688 = vector.extract_strided_slice %686 {offsets = [0, 0], sizes = [8, 32], strides = [1, 1]} : vector<8x128xf32> to vector<8x32xf32>
    %689 = vector.extract_strided_slice %686 {offsets = [0, 32], sizes = [8, 32], strides = [1, 1]} : vector<8x128xf32> to vector<8x32xf32>
    %690 = vector.extract_strided_slice %686 {offsets = [0, 96], sizes = [8, 32], strides = [1, 1]} : vector<8x128xf32> to vector<8x32xf32>
    %691 = vector.extract_strided_slice %687 {offsets = [0, 64], sizes = [8, 32], strides = [1, 1]} : vector<8x128xf32> to vector<8x32xf32>
    %692 = arith.mulf %689, %673 : vector<8x32xf32>
    %693 = arith.mulf %688, %691 : vector<8x32xf32>
    %694 = arith.addf %692, %693 : vector<8x32xf32>
    %695 = math.tanh %694 : vector<8x32xf32>
    %696 = arith.mulf %690, %695 : vector<8x32xf32>
    %697 = tpu.concatenate %507, %591, %654, %696 in 0 : vector<8x32xf32>, vector<8x32xf32>, vector<8x32xf32>, vector<8x32xf32> -> vector<32x32xf32>
    %cst_129 = arith.constant 0.000000e+00 : f32
    %698 = vector.broadcast %cst_129 : f32 to vector<32x32xf32>
    %699 = arith.maximumf %697, %698 : vector<32x32xf32>
    %700 = arith.truncf %699 : vector<32x32xf32> to vector<32x32xbf16>
    %c0_130 = arith.constant 0 : index
    %c0_131 = arith.constant 0 : index
    %701 = vector.load %arg5[%c0_130, %c0_131] : memref<32x784xbf16, #tpu.memory_space<vmem>>, vector<32x784xbf16>
    %cst_132 = arith.constant dense<0.000000e+00> : vector<32x784xf32>
    %702 = tpu.matmul %700, %701, %cst_132 {dimension_numbers = #tpu.dot_dimension_numbers<[1], [0], [0], [1], [0, 0, 1, 1], [], []>} : vector<32x32xbf16>, vector<32x784xbf16>, vector<32x784xf32> -> vector<32x784xf32>
    %c0_133 = arith.constant 0 : index
    %c0_134 = arith.constant 0 : index
    %703 = vector.load %arg6[%c0_133, %c0_134] : memref<1x784xf32, #tpu.memory_space<vmem>>, vector<1x784xf32>
    %704 = vector.broadcast %703 : vector<1x784xf32> to vector<32x784xf32>
    %705 = arith.addf %702, %704 : vector<32x784xf32>
    %cst_135 = arith.constant 0.000000e+00 : f32
    %706 = vector.broadcast %cst_135 : f32 to vector<32x784xf32>
    %707 = arith.maximumf %705, %706 : vector<32x784xf32>
    %708 = arith.truncf %707 : vector<32x784xf32> to vector<32x784xbf16>
    %c0_136 = arith.constant 0 : index
    %c0_137 = arith.constant 0 : index
    %709 = vector.load %arg7[%c0_136, %c0_137] : memref<784x16xbf16, #tpu.memory_space<vmem>>, vector<784x16xbf16>
    %cst_138 = arith.constant dense<0.000000e+00> : vector<32x16xf32>
    %710 = tpu.matmul %708, %709, %cst_138 {dimension_numbers = #tpu.dot_dimension_numbers<[1], [0], [0], [1], [0, 0, 1, 1], [], []>} : vector<32x784xbf16>, vector<784x16xbf16>, vector<32x16xf32> -> vector<32x16xf32>
    %c0_139 = arith.constant 0 : index
    %c0_140 = arith.constant 0 : index
    %711 = vector.load %arg8[%c0_139, %c0_140] : memref<1x16xf32, #tpu.memory_space<vmem>>, vector<1x16xf32>
    %712 = vector.broadcast %711 : vector<1x16xf32> to vector<32x16xf32>
    %713 = arith.addf %710, %712 : vector<32x16xf32>
    %c0_141 = arith.constant 0 : index
    %c0_142 = arith.constant 0 : index
    %714 = vector.load %arg9[%c0_141, %c0_142] : memref<32x16xf32, #tpu.memory_space<vmem>>, vector<32x16xf32>
    tpu.vector_store %arg9[%c0_141, %c0_142], %713 {strides = array<i32>} : memref<32x16xf32, #tpu.memory_space<vmem>>, vector<32x16xf32>,
    return
  }
}

</mosaic_0001>

<bundles_post_ra>
// kernel: lstm_model_forward.1
= control target key start
LH: loop header
LB: loop body
LE: loop exit
PB: predicated region body
PF: predicated region fallthrough
CT: control target
= control target key end

     0   :  { %vm76_vm0 = vcmask 130048   ;;  %v5869_v1 = vmov 0.0   ;;  %vm5870_vm1 = vmmov 0   ;;  %v5871_v8 = vmov 0   ;;  %s5872_s23 = smov 64   ;;  %s5873_s24 = smov 32   ;;  %s7102_s1 = inlined_call_operand.vmem [shape: bf16[16,128], index: 1, kind: input, shape index: {}]   ;;  %s7103_s0 = inlined_call_operand.vmem [shape: bf16[64,16], index: 0, kind: input, shape index: {}]   ;;  %s7104_s3 = inlined_call_operand.vmem [shape: bf16[4,32,128], index: 3, kind: input, shape index: {}]   ;;  %s7105_s4 = inlined_call_operand.vmem [shape: f32[4,1,128], index: 4, kind: input, shape index: {}]   ;;  %s7106_s2 = inlined_call_operand.vmem [shape: bf16[3,32,128], index: 2, kind: input, shape index: {}]   ;;  %s7107_s5 = inlined_call_operand.vmem [shape: bf16[32,784], index: 5, kind: input, shape index: {}]   ;;  %s7108_s7 = inlined_call_operand.vmem [shape: bf16[784,16], index: 7, kind: input, shape index: {}]   ;;  %s7109_s6 = inlined_call_operand.vmem [shape: f32[1,784], index: 6, kind: input, shape index: {}]   ;;  %s7110_s8 = inlined_call_operand.vmem [shape: f32[1,16], index: 8, kind: input, shape index: {}]   ;;  %s7111_s9 = inlined_call_operand.vmem [shape: f32[32,16], index: 9, kind: output, shape index: {}]  }
   0x1   :  { %v5507_v0 = vld [vmem:[%s7102_s1] sm:$0xff]   ;;  %5056 = vmatprep.subr.bf16.mxu0 %v5869_v1  ;;  %5060 = vmatprep.mubr.msk.bf16.mxu0 %vm5870_vm1, %v5869_v1  ;;  %v5509_v3 = vld [vmem:[%s7103_s0 + $0x8] sm:$0xff]   ;;  %v5511_v5 = vld [vmem:[%s7103_s0 + $0x10] sm:$0xff]   ;;  %vm223_vm2 = vcmask 261120  }
   0x2   :  { %v5508_v2 = vld [vmem:[%s7103_s0] sm:$0xff]   ;;  %5030 = vmatprep.subr.bf16.mxu1 %v5507_v0  ;;  %v5940_v4 = vld [vmem:[%s7104_s3 + $0x8] sm:$0xff]   ;;  %v5512_v7 = vld [vmem:[%s7103_s0 + $0x18] sm:$0xff]  }
   0x3   :  { %5031 = vmatpush3.bf16.msra.mxu1 %v5507_v0  ;;  %5032 = vmatprep.mubr.msk.bf16.mxu1 %vm76_vm0, %v5508_v2  ;;  %v5950_v6 = vld [vmem:[%s7104_s3] sm:$0xff]   ;;  %v6003_v39 = vld [vmem:[%s7104_s3 + $0x18] sm:$0xff]   ;;  %v6011_v41 = vld [vmem:[%s7104_s3 + $0x10] sm:$0xff]  }
   0x4   :  { %5040 = vmatprep.subr.bf16.mxu1 %v5869_v1  ;;  %v5973_v9 = vld [vmem:[%s7105_s4] ss:$0 sm:$0xff]  ;;  %5057 = vmatpush3.bf16.msra.mxu0 %v6003_v39  ;;  %v6026_v45 = vld [vmem:[%s7106_s2 + $0x8] sm:$0xff]   ;;  %v6052_v58 = vld [vmem:[%s7105_s4 + $0x1] ss:$0 sm:$0xff] }
   0x5   :  { %5058 = vmatprep.subr.bf16.mxu0 %v5869_v1  ;;  %v6033_v47 = vld [vmem:[%s7106_s2] sm:$0xff]  }
   0x6   :  { %5033 = vmatmul.mubr.msk.bf16.vlgmr.msra.gmra.mxu1 %vm76_vm0, %v5509_v3 }
   0x7   :  { %5041 = vmatpush3.bf16.msra.mxu1 %v5940_v4  ;;  %5036 = vmatprep.mubr.msk.bf16.mxu1 %vm76_vm0, %v5511_v5 }
   0x8   :  { %5042 = vmatprep.subr.bf16.mxu1 %v5869_v1  ;;  %5059 = vmatpush3.bf16.msra.mxu0 %v6011_v41 }
   0x9   :  { %5072 = vmatprep.subr.bf16.mxu0 %v5869_v1 }
   0xb   :  { %5043 = vmatpush3.bf16.msra.mxu1 %v5950_v6  ;;  %5061 = vmatmul.mubr.bf16.vlgmr.msra.gmra.mxu0 %v5871_v8 }
   0xc   :  { %5048 = vmatprep.subr.bf16.mxu1 %v5869_v1  ;;  %5073 = vmatpush3.bf16.msra.mxu0 %v5940_v4 }
   0xd   :  { %5076 = vmatprep.mubr.msk.bf16.mxu0 %vm5870_vm1, %v5869_v1  ;;  %5074 = vmatprep.subr.bf16.mxu0 %v5869_v1 }
   0xe   :  { %5037 = vmatmul.mubr.msk.bf16.gmra.mxu1 %vm76_vm0, %v5512_v7 }
   0xf   :  { %5044 = vmatprep.mubr.msk.bf16.mxu1 %vm5870_vm1, %v5869_v1 }
  0x10   :  { %5075 = vmatpush3.bf16.msra.mxu0 %v5950_v6 }
  0x11   :  { %5088 = vmatprep.subr.bf16.mxu0 %v5869_v1 }
  0x16   :  { %5045 = vmatmul.mubr.bf16.vlgmr.msra.gmra.mxu1 %v5871_v8 }
  0x17   :  { %5049 = vmatpush3.bf16.msra.mxu1 %v5940_v4  ;;  %5052 = vmatprep.mubr.msk.bf16.mxu1 %vm5870_vm1, %v5869_v1 }
  0x18   :  { %5050 = vmatprep.subr.bf16.mxu1 %v5869_v1 }
  0x1b   :  { %5051 = vmatpush3.bf16.msra.mxu1 %v5950_v6 }
  0x1c   :  { %5064 = vmatprep.subr.bf16.mxu1 %v5869_v1 }
  0xc6   :  { %v5034_v10 = vpop.f32.mrf.mxu1 }
  0xc7   :  { %v5976_v11 = vadd.f32 %v5034_v10, %v5973_v9 }
  0xc8   :  { %v123_v12 = vpop.f32.mrf.mxu1 }
  0xc9   :  { %v124_v23 = vadd.f32 %v5973_v9, %v123_v12 }
  0xca   :  { %v5035_v13 = vpop.f32.mrf.mxu1 }
  0xcb   :  { %v5979_v14 = vadd.f32 %v5035_v13, %v5973_v9  ;;  %v410_v48 = vpop.f32.mrf.mxu0 }
  0xcc   :  { %v5981_v15 = vpop.f32.mrf.mxu1 }
  0xcd   :  { %v5062_v49 = vpop.f32.mrf.mxu0  ;;  %v127_v52 = vadd.f32 %v5973_v9, %v5981_v15 }
  0xce   :  { %v5038_v16 = vpop.f32.mrf.mxu1 }
  0xcf   :  { %v5984_v17 = vadd.f32 %v5038_v16, %v5973_v9  ;;  %v413_v50 = vpop.f32.mrf.mxu0 }
  0xd0   :  { %v139_v18 = vpop.f32.mrf.mxu1 }
  0xd1   :  { %v5987_v19 = vadd.f32 %v5973_v9, %v139_v18  ;;  %v5063_v51 = vpop.f32.mrf.mxu0 }
  0xd2   :  { %v5039_v20 = vpop.f32.mrf.mxu1 }
  0xd3   :  { %v5990_v21 = vadd.f32 %v5039_v20, %v5973_v9 }
  0xd4   :  { %v5992_v22 = vpop.f32.mrf.mxu1 }
  0xd6   :  { %v261_v24 = vpop.f32.mrf.mxu1 }
  0xd7   :  { %v267_v25 = vadd.f32 %v261_v24, %v124_v23 }
  0xd8   :  { %v5046_v26 = vpop.f32.mrf.mxu1 }
  0xd9   :  { %5595 = vtanh.f32 %v267_v25  ;;  %v4596_v30 = vmul.f32 -1.442695, %v267_v25 }
  0xda   :  { %v264_v27 = vpop.f32.mrf.mxu1 }
  0xdb   :  { %5597 = vpow2.f32 %v4596_v30 }
  0xdc   :  { %v5047_v28 = vpop.f32.mrf.mxu1 }
  0xe6   :  { %v5596_v29 = vpop.eup %5595 }
  0xe7   :  { %277 = vrot.lane.b32.xlu0 %v5596_v29, %s5872_s23 }
  0xe8   :  { %v5598_v31 = vpop.eup %5597 }
  0xe9   :  { %v271_v32 = vadd.f32 1.0, %v5598_v31 }
  0xeb   :  { %5599 = vrcp.f32 %v271_v32 }
  0xf8   :  { %v5600_v33 = vpop.eup %5599 }
  0xf9   :  { %v275_v36 = vmul.f32 0.0, %v5600_v33 }
 0x159   :  { %v278_v34 = vpop.permute.xlu0 %277 }
 0x15a   :  { %v280_v35 = vmul.f32 %v5600_v33, %v278_v34 }
 0x15c   :  { %282 = vrot.lane.b32.xlu0 %v280_v35, %s5873_s24 }
 0x1ce   :  { %v283_v37 = vpop.permute.xlu0 %282 }
 0x1cf   :  { %v5997_v38 = vadd.f32 %v283_v37, %v275_v36 }
 0x1d1   :  { %5601 = vtanh.f32 %v5997_v38 }
 0x1de   :  { %v5602_v40 = vpop.eup %5601 }
 0x1df   :  { %288 = vrot.lane.b32.xlu1 %v5602_v40, %s5872_s23 }
 0x251   :  { %v289_v42 = vpop.permute.xlu1 %288 }
 0x252   :  { %v291_v43 = vmul.f32 %v5600_v33, %v289_v42  ;;  %v6079_v42 = vld [vmem:[%s7106_s2 + $0x18] sm:$0xff]  }
 0x254   :  { %v292_v44 = vpack.c.bf16 %v291_v43, %v291_v43  ;;  %v6085_v43 = vld [vmem:[%s7104_s3 + $0x28] sm:$0xff]  }
 0x256   :  { %294 = vrot.lane.b32.xlu1 %v292_v44, %s5873_s24 }
 0x2c8   :  { %v295_v46 = vpop.permute.xlu1 %294 }
 0x2c9   :  { %5053 = vmatmul.mubr.msk.bf16.vlgmr.msra.gmra.mxu1 %vm223_vm2, %v295_v46 }
 0x2ca   :  { %5065 = vmatpush3.bf16.msra.mxu1 %v6026_v45  ;;  %5068 = vmatprep.mubr.msk.bf16.mxu1 %vm5870_vm1, %v5869_v1 }
 0x2cb   :  { %5066 = vmatprep.subr.bf16.mxu1 %v5869_v1 }
 0x2ce   :  { %5067 = vmatpush3.bf16.msra.mxu1 %v6033_v47 }
 0x2cf   :  { %5080 = vmatprep.subr.bf16.mxu1 %v5869_v1 }
 0x2d1   :  { %5069 = vmatmul.mubr.msk.bf16.vlgmr.msra.gmra.mxu1 %vm223_vm2, %v295_v46  ;;  %v6092_v46 = vld [vmem:[%s7106_s2 + $0x10] sm:$0xff]  }
 0x2d2   :  { %5081 = vmatpush3.bf16.msra.mxu1 %v6003_v39  ;;  %5084 = vmatprep.mubr.msk.bf16.mxu1 %vm5870_vm1, %v5869_v1 }
 0x2d3   :  { %5082 = vmatprep.subr.bf16.mxu1 %v5869_v1 }
 0x2d6   :  { %5083 = vmatpush3.bf16.msra.mxu1 %v6011_v41 }
 0x2d7   :  { %5096 = vmatprep.subr.bf16.mxu1 %v5869_v1 }
 0x389   :  { %v333_v53 = vpop.f32.mrf.mxu1 }
 0x38a   :  { %v339_v54 = vadd.f32 %v333_v53, %v127_v52 }
 0x38b   :  { %v5054_v55 = vpop.f32.mrf.mxu1 }
 0x38c   :  { %5603 = vtanh.f32 %v339_v54  ;;  %v4598_v5 = vmul.f32 -1.442695, %v339_v54 }
 0x38d   :  { %v336_v56 = vpop.f32.mrf.mxu1 }
 0x38f   :  { %v5055_v57 = vpop.f32.mrf.mxu1 }
 0x391   :  { %v462_v59 = vpop.f32.mrf.mxu1 }
 0x392   :  { %v463_v60 = vadd.f32 %v462_v59, %v410_v48  ;;  %v6102_v48 = vld [vmem:[%s7104_s3 + $0x20] sm:$0xff]  }
 0x393   :  { %v5070_v61 = vpop.f32.mrf.mxu1 }
 0x394   :  { %v468_v62 = vadd.f32 %v6052_v58, %v463_v60 }
 0x395   :  { %v465_v63 = vpop.f32.mrf.mxu1 }
 0x396   :  { %5605 = vtanh.f32 %v468_v62  ;;  %v4604_v7 = vmul.f32 -1.442695, %v468_v62 }
 0x397   :  { %v5071_v0 = vpop.f32.mrf.mxu1  ;;  %5607 = vpow2.f32 %v4598_v5 }
 0x398   :  { %5609 = vpow2.f32 %v4604_v7 }
 0x399   :  { %v5604_v2 = vpop.eup %5603 }
 0x39a   :  { %349 = vrot.lane.b32.xlu0 %v5604_v2, %s5872_s23 }
 0x3a3   :  { %v5606_v3 = vpop.eup %5605 }
 0x3a4   :  { %478 = vrot.lane.b32.xlu1 %v5606_v3, %s5872_s23  ;;  %v5608_v9 = vpop.eup %5607 }
 0x3a5   :  { %v343_v10 = vadd.f32 1.0, %v5608_v9  ;;  %v5610_v12 = vpop.eup %5609 }
 0x3a6   :  { %v472_v13 = vadd.f32 1.0, %v5610_v12 }
 0x3a7   :  { %5611 = vrcp.f32 %v343_v10 }
 0x3a8   :  { %5613 = vrcp.f32 %v472_v13 }
 0x3b4   :  { %v5612_v15 = vpop.eup %5611 }
 0x3b5   :  { %v5614_v20 = vpop.eup %5613  ;;  %v347_v25 = vmul.f32 %v5612_v15, %v5997_v38 }
 0x3b6   :  { %v476_v28 = vmul.f32 0.0, %v5614_v20 }
 0x40c   :  { %v350_v16 = vpop.permute.xlu0 %349 }
 0x40d   :  { %v352_v18 = vmul.f32 %v5612_v15, %v350_v16 }
 0x40f   :  { %354 = vrot.lane.b32.xlu0 %v352_v18, %s5873_s24 }
 0x416   :  { %v479_v23 = vpop.permute.xlu1 %478 }
 0x417   :  { %v481_v24 = vmul.f32 %v5614_v20, %v479_v23 }
 0x419   :  { %483 = vrot.lane.b32.xlu1 %v481_v24, %s5873_s24 }
 0x481   :  { %v355_v26 = vpop.permute.xlu0 %354 }
 0x482   :  { %v6060_v27 = vadd.f32 %v355_v26, %v347_v25 }
 0x484   :  { %5615 = vtanh.f32 %v6060_v27 }
 0x48b   :  { %v484_v29 = vpop.permute.xlu1 %483 }
 0x48c   :  { %v6063_v30 = vadd.f32 %v484_v29, %v476_v28 }
 0x48e   :  { %5617 = vtanh.f32 %v6063_v30 }
 0x491   :  { %v5616_v31 = vpop.eup %5615 }
 0x492   :  { %360 = vrot.lane.b32.xlu0 %v5616_v31, %s5872_s23 }
 0x49b   :  { %v5618_v32 = vpop.eup %5617 }
 0x49c   :  { %489 = vrot.lane.b32.xlu1 %v5618_v32, %s5872_s23 }
 0x504   :  { %v361_v33 = vpop.permute.xlu0 %360 }
 0x505   :  { %v363_v34 = vmul.f32 %v5612_v15, %v361_v33 }
 0x507   :  { %v493_v35 = vpack.c.bf16 %v363_v34, %v363_v34 }
 0x509   :  { %495 = vrot.lane.b32.xlu0 %v493_v35, %s5873_s24 }
 0x50e   :  { %v490_v36 = vpop.permute.xlu1 %489 }
 0x50f   :  { %v492_v37 = vmul.f32 %v5614_v20, %v490_v36 }
 0x511   :  { %v565_v38 = vpack.c.bf16 %v492_v37, %v492_v37 }
 0x513   :  { %567 = vrot.lane.b32.xlu1 %v565_v38, %s5873_s24 }
 0x57b   :  { %v496_v40 = vpop.permute.xlu0 %495 }
 0x57c   :  { %5077 = vmatmul.mubr.msk.bf16.vlgmr.msra.gmra.mxu0 %vm223_vm2, %v496_v40 }
 0x57d   :  { %5089 = vmatpush3.bf16.msra.mxu0 %v6026_v45  ;;  %5092 = vmatprep.mubr.msk.bf16.mxu0 %vm5870_vm1, %v5869_v1 }
 0x57e   :  { %5090 = vmatprep.subr.bf16.mxu0 %v5869_v1 }
 0x581   :  { %5091 = vmatpush3.bf16.msra.mxu0 %v6033_v47 }
 0x582   :  { %5104 = vmatprep.subr.bf16.mxu0 %v5869_v1 }
 0x584   :  { %5093 = vmatmul.mubr.msk.bf16.vlgmr.msra.gmra.mxu0 %vm223_vm2, %v496_v40 }
 0x585   :  { %5105 = vmatpush3.bf16.msra.mxu0 %v6079_v42  ;;  %v568_v44 = vpop.permute.xlu1 %567  ;;  %5108 = vmatprep.mubr.msk.bf16.mxu0 %vm5870_vm1, %v5869_v1 }
 0x586   :  { %5085 = vmatmul.mubr.msk.bf16.vlgmr.msra.gmra.mxu1 %vm223_vm2, %v568_v44  ;;  %5106 = vmatprep.subr.bf16.mxu0 %v5869_v1 }
 0x587   :  { %5097 = vmatpush3.bf16.msra.mxu1 %v6085_v43  ;;  %5100 = vmatprep.mubr.msk.bf16.mxu1 %vm5870_vm1, %v5869_v1 }
 0x588   :  { %5098 = vmatprep.subr.bf16.mxu1 %v5869_v1 }
 0x589   :  { %5107 = vmatpush3.bf16.msra.mxu0 %v6092_v46 }
 0x58a   :  { %5120 = vmatprep.subr.bf16.mxu0 %v5869_v1 }
 0x58b   :  { %5099 = vmatpush3.bf16.msra.mxu1 %v6102_v48 }
 0x58c   :  { %5109 = vmatmul.mubr.msk.bf16.vlgmr.msra.gmra.mxu0 %vm223_vm2, %v568_v44  ;;  %5112 = vmatprep.subr.bf16.mxu1 %v5869_v1 }
 0x58d   :  { %5121 = vmatpush3.bf16.msra.mxu0 %v6003_v39  ;;  %5124 = vmatprep.mubr.msk.bf16.mxu0 %vm5870_vm1, %v5869_v1 }
 0x58e   :  { %5101 = vmatmul.mubr.bf16.vlgmr.msra.gmra.mxu1 %v5871_v8  ;;  %5122 = vmatprep.subr.bf16.mxu0 %v5869_v1 }
 0x58f   :  { %5113 = vmatpush3.bf16.msra.mxu1 %v5940_v4  ;;  %5116 = vmatprep.mubr.msk.bf16.mxu1 %vm5870_vm1, %v5869_v1 }
 0x590   :  { %5114 = vmatprep.subr.bf16.mxu1 %v5869_v1 }
 0x591   :  { %5123 = vmatpush3.bf16.msra.mxu0 %v6011_v41 }
 0x592   :  { %5136 = vmatprep.subr.bf16.mxu0 %v5869_v1 }
 0x593   :  { %5115 = vmatpush3.bf16.msra.mxu1 %v5950_v6 }
 0x594   :  { %5128 = vmatprep.subr.bf16.mxu1 %v5869_v1 }
 0x63c   :  { %v534_v49 = vpop.f32.mrf.mxu0 }
 0x63d   :  { %v540_v50 = vadd.f32 %v534_v49, %v5976_v11  ;;  %v6131_v11 = vld [vmem:[%s7105_s4 + $0x2] ss:$0 sm:$0xff] }
 0x63e   :  { %v5078_v51 = vpop.f32.mrf.mxu0 }
 0x63f   :  { %5619 = vtanh.f32 %v540_v50  ;;  %v4606_v24 = vmul.f32 -1.442695, %v540_v50 }
 0x640   :  { %v537_v52 = vpop.f32.mrf.mxu0 }
 0x642   :  { %v5079_v53 = vpop.f32.mrf.mxu0 }
 0x644   :  { %v646_v54 = vpop.f32.mrf.mxu0 }
 0x646   :  { %v606_v55 = vpop.f32.mrf.mxu1  ;;  %v5094_v56 = vpop.f32.mrf.mxu0 }
 0x647   :  { %v647_v57 = vadd.f32 %v646_v54, %v606_v55 }
 0x648   :  { %v5086_v59 = vpop.f32.mrf.mxu1  ;;  %v649_v60 = vpop.f32.mrf.mxu0 }
 0x649   :  { %v652_v61 = vadd.f32 %v6052_v58, %v647_v57 }
 0x64a   :  { %v609_v62 = vpop.f32.mrf.mxu1  ;;  %v5095_v63 = vpop.f32.mrf.mxu0 }
 0x64b   :  { %5621 = vtanh.f32 %v652_v61  ;;  %v4609_v25 = vmul.f32 -1.442695, %v652_v61 }
 0x64c   :  { %v5620_v0 = vpop.eup %5619  ;;  %v5087_v2 = vpop.f32.mrf.mxu1 }
 0x64d   :  { %v775_v3 = vpop.f32.mrf.mxu0  ;;  %550 = vrot.lane.b32.xlu0 %v5620_v0, %s5872_s23 }
 0x64e   :  { %v723_v5 = vpop.f32.mrf.mxu1 }
 0x64f   :  { %v5110_v7 = vpop.f32.mrf.mxu0  ;;  %v776_v9 = vadd.f32 %v775_v3, %v723_v5 }
 0x650   :  { %v5102_v10 = vpop.f32.mrf.mxu1 }
 0x651   :  { %v778_v12 = vpop.f32.mrf.mxu0  ;;  %v781_v13 = vadd.f32 %v6131_v11, %v776_v9 }
 0x652   :  { %v726_v15 = vpop.f32.mrf.mxu1 }
 0x653   :  { %v5111_v16 = vpop.f32.mrf.mxu0  ;;  %5623 = vtanh.f32 %v781_v13  ;;  %v4615_v29 = vmul.f32 -1.442695, %v781_v13 }
 0x654   :  { %v5103_v18 = vpop.f32.mrf.mxu1  ;;  %5625 = vpow2.f32 %v4606_v24  ;;  %v6174_v16 = vld [vmem:[%s7106_s2 + $0x28] sm:$0xff]   ;;  %v6203_v24 = vld [vmem:[%s7104_s3 + $0x30] sm:$0xff]  }
 0x655   :  { %5627 = vpow2.f32 %v4609_v25  ;;  %v6186_v18 = vld [vmem:[%s7104_s3 + $0x38] sm:$0xff]  }
 0x658   :  { %v5622_v20 = vpop.eup %5621 }
 0x659   :  { %662 = vrot.lane.b32.xlu1 %v5622_v20, %s5872_s23  ;;  %v6191_v20 = vld [vmem:[%s7106_s2 + $0x20] sm:$0xff]  }
 0x660   :  { %v5624_v23 = vpop.eup %5623 }
 0x661   :  { %791 = vrot.lane.b32.xlu0 %v5624_v23, %s5872_s23  ;;  %v5626_v26 = vpop.eup %5625 }
 0x662   :  { %v544_v28 = vadd.f32 1.0, %v5626_v26  ;;  %v5628_v31 = vpop.eup %5627 }
 0x663   :  { %v656_v32 = vadd.f32 1.0, %v5628_v31 }
 0x664   :  { %5629 = vrcp.f32 %v544_v28 }
 0x665   :  { %5631 = vpow2.f32 %v4615_v29 }
 0x666   :  { %5633 = vrcp.f32 %v656_v32 }
 0x671   :  { %v5630_v33 = vpop.eup %5629 }
 0x672   :  { %v5632_v34 = vpop.eup %5631  ;;  %v548_v52 = vmul.f32 %v5630_v33, %v6060_v27 }
 0x673   :  { %v785_v37 = vadd.f32 1.0, %v5632_v34  ;;  %v5634_v38 = vpop.eup %5633 }
 0x674   :  { %v660_v55 = vmul.f32 %v5634_v38, %v6063_v30 }
 0x675   :  { %5635 = vrcp.f32 %v785_v37 }
 0x682   :  { %v5636_v49 = vpop.eup %5635 }
 0x683   :  { %v789_v60 = vmul.f32 0.0, %v5636_v49 }
 0x6bf   :  { %v551_v35 = vpop.permute.xlu0 %550 }
 0x6c0   :  { %v553_v36 = vmul.f32 %v5630_v33, %v551_v35 }
 0x6c2   :  { %555 = vrot.lane.b32.xlu1 %v553_v36, %s5873_s24 }
 0x6cb   :  { %v663_v40 = vpop.permute.xlu1 %662 }
 0x6cc   :  { %v665_v44 = vmul.f32 %v5634_v38, %v663_v40 }
 0x6ce   :  { %667 = vrot.lane.b32.xlu0 %v665_v44, %s5873_s24 }
 0x6d3   :  { %v792_v50 = vpop.permute.xlu0 %791 }
 0x6d4   :  { %v794_v51 = vmul.f32 %v5636_v49, %v792_v50 }
 0x6d6   :  { %796 = vrot.lane.b32.xlu1 %v794_v51, %s5873_s24 }
 0x734   :  { %v556_v53 = vpop.permute.xlu1 %555 }
 0x735   :  { %v6140_v54 = vadd.f32 %v556_v53, %v548_v52 }
 0x737   :  { %5637 = vtanh.f32 %v6140_v54 }
 0x740   :  { %v668_v56 = vpop.permute.xlu0 %667 }
 0x741   :  { %v6144_v57 = vadd.f32 %v668_v56, %v660_v55 }
 0x743   :  { %5639 = vtanh.f32 %v6144_v57 }
 0x744   :  { %v5638_v59 = vpop.eup %5637 }
 0x745   :  { %561 = vrot.lane.b32.xlu0 %v5638_v59, %s5872_s23 }
 0x748   :  { %v797_v61 = vpop.permute.xlu1 %796 }
 0x749   :  { %v6148_v62 = vadd.f32 %v797_v61, %v789_v60 }
 0x74b   :  { %5641 = vtanh.f32 %v6148_v62 }
 0x750   :  { %v5640_v27 = vpop.eup %5639 }
 0x751   :  { %673 = vrot.lane.b32.xlu1 %v5640_v27, %s5872_s23 }
 0x758   :  { %v5642_v63 = vpop.eup %5641 }
 0x759   :  { %802 = vrot.lane.b32.xlu0 %v5642_v63, %s5872_s23  ;;  %v6232_v63 = vld [vmem:[%s7105_s4 + $0x3] ss:$0 sm:$0xff] }
 0x7b7   :  { %v562_v30 = vpop.permute.xlu0 %561 }
 0x7b8   :  { %v564_v0 = vmul.f32 %v5630_v33, %v562_v30 }
 0x7ba   :  { %v806_v2 = vpack.c.bf16 %v564_v0, %v564_v0 }
 0x7bc   :  { %808 = vrot.lane.b32.xlu1 %v806_v2, %s5873_s24 }
 0x7c3   :  { %v674_v3 = vpop.permute.xlu1 %673 }
 0x7c4   :  { %v676_v5 = vmul.f32 %v5634_v38, %v674_v3 }
 0x7c6   :  { %v878_v7 = vpack.c.bf16 %v676_v5, %v676_v5 }
 0x7c8   :  { %880 = vrot.lane.b32.xlu0 %v878_v7, %s5873_s24 }
 0x7cb   :  { %v803_v9 = vpop.permute.xlu0 %802 }
 0x7cc   :  { %v805_v10 = vmul.f32 %v5636_v49, %v803_v9 }
 0x7ce   :  { %v990_v12 = vpack.c.bf16 %v805_v10, %v805_v10 }
 0x7d0   :  { %992 = vrot.lane.b32.xlu1 %v990_v12, %s5873_s24 }
 0x82e   :  { %v809_v13 = vpop.permute.xlu1 %808 }
 0x82f   :  { %5117 = vmatmul.mubr.msk.bf16.vlgmr.msra.gmra.mxu1 %vm223_vm2, %v809_v13 }
 0x830   :  { %5129 = vmatpush3.bf16.msra.mxu1 %v6026_v45  ;;  %5132 = vmatprep.mubr.msk.bf16.mxu1 %vm5870_vm1, %v5869_v1 }
 0x831   :  { %5130 = vmatprep.subr.bf16.mxu1 %v5869_v1 }
 0x834   :  { %5131 = vmatpush3.bf16.msra.mxu1 %v6033_v47 }
 0x835   :  { %5144 = vmatprep.subr.bf16.mxu1 %v5869_v1 }
 0x837   :  { %5133 = vmatmul.mubr.msk.bf16.vlgmr.msra.gmra.mxu1 %vm223_vm2, %v809_v13 }
 0x838   :  { %5145 = vmatpush3.bf16.msra.mxu1 %v6079_v42  ;;  %5148 = vmatprep.mubr.msk.bf16.mxu1 %vm5870_vm1, %v5869_v1 }
 0x839   :  { %5146 = vmatprep.subr.bf16.mxu1 %v5869_v1 }
 0x83a   :  { %v881_v15 = vpop.permute.xlu0 %880 }
 0x83b   :  { %5125 = vmatmul.mubr.msk.bf16.vlgmr.msra.gmra.mxu0 %vm223_vm2, %v881_v15 }
 0x83c   :  { %5137 = vmatpush3.bf16.msra.mxu0 %v6085_v43  ;;  %5147 = vmatpush3.bf16.msra.mxu1 %v6092_v46 }
 0x83d   :  { %5138 = vmatprep.subr.bf16.mxu0 %v5869_v1  ;;  %5160 = vmatprep.subr.bf16.mxu1 %v5869_v1 }
 0x83e   :  { %5140 = vmatprep.mubr.msk.bf16.mxu0 %vm5870_vm1, %v5869_v1 }
 0x83f   :  { %5149 = vmatmul.mubr.msk.bf16.vlgmr.msra.gmra.mxu1 %vm223_vm2, %v881_v15 }
 0x840   :  { %5139 = vmatpush3.bf16.msra.mxu0 %v6102_v48  ;;  %5161 = vmatpush3.bf16.msra.mxu1 %v6174_v16 }
 0x841   :  { %5152 = vmatprep.subr.bf16.mxu0 %v5869_v1  ;;  %5162 = vmatprep.subr.bf16.mxu1 %v5869_v1 }
 0x842   :  { %v993_v23 = vpop.permute.xlu1 %992  ;;  %5164 = vmatprep.mubr.msk.bf16.mxu1 %vm5870_vm1, %v5869_v1 }
 0x843   :  { %5141 = vmatmul.mubr.msk.bf16.vlgmr.msra.gmra.mxu0 %vm223_vm2, %v993_v23 }
 0x844   :  { %5153 = vmatpush3.bf16.msra.mxu0 %v6186_v18  ;;  %5163 = vmatpush3.bf16.msra.mxu1 %v6191_v20 }
 0x845   :  { %5154 = vmatprep.subr.bf16.mxu0 %v5869_v1  ;;  %5156 = vmatprep.mubr.msk.bf16.mxu0 %vm5870_vm1, %v5869_v1 }
 0x846   :  { %5176 = vmatprep.subr.bf16.mxu1 %v5869_v1 }
 0x847   :  { %5165 = vmatmul.mubr.msk.bf16.vlgmr.msra.gmra.mxu1 %vm223_vm2, %v993_v23 }
 0x848   :  { %5155 = vmatpush3.bf16.msra.mxu0 %v6203_v24  ;;  %5177 = vmatpush3.bf16.msra.mxu1 %v6003_v39 }
 0x849   :  { %5168 = vmatprep.subr.bf16.mxu0 %v5869_v1  ;;  %5178 = vmatprep.subr.bf16.mxu1 %v5869_v1 }
 0x84a   :  { %5180 = vmatprep.mubr.msk.bf16.mxu1 %vm5870_vm1, %v5869_v1 }
 0x84b   :  { %5157 = vmatmul.mubr.bf16.vlgmr.msra.gmra.mxu0 %v5871_v8 }
 0x84c   :  { %5169 = vmatpush3.bf16.msra.mxu0 %v5940_v4  ;;  %5172 = vmatprep.mubr.msk.bf16.mxu0 %vm5870_vm1, %v5869_v1 }
 0x84d   :  { %5170 = vmatprep.subr.bf16.mxu0 %v5869_v1  ;;  %5179 = vmatpush3.bf16.msra.mxu1 %v6011_v41 }
 0x84e   :  { %5192 = vmatprep.subr.bf16.mxu1 %v5869_v1 }
 0x850   :  { %5171 = vmatpush3.bf16.msra.mxu0 %v5950_v6 }
 0x851   :  { %5184 = vmatprep.subr.bf16.mxu0 %v5869_v1 }
 0x8ef   :  { %v847_v25 = vpop.f32.mrf.mxu1 }
 0x8f0   :  { %v853_v26 = vadd.f32 %v847_v25, %v5979_v14 }
 0x8f1   :  { %v5118_v28 = vpop.f32.mrf.mxu1 }
 0x8f2   :  { %5643 = vtanh.f32 %v853_v26  ;;  %v4617_v23 = vmul.f32 -1.442695, %v853_v26 }
 0x8f3   :  { %v850_v29 = vpop.f32.mrf.mxu1 }
 0x8f5   :  { %v5119_v4 = vpop.f32.mrf.mxu1 }
 0x8f7   :  { %v959_v31 = vpop.f32.mrf.mxu1 }
 0x8f9   :  { %v5134_v32 = vpop.f32.mrf.mxu1 }
 0x8fb   :  { %v919_v33 = vpop.f32.mrf.mxu0  ;;  %v962_v34 = vpop.f32.mrf.mxu1 }
 0x8fc   :  { %v960_v35 = vadd.f32 %v959_v31, %v919_v33 }
 0x8fd   :  { %v5126_v36 = vpop.f32.mrf.mxu0  ;;  %v5135_v37 = vpop.f32.mrf.mxu1 }
 0x8fe   :  { %v965_v38 = vadd.f32 %v6052_v58, %v960_v35 }
 0x8ff   :  { %v5644_v40 = vpop.eup %5643  ;;  %v922_v6 = vpop.f32.mrf.mxu0 }
 0x900   :  { %v1071_v44 = vpop.f32.mrf.mxu1  ;;  %5645 = vtanh.f32 %v965_v38  ;;  %863 = vrot.lane.b32.xlu0 %v5644_v40, %s5872_s23  ;;  %v4620_v25 = vmul.f32 -1.442695, %v965_v38 }
 0x901   :  { %v5127_v14 = vpop.f32.mrf.mxu0 }
 0x902   :  { %v5150_v49 = vpop.f32.mrf.mxu1 }
 0x903   :  { %v1031_v50 = vpop.f32.mrf.mxu0 }
 0x904   :  { %v1074_v51 = vpop.f32.mrf.mxu1  ;;  %v1072_v52 = vadd.f32 %v1071_v44, %v1031_v50 }
 0x905   :  { %v5142_v53 = vpop.f32.mrf.mxu0 }
 0x906   :  { %v5151_v55 = vpop.f32.mrf.mxu1  ;;  %v1077_v56 = vadd.f32 %v6131_v11, %v1072_v52 }
 0x907   :  { %v1034_v59 = vpop.f32.mrf.mxu0 }
 0x908   :  { %v1200_v60 = vpop.f32.mrf.mxu1  ;;  %5647 = vtanh.f32 %v1077_v56  ;;  %v4623_v4 = vmul.f32 -1.442695, %v1077_v56 }
 0x909   :  { %v5143_v61 = vpop.f32.mrf.mxu0 }
 0x90a   :  { %v5166_v27 = vpop.f32.mrf.mxu1 }
 0x90b   :  { %v1148_v30 = vpop.f32.mrf.mxu0 }
 0x90c   :  { %v1203_v0 = vpop.f32.mrf.mxu1  ;;  %v1201_v2 = vadd.f32 %v1200_v60, %v1148_v30 }
 0x90d   :  { %v5646_v3 = vpop.eup %5645  ;;  %v5158_v5 = vpop.f32.mrf.mxu0 }
 0x90e   :  { %v5167_v7 = vpop.f32.mrf.mxu1  ;;  %v1206_v9 = vadd.f32 %v6232_v63, %v1201_v2  ;;  %975 = vrot.lane.b32.xlu1 %v5646_v3, %s5872_s23 }
 0x90f   :  { %v1151_v10 = vpop.f32.mrf.mxu0 }
 0x910   :  { %5649 = vtanh.f32 %v1206_v9  ;;  %v4629_v31 = vmul.f32 -1.442695, %v1206_v9 }
 0x911   :  { %v5159_v12 = vpop.f32.mrf.mxu0  ;;  %5651 = vpow2.f32 %v4617_v23 }
 0x912   :  { %5653 = vpow2.f32 %v4620_v25 }
 0x915   :  { %v5648_v13 = vpop.eup %5647 }
 0x916   :  { %1087 = vrot.lane.b32.xlu0 %v5648_v13, %s5872_s23 }
 0x91d   :  { %v5650_v15 = vpop.eup %5649 }
 0x91e   :  { %1216 = vrot.lane.b32.xlu1 %v5650_v15, %s5872_s23  ;;  %v5652_v28 = vpop.eup %5651 }
 0x91f   :  { %v857_v29 = vadd.f32 1.0, %v5652_v28  ;;  %v5654_v32 = vpop.eup %5653 }
 0x920   :  { %v969_v33 = vadd.f32 1.0, %v5654_v32 }
 0x921   :  { %5655 = vrcp.f32 %v857_v29 }
 0x922   :  { %5657 = vpow2.f32 %v4623_v4 }
 0x923   :  { %5659 = vpow2.f32 %v4629_v31 }
 0x924   :  { %5661 = vrcp.f32 %v969_v33 }
 0x92e   :  { %v5656_v34 = vpop.eup %5655 }
 0x92f   :  { %v5658_v37 = vpop.eup %5657  ;;  %v861_v56 = vmul.f32 %v5656_v34, %v6140_v54 }
 0x930   :  { %v1081_v26 = vadd.f32 1.0, %v5658_v37  ;;  %v5660_v38 = vpop.eup %5659 }
 0x931   :  { %v1210_v40 = vadd.f32 1.0, %v5660_v38  ;;  %v5662_v6 = vpop.eup %5661 }
 0x932   :  { %5663 = vrcp.f32 %v1081_v26  ;;  %v973_v61 = vmul.f32 %v5662_v6, %v6144_v57 }
 0x933   :  { %5665 = vrcp.f32 %v1210_v40 }
 0x93f   :  { %v5664_v49 = vpop.eup %5663 }
 0x940   :  { %v5666_v52 = vpop.eup %5665  ;;  %v1085_v2 = vmul.f32 %v5664_v49, %v6148_v62 }
 0x941   :  { %v1214_v54 = vmul.f32 0.0, %v5666_v52 }
 0x972   :  { %v864_v35 = vpop.permute.xlu0 %863 }
 0x973   :  { %v866_v36 = vmul.f32 %v5656_v34, %v864_v35 }
 0x975   :  { %868 = vrot.lane.b32.xlu0 %v866_v36, %s5873_s24 }
 0x980   :  { %v976_v44 = vpop.permute.xlu1 %975 }
 0x981   :  { %v978_v14 = vmul.f32 %v5662_v6, %v976_v44 }
 0x983   :  { %980 = vrot.lane.b32.xlu1 %v978_v14, %s5873_s24 }
 0x988   :  { %v1088_v50 = vpop.permute.xlu0 %1087 }
 0x989   :  { %v1090_v51 = vmul.f32 %v5664_v49, %v1088_v50 }
 0x98b   :  { %1092 = vrot.lane.b32.xlu0 %v1090_v51, %s5873_s24 }
 0x990   :  { %v1217_v53 = vpop.permute.xlu1 %1216 }
 0x991   :  { %v1219_v55 = vmul.f32 %v5666_v52, %v1217_v53 }
 0x993   :  { %1221 = vrot.lane.b32.xlu1 %v1219_v55, %s5873_s24 }
 0x9e7   :  { %v869_v59 = vpop.permute.xlu0 %868 }
 0x9e8   :  { %v6243_v60 = vadd.f32 %v869_v59, %v861_v56 }
 0x9ea   :  { %5667 = vtanh.f32 %v6243_v60 }
 0x9f5   :  { %v981_v27 = vpop.permute.xlu1 %980 }
 0x9f6   :  { %v6247_v30 = vadd.f32 %v981_v27, %v973_v61 }
 0x9f7   :  { %v5668_v0 = vpop.eup %5667 }
 0x9f8   :  { %5669 = vtanh.f32 %v6247_v30  ;;  %874 = vrot.lane.b32.xlu0 %v5668_v0, %s5872_s23 }
 0x9fd   :  { %v1093_v3 = vpop.permute.xlu0 %1092 }
 0x9fe   :  { %v6252_v5 = vadd.f32 %v1093_v3, %v1085_v2 }
 0xa00   :  { %5671 = vtanh.f32 %v6252_v5 }
 0xa05   :  { %v5670_v7 = vpop.eup %5669  ;;  %v1222_v9 = vpop.permute.xlu1 %1221 }
 0xa06   :  { %v6255_v10 = vadd.f32 %v1222_v9, %v1214_v54  ;;  %986 = vrot.lane.b32.xlu1 %v5670_v7, %s5872_s23 }
 0xa08   :  { %5673 = vtanh.f32 %v6255_v10 }
 0xa0d   :  { %v5672_v57 = vpop.eup %5671 }
 0xa0e   :  { %1098 = vrot.lane.b32.xlu0 %v5672_v57, %s5872_s23 }
 0xa15   :  { %v5674_v12 = vpop.eup %5673 }
 0xa16   :  { %1227 = vrot.lane.b32.xlu1 %v5674_v12, %s5872_s23 }
 0xa6a   :  { %v875_v62 = vpop.permute.xlu0 %874 }
 0xa6b   :  { %v877_v13 = vmul.f32 %v5656_v34, %v875_v62 }
 0xa6d   :  { %v1231_v15 = vpack.c.bf16 %v877_v13, %v877_v13 }
 0xa6f   :  { %1233 = vrot.lane.b32.xlu0 %v1231_v15, %s5873_s24 }
 0xa78   :  { %v987_v23 = vpop.permute.xlu1 %986 }
 0xa79   :  { %v989_v25 = vmul.f32 %v5662_v6, %v987_v23 }
 0xa7b   :  { %v1303_v28 = vpack.c.bf16 %v989_v25, %v989_v25 }
 0xa7d   :  { %1305 = vrot.lane.b32.xlu1 %v1303_v28, %s5873_s24 }
 0xa80   :  { %v1099_v29 = vpop.permute.xlu0 %1098 }
 0xa81   :  { %v1101_v4 = vmul.f32 %v5664_v49, %v1099_v29 }
 0xa83   :  { %v1415_v31 = vpack.c.bf16 %v1101_v4, %v1101_v4 }
 0xa85   :  { %1417 = vrot.lane.b32.xlu0 %v1415_v31, %s5873_s24 }
 0xa88   :  { %v1228_v32 = vpop.permute.xlu1 %1227 }
 0xa89   :  { %v1230_v33 = vmul.f32 %v5666_v52, %v1228_v32 }
 0xa8b   :  { %v1527_v35 = vpack.c.bf16 %v1230_v33, %v1230_v33 }
 0xa8d   :  { %1529 = vrot.lane.b32.xlu1 %v1527_v35, %s5873_s24 }
 0xae1   :  { %v1234_v36 = vpop.permute.xlu0 %1233 }
 0xae2   :  { %5173 = vmatmul.mubr.msk.bf16.vlgmr.msra.gmra.mxu0 %vm223_vm2, %v1234_v36 }
 0xae3   :  { %5185 = vmatpush3.bf16.msra.mxu0 %v6026_v45  ;;  %5188 = vmatprep.mubr.msk.bf16.mxu0 %vm5870_vm1, %v5869_v1 }
 0xae4   :  { %5186 = vmatprep.subr.bf16.mxu0 %v5869_v1 }
 0xae7   :  { %5187 = vmatpush3.bf16.msra.mxu0 %v6033_v47 }
 0xae8   :  { %5200 = vmatprep.subr.bf16.mxu0 %v5869_v1 }
 0xaea   :  { %5189 = vmatmul.mubr.msk.bf16.vlgmr.msra.gmra.mxu0 %vm223_vm2, %v1234_v36 }
 0xaeb   :  { %5201 = vmatpush3.bf16.msra.mxu0 %v6079_v42  ;;  %5204 = vmatprep.mubr.msk.bf16.mxu0 %vm5870_vm1, %v5869_v1 }
 0xaec   :  { %5202 = vmatprep.subr.bf16.mxu0 %v5869_v1 }
 0xaef   :  { %5203 = vmatpush3.bf16.msra.mxu0 %v6092_v46  ;;  %v1306_v45 = vpop.permute.xlu1 %1305 }
 0xaf0   :  { %5181 = vmatmul.mubr.msk.bf16.vlgmr.msra.gmra.mxu1 %vm223_vm2, %v1306_v45  ;;  %5216 = vmatprep.subr.bf16.mxu0 %v5869_v1 }
 0xaf1   :  { %5193 = vmatpush3.bf16.msra.mxu1 %v6085_v43  ;;  %5196 = vmatprep.mubr.msk.bf16.mxu1 %vm5870_vm1, %v5869_v1 }
 0xaf2   :  { %5205 = vmatmul.mubr.msk.bf16.vlgmr.msra.gmra.mxu0 %vm223_vm2, %v1306_v45  ;;  %5194 = vmatprep.subr.bf16.mxu1 %v5869_v1 }
 0xaf3   :  { %5217 = vmatpush3.bf16.msra.mxu0 %v6174_v16  ;;  %5220 = vmatprep.mubr.msk.bf16.mxu0 %vm5870_vm1, %v5869_v1 }
 0xaf4   :  { %5218 = vmatprep.subr.bf16.mxu0 %v5869_v1 }
 0xaf5   :  { %5195 = vmatpush3.bf16.msra.mxu1 %v6102_v48 }
 0xaf6   :  { %5208 = vmatprep.subr.bf16.mxu1 %v5869_v1 }
 0xaf7   :  { %v1418_v47 = vpop.permute.xlu0 %1417  ;;  %5219 = vmatpush3.bf16.msra.mxu0 %v6191_v20 }
 0xaf8   :  { %5197 = vmatmul.mubr.msk.bf16.vlgmr.msra.gmra.mxu1 %vm223_vm2, %v1418_v47  ;;  %5232 = vmatprep.subr.bf16.mxu0 %v5869_v1 }
 0xaf9   :  { %5209 = vmatpush3.bf16.msra.mxu1 %v6186_v18  ;;  %5212 = vmatprep.mubr.msk.bf16.mxu1 %vm5870_vm1, %v5869_v1 }
 0xafa   :  { %5221 = vmatmul.mubr.msk.bf16.vlgmr.msra.gmra.mxu0 %vm223_vm2, %v1418_v47  ;;  %5210 = vmatprep.subr.bf16.mxu1 %v5869_v1 }
 0xafb   :  { %5233 = vmatpush3.bf16.msra.mxu0 %v6003_v39  ;;  %5236 = vmatprep.mubr.msk.bf16.mxu0 %vm5870_vm1, %v5869_v1  ;;  %v6311_v39 = vld [vmem:[%s7104_s3 + $0x8] sm:$0xff]  }
 0xafc   :  { %5234 = vmatprep.subr.bf16.mxu0 %v5869_v1 }
 0xafd   :  { %5211 = vmatpush3.bf16.msra.mxu1 %v6203_v24 }
 0xafe   :  { %5224 = vmatprep.subr.bf16.mxu1 %v5869_v1 }
 0xaff   :  { %v1530_v34 = vpop.permute.xlu1 %1529  ;;  %5235 = vmatpush3.bf16.msra.mxu0 %v6011_v41  ;;  %v6320_v41 = vld [vmem:[%s7104_s3] sm:$0xff]  }
 0xb00   :  { %5213 = vmatmul.mubr.msk.bf16.vlgmr.msra.gmra.mxu1 %vm223_vm2, %v1530_v34  ;;  %5248 = vmatprep.subr.bf16.mxu0 %v5869_v1 }
 0xb01   :  { %5225 = vmatpush3.bf16.msra.mxu1 %v6311_v39  ;;  %5228 = vmatprep.mubr.msk.bf16.mxu1 %vm5870_vm1, %v5869_v1 }
 0xb02   :  { %5226 = vmatprep.subr.bf16.mxu1 %v5869_v1 }
 0xb05   :  { %5227 = vmatpush3.bf16.msra.mxu1 %v6320_v41 }
 0xb06   :  { %5240 = vmatprep.subr.bf16.mxu1 %v5869_v1 }
 0xba2   :  { %v1272_v37 = vpop.f32.mrf.mxu0 }
 0xba3   :  { %v1278_v26 = vadd.f32 %v1272_v37, %v5987_v19 }
 0xba4   :  { %v5174_v38 = vpop.f32.mrf.mxu0 }
 0xba5   :  { %5675 = vtanh.f32 %v1278_v26  ;;  %v4631_v36 = vmul.f32 -1.442695, %v1278_v26 }
 0xba6   :  { %v1275_v40 = vpop.f32.mrf.mxu0 }
 0xba8   :  { %v5175_v6 = vpop.f32.mrf.mxu0 }
 0xbaa   :  { %v1384_v44 = vpop.f32.mrf.mxu0 }
 0xbac   :  { %v5190_v14 = vpop.f32.mrf.mxu0 }
 0xbae   :  { %v1387_v49 = vpop.f32.mrf.mxu0 }
 0xbb0   :  { %v1344_v50 = vpop.f32.mrf.mxu1  ;;  %v5191_v51 = vpop.f32.mrf.mxu0 }
 0xbb1   :  { %v1385_v52 = vadd.f32 %v1384_v44, %v1344_v50 }
 0xbb2   :  { %v5676_v53 = vpop.eup %5675  ;;  %v5182_v55 = vpop.f32.mrf.mxu1 }
 0xbb3   :  { %v1496_v56 = vpop.f32.mrf.mxu0  ;;  %v1390_v59 = vadd.f32 %v6052_v58, %v1385_v52  ;;  %1288 = vrot.lane.b32.xlu0 %v5676_v53, %s5872_s23 }
 0xbb4   :  { %v1347_v61 = vpop.f32.mrf.mxu1 }
 0xbb5   :  { %v5206_v27 = vpop.f32.mrf.mxu0  ;;  %5677 = vtanh.f32 %v1390_v59  ;;  %v4634_v45 = vmul.f32 -1.442695, %v1390_v59 }
 0xbb6   :  { %v5183_v19 = vpop.f32.mrf.mxu1 }
 0xbb7   :  { %v1499_v0 = vpop.f32.mrf.mxu0 }
 0xbb8   :  { %v1456_v2 = vpop.f32.mrf.mxu1 }
 0xbb9   :  { %v5207_v3 = vpop.f32.mrf.mxu0  ;;  %v1497_v54 = vadd.f32 %v1496_v56, %v1456_v2 }
 0xbba   :  { %v5198_v7 = vpop.f32.mrf.mxu1 }
 0xbbb   :  { %v1608_v9 = vpop.f32.mrf.mxu0  ;;  %v1502_v57 = vadd.f32 %v6131_v11, %v1497_v54 }
 0xbbc   :  { %v1459_v12 = vpop.f32.mrf.mxu1 }
 0xbbd   :  { %v5222_v62 = vpop.f32.mrf.mxu0  ;;  %5679 = vtanh.f32 %v1502_v57  ;;  %v4637_v37 = vmul.f32 -1.442695, %v1502_v57 }
 0xbbe   :  { %v5199_v13 = vpop.f32.mrf.mxu1 }
 0xbbf   :  { %v1611_v15 = vpop.f32.mrf.mxu0 }
 0xbc0   :  { %v1568_v58 = vpop.f32.mrf.mxu1 }
 0xbc1   :  { %v5223_v23 = vpop.f32.mrf.mxu0  ;;  %v1609_v25 = vadd.f32 %v1608_v9, %v1568_v58 }
 0xbc2   :  { %v5678_v28 = vpop.eup %5677  ;;  %v5214_v29 = vpop.f32.mrf.mxu1 }
 0xbc3   :  { %v1614_v4 = vadd.f32 %v6232_v63, %v1609_v25  ;;  %1400 = vrot.lane.b32.xlu1 %v5678_v28, %s5872_s23 }
 0xbc4   :  { %v1571_v31 = vpop.f32.mrf.mxu1 }
 0xbc5   :  { %5681 = vtanh.f32 %v1614_v4  ;;  %v4640_v38 = vmul.f32 -1.442695, %v1614_v4 }
 0xbc6   :  { %v5215_v32 = vpop.f32.mrf.mxu1  ;;  %5683 = vpow2.f32 %v4631_v36 }
 0xbc7   :  { %5685 = vpow2.f32 %v4634_v45 }
 0xbca   :  { %v5680_v33 = vpop.eup %5679 }
 0xbcb   :  { %1512 = vrot.lane.b32.xlu0 %v5680_v33, %s5872_s23 }
 0xbd2   :  { %v5682_v35 = vpop.eup %5681 }
 0xbd3   :  { %1624 = vrot.lane.b32.xlu1 %v5682_v35, %s5872_s23  ;;  %v5684_v47 = vpop.eup %5683 }
 0xbd4   :  { %v1282_v34 = vadd.f32 1.0, %v5684_v47  ;;  %v5686_v40 = vpop.eup %5685 }
 0xbd5   :  { %v1394_v6 = vadd.f32 1.0, %v5686_v40  ;;  %v6364_v40 = vld [vmem:[%s7106_s2 + $0x8] sm:$0xff]  }
 0xbd6   :  { %5687 = vrcp.f32 %v1282_v34 }
 0xbd7   :  { %5689 = vpow2.f32 %v4637_v37 }
 0xbd8   :  { %5691 = vpow2.f32 %v4640_v38 }
 0xbd9   :  { %5693 = vrcp.f32 %v1394_v6  ;;  %v6373_v6 = vld [vmem:[%s7106_s2] sm:$0xff]  }
 0xbe3   :  { %v5688_v44 = vpop.eup %5687 }
 0xbe4   :  { %v5690_v50 = vpop.eup %5689  ;;  %v1286_v3 = vmul.f32 %v5688_v44, %v6243_v60 }
 0xbe5   :  { %v1506_v26 = vadd.f32 1.0, %v5690_v50  ;;  %v5692_v51 = vpop.eup %5691 }
 0xbe6   :  { %v1618_v52 = vadd.f32 1.0, %v5692_v51  ;;  %v5694_v53 = vpop.eup %5693 }
 0xbe7   :  { %5695 = vrcp.f32 %v1506_v26  ;;  %v1398_v9 = vmul.f32 %v5694_v53, %v6247_v30 }
 0xbe8   :  { %5697 = vrcp.f32 %v1618_v52 }
 0xbf4   :  { %v5696_v59 = vpop.eup %5695 }
 0xbf5   :  { %v5698_v19 = vpop.eup %5697  ;;  %v1510_v13 = vmul.f32 %v5696_v59, %v6252_v5 }
 0xbf6   :  { %v1622_v60 = vmul.f32 %v5698_v19, %v6255_v10 }
 0xc25   :  { %v1289_v14 = vpop.permute.xlu0 %1288 }
 0xc26   :  { %v1291_v49 = vmul.f32 %v5688_v44, %v1289_v14 }
 0xc28   :  { %1293 = vrot.lane.b32.xlu0 %v1291_v49, %s5873_s24 }
 0xc35   :  { %v1401_v55 = vpop.permute.xlu1 %1400 }
 0xc36   :  { %v1403_v56 = vmul.f32 %v5694_v53, %v1401_v55 }
 0xc38   :  { %1405 = vrot.lane.b32.xlu1 %v1403_v56, %s5873_s24 }
 0xc3d   :  { %v1513_v61 = vpop.permute.xlu0 %1512 }
 0xc3e   :  { %v1515_v27 = vmul.f32 %v5696_v59, %v1513_v61 }
 0xc40   :  { %1517 = vrot.lane.b32.xlu0 %v1515_v27, %s5873_s24 }
 0xc45   :  { %v1625_v0 = vpop.permute.xlu1 %1624 }
 0xc46   :  { %v1627_v2 = vmul.f32 %v5698_v19, %v1625_v0 }
 0xc48   :  { %1629 = vrot.lane.b32.xlu1 %v1627_v2, %s5873_s24 }
 0xc9a   :  { %v1294_v54 = vpop.permute.xlu0 %1293 }
 0xc9b   :  { %v6337_v7 = vadd.f32 %v1294_v54, %v1286_v3 }
 0xc9d   :  { %5699 = vtanh.f32 %v6337_v7 }
 0xcaa   :  { %v5700_v57 = vpop.eup %5699  ;;  %v1406_v12 = vpop.permute.xlu1 %1405 }
 0xcab   :  { %v6341_v62 = vadd.f32 %v1406_v12, %v1398_v9  ;;  %1299 = vrot.lane.b32.xlu0 %v5700_v57, %s5872_s23 }
 0xcad   :  { %5701 = vtanh.f32 %v6341_v62 }
 0xcb2   :  { %v1518_v15 = vpop.permute.xlu0 %1517 }
 0xcb3   :  { %v6346_v58 = vadd.f32 %v1518_v15, %v1510_v13 }
 0xcb5   :  { %5703 = vtanh.f32 %v6346_v58 }
 0xcba   :  { %v5702_v23 = vpop.eup %5701  ;;  %v1630_v25 = vpop.permute.xlu1 %1629 }
 0xcbb   :  { %v6350_v30 = vadd.f32 %v1630_v25, %v1622_v60  ;;  %1411 = vrot.lane.b32.xlu1 %v5702_v23, %s5872_s23 }
 0xcbd   :  { %5705 = vtanh.f32 %v6350_v30 }
 0xcc2   :  { %v5704_v28 = vpop.eup %5703 }
 0xcc3   :  { %1523 = vrot.lane.b32.xlu0 %v5704_v28, %s5872_s23 }
 0xcca   :  { %v5706_v29 = vpop.eup %5705 }
 0xccb   :  { %1635 = vrot.lane.b32.xlu1 %v5706_v29, %s5872_s23 }
 0xd1d   :  { %v1300_v5 = vpop.permute.xlu0 %1299 }
 0xd1e   :  { %v1302_v4 = vmul.f32 %v5688_v44, %v1300_v5 }
 0xd20   :  { %v1639_v31 = vpack.c.bf16 %v1302_v4, %v1302_v4 }
 0xd22   :  { %1641 = vrot.lane.b32.xlu0 %v1639_v31, %s5873_s24 }
 0xd2d   :  { %v1412_v10 = vpop.permute.xlu1 %1411 }
 0xd2e   :  { %v1414_v32 = vmul.f32 %v5694_v53, %v1412_v10 }
 0xd30   :  { %v1711_v33 = vpack.c.bf16 %v1414_v32, %v1414_v32 }
 0xd32   :  { %1713 = vrot.lane.b32.xlu1 %v1711_v33, %s5873_s24 }
 0xd35   :  { %v1524_v35 = vpop.permute.xlu0 %1523 }
 0xd36   :  { %v1526_v36 = vmul.f32 %v5696_v59, %v1524_v35 }
 0xd38   :  { %v1823_v45 = vpack.c.bf16 %v1526_v36, %v1526_v36 }
 0xd3a   :  { %1825 = vrot.lane.b32.xlu0 %v1823_v45, %s5873_s24 }
 0xd3d   :  { %v1636_v47 = vpop.permute.xlu1 %1635 }
 0xd3e   :  { %v1638_v34 = vmul.f32 %v5698_v19, %v1636_v47 }
 0xd40   :  { %v1935_v37 = vpack.c.bf16 %v1638_v34, %v1638_v34 }
 0xd42   :  { %1937 = vrot.lane.b32.xlu1 %v1935_v37, %s5873_s24 }
 0xd94   :  { %v1642_v38 = vpop.permute.xlu0 %1641 }
 0xd95   :  { %5229 = vmatmul.mubr.msk.bf16.vlgmr.msra.gmra.mxu1 %vm223_vm2, %v1642_v38 }
 0xd96   :  { %5241 = vmatpush3.bf16.msra.mxu1 %v6364_v40  ;;  %5244 = vmatprep.mubr.msk.bf16.mxu1 %vm5870_vm1, %v5869_v1 }
 0xd97   :  { %5242 = vmatprep.subr.bf16.mxu1 %v5869_v1 }
 0xd9a   :  { %5243 = vmatpush3.bf16.msra.mxu1 %v6373_v6 }
 0xd9b   :  { %5256 = vmatprep.subr.bf16.mxu1 %v5869_v1 }
 0xd9d   :  { %5245 = vmatmul.mubr.msk.bf16.vlgmr.msra.gmra.mxu1 %vm223_vm2, %v1642_v38 }
 0xd9e   :  { %5257 = vmatpush3.bf16.msra.mxu1 %v6079_v42  ;;  %5260 = vmatprep.mubr.msk.bf16.mxu1 %vm5870_vm1, %v5869_v1 }
 0xd9f   :  { %5258 = vmatprep.subr.bf16.mxu1 %v5869_v1 }
 0xda2   :  { %5259 = vmatpush3.bf16.msra.mxu1 %v6092_v46  ;;  %v6418_v46 = vld [vmem:[%s7104_s3 + $0x10] sm:$0xff]  }
 0xda3   :  { %5272 = vmatprep.subr.bf16.mxu1 %v5869_v1 }
 0xda4   :  { %v1714_v44 = vpop.permute.xlu1 %1713 }
 0xda5   :  { %5237 = vmatmul.mubr.msk.bf16.vlgmr.msra.gmra.mxu0 %vm223_vm2, %v1714_v44  ;;  %5261 = vmatmul.mubr.msk.bf16.vlgmr.msra.gmra.mxu1 %vm223_vm2, %v1714_v44 }
 0xda6   :  { %5249 = vmatpush3.bf16.msra.mxu0 %v6085_v43  ;;  %5273 = vmatpush3.bf16.msra.mxu1 %v6174_v16  ;;  %v6407_v43 = vld [vmem:[%s7104_s3 + $0x18] sm:$0xff]   ;;  %v5857_v16 = vld [vmem:[%s7105_s4] ss:$0 sm:$0xff] }
 0xda7   :  { %5250 = vmatprep.subr.bf16.mxu0 %v5869_v1  ;;  %5274 = vmatprep.subr.bf16.mxu1 %v5869_v1 }
 0xda8   :  { %5252 = vmatprep.mubr.msk.bf16.mxu0 %vm5870_vm1, %v5869_v1  ;;  %5276 = vmatprep.mubr.msk.bf16.mxu1 %vm5870_vm1, %v5869_v1 }
 0xdaa   :  { %5251 = vmatpush3.bf16.msra.mxu0 %v6102_v48  ;;  %5275 = vmatpush3.bf16.msra.mxu1 %v6191_v20 }
 0xdab   :  { %5264 = vmatprep.subr.bf16.mxu0 %v5869_v1  ;;  %5288 = vmatprep.subr.bf16.mxu1 %v5869_v1 }
 0xdac   :  { %v1826_v42 = vpop.permute.xlu0 %1825 }
 0xdad   :  { %5253 = vmatmul.mubr.msk.bf16.vlgmr.msra.gmra.mxu0 %vm223_vm2, %v1826_v42  ;;  %5277 = vmatmul.mubr.msk.bf16.vlgmr.msra.gmra.mxu1 %vm223_vm2, %v1826_v42 }
 0xdae   :  { %5265 = vmatpush3.bf16.msra.mxu0 %v6186_v18  ;;  %5268 = vmatprep.mubr.msk.bf16.mxu0 %vm5870_vm1, %v5869_v1  ;;  %v143_v18 = vadd.f32 %v5857_v16, %v5992_v22  ;;  %v6437_v22 = vld [vmem:[%s7105_s4 + $0x1] ss:$0 sm:$0xff] }
 0xdaf   :  { %5266 = vmatprep.subr.bf16.mxu0 %v5869_v1  ;;  %5289 = vmatpush3.bf16.msra.mxu1 %v6407_v43 }
 0xdb0   :  { %5290 = vmatprep.subr.bf16.mxu1 %v5869_v1  ;;  %5292 = vmatprep.mubr.msk.bf16.mxu1 %vm5870_vm1, %v5869_v1 }
 0xdb2   :  { %5267 = vmatpush3.bf16.msra.mxu0 %v6203_v24 }
 0xdb3   :  { %5280 = vmatprep.subr.bf16.mxu0 %v5869_v1  ;;  %5291 = vmatpush3.bf16.msra.mxu1 %v6418_v46 }
 0xdb4   :  { %v1938_v48 = vpop.permute.xlu1 %1937  ;;  %5304 = vmatprep.subr.bf16.mxu1 %v5869_v1 }
 0xdb5   :  { %5269 = vmatmul.mubr.msk.bf16.vlgmr.msra.gmra.mxu0 %vm223_vm2, %v1938_v48 }
 0xdb6   :  { %5281 = vmatpush3.bf16.msra.mxu0 %v6311_v39  ;;  %5284 = vmatprep.mubr.msk.bf16.mxu0 %vm5870_vm1, %v5869_v1 }
 0xdb7   :  { %5282 = vmatprep.subr.bf16.mxu0 %v5869_v1 }
 0xdba   :  { %5283 = vmatpush3.bf16.msra.mxu0 %v6320_v41 }
 0xdbb   :  { %5296 = vmatprep.subr.bf16.mxu0 %v5869_v1 }
 0xe55   :  { %v1680_v20 = vpop.f32.mrf.mxu1 }
 0xe56   :  { %v1686_v24 = vadd.f32 %v1680_v20, %v143_v18 }
 0xe57   :  { %v5230_v14 = vpop.f32.mrf.mxu1 }
 0xe58   :  { %5707 = vtanh.f32 %v1686_v24  ;;  %v4642_v47 = vmul.f32 -1.442695, %v1686_v24 }
 0xe59   :  { %v1683_v49 = vpop.f32.mrf.mxu1 }
 0xe5b   :  { %v5231_v50 = vpop.f32.mrf.mxu1 }
 0xe5d   :  { %v1792_v26 = vpop.f32.mrf.mxu1 }
 0xe5f   :  { %v5246_v51 = vpop.f32.mrf.mxu1 }
 0xe61   :  { %v1795_v52 = vpop.f32.mrf.mxu1 }
 0xe63   :  { %v5247_v53 = vpop.f32.mrf.mxu1 }
 0xe65   :  { %v5708_v55 = vpop.eup %5707  ;;  %v1752_v56 = vpop.f32.mrf.mxu0 }
 0xe66   :  { %v1904_v59 = vpop.f32.mrf.mxu1  ;;  %v1793_v61 = vadd.f32 %v1792_v26, %v1752_v56  ;;  %1696 = vrot.lane.b32.xlu0 %v5708_v55, %s5872_s23 }
 0xe67   :  { %v5238_v27 = vpop.f32.mrf.mxu0 }
 0xe68   :  { %v5262_v19 = vpop.f32.mrf.mxu1  ;;  %v1798_v0 = vadd.f32 %v6437_v22, %v1793_v61 }
 0xe69   :  { %v1755_v2 = vpop.f32.mrf.mxu0 }
 0xe6a   :  { %v1907_v3 = vpop.f32.mrf.mxu1  ;;  %5709 = vtanh.f32 %v1798_v0  ;;  %v4645_v37 = vmul.f32 -1.442695, %v1798_v0 }
 0xe6b   :  { %v5239_v54 = vpop.f32.mrf.mxu0 }
 0xe6c   :  { %v5263_v9 = vpop.f32.mrf.mxu1 }
 0xe6d   :  { %v1864_v57 = vpop.f32.mrf.mxu0 }
 0xe6e   :  { %v2016_v12 = vpop.f32.mrf.mxu1  ;;  %v1905_v13 = vadd.f32 %v1904_v59, %v1864_v57 }
 0xe6f   :  { %v5254_v15 = vpop.f32.mrf.mxu0 }
 0xe70   :  { %v5278_v60 = vpop.f32.mrf.mxu1  ;;  %v1910_v23 = vadd.f32 %v6131_v11, %v1905_v13 }
 0xe71   :  { %v1867_v25 = vpop.f32.mrf.mxu0 }
 0xe72   :  { %v2019_v28 = vpop.f32.mrf.mxu1  ;;  %5711 = vtanh.f32 %v1910_v23  ;;  %v4648_v44 = vmul.f32 -1.442695, %v1910_v23 }
 0xe73   :  { %v5255_v29 = vpop.f32.mrf.mxu0 }
 0xe74   :  { %v5279_v5 = vpop.f32.mrf.mxu1 }
 0xe75   :  { %v1976_v4 = vpop.f32.mrf.mxu0 }
 0xe76   :  { %v2017_v31 = vadd.f32 %v2016_v12, %v1976_v4 }
 0xe77   :  { %v5270_v10 = vpop.f32.mrf.mxu0  ;;  %v5710_v32 = vpop.eup %5709 }
 0xe78   :  { %v2022_v33 = vadd.f32 %v6232_v63, %v2017_v31  ;;  %1808 = vrot.lane.b32.xlu1 %v5710_v32, %s5872_s23 }
 0xe79   :  { %v1979_v35 = vpop.f32.mrf.mxu0 }
 0xe7a   :  { %5713 = vtanh.f32 %v2022_v33  ;;  %v4651_v63 = vmul.f32 -1.442695, %v2022_v33 }
 0xe7b   :  { %v5271_v36 = vpop.f32.mrf.mxu0  ;;  %5715 = vpow2.f32 %v4642_v47  ;;  %v6484_v47 = vld [vmem:[%s7106_s2 + $0x18] sm:$0xff]  }
 0xe7c   :  { %5717 = vpow2.f32 %v4645_v37 }
 0xe7f   :  { %v5712_v45 = vpop.eup %5711 }
 0xe80   :  { %1920 = vrot.lane.b32.xlu0 %v5712_v45, %s5872_s23 }
 0xe87   :  { %v5714_v11 = vpop.eup %5713 }
 0xe88   :  { %2032 = vrot.lane.b32.xlu1 %v5714_v11, %s5872_s23  ;;  %v5716_v34 = vpop.eup %5715 }
 0xe89   :  { %v1690_v38 = vadd.f32 1.0, %v5716_v34  ;;  %v5718_v42 = vpop.eup %5717  ;;  %v6493_v34 = vld [vmem:[%s7106_s2 + $0x10] sm:$0xff]  }
 0xe8a   :  { %v1802_v20 = vadd.f32 1.0, %v5718_v42  ;;  %v6526_v42 = vld [vmem:[%s7106_s2 + $0x20] sm:$0xff]  }
 0xe8b   :  { %5719 = vrcp.f32 %v1690_v38  ;;  %v6502_v38 = vld [vmem:[%s7104_s3 + $0x28] sm:$0xff]  }
 0xe8c   :  { %5721 = vpow2.f32 %v4648_v44  ;;  %v6508_v44 = vld [vmem:[%s7106_s2 + $0x28] sm:$0xff]  }
 0xe8d   :  { %5723 = vpow2.f32 %v4651_v63  ;;  %v6520_v63 = vld [vmem:[%s7104_s3 + $0x20] sm:$0xff]  }
 0xe8e   :  { %5725 = vrcp.f32 %v1802_v20 }
 0xe98   :  { %v5720_v48 = vpop.eup %5719 }
 0xe99   :  { %v5722_v14 = vpop.eup %5721  ;;  %v1694_v19 = vmul.f32 %v5720_v48, %v6337_v7 }
 0xe9a   :  { %v1914_v24 = vadd.f32 1.0, %v5722_v14  ;;  %v5724_v49 = vpop.eup %5723 }
 0xe9b   :  { %v2026_v50 = vadd.f32 1.0, %v5724_v49  ;;  %v5726_v26 = vpop.eup %5725 }
 0xe9c   :  { %5727 = vrcp.f32 %v1914_v24  ;;  %v1806_v54 = vmul.f32 %v5726_v26, %v6341_v62 }
 0xe9d   :  { %5729 = vrcp.f32 %v2026_v50 }
 0xea9   :  { %v5728_v53 = vpop.eup %5727 }
 0xeaa   :  { %v5730_v59 = vpop.eup %5729  ;;  %v1918_v12 = vmul.f32 %v5728_v53, %v6346_v58 }
 0xeab   :  { %v2030_v7 = vmul.f32 %v5730_v59, %v6350_v30 }
 0xed8   :  { %v1697_v16 = vpop.permute.xlu0 %1696 }
 0xed9   :  { %v1699_v18 = vmul.f32 %v5720_v48, %v1697_v16  ;;  %v6536_v16 = vld [vmem:[%s7104_s3 + $0x38] sm:$0xff]  }
 0xedb   :  { %1701 = vrot.lane.b32.xlu0 %v1699_v18, %s5873_s24  ;;  %v6549_v18 = vld [vmem:[%s7104_s3 + $0x30] sm:$0xff]  }
 0xeea   :  { %v1809_v51 = vpop.permute.xlu1 %1808 }
 0xeeb   :  { %v1811_v52 = vmul.f32 %v5726_v26, %v1809_v51 }
 0xeed   :  { %1813 = vrot.lane.b32.xlu1 %v1811_v52, %s5873_s24 }
 0xef2   :  { %v1921_v55 = vpop.permute.xlu0 %1920 }
 0xef3   :  { %v1923_v56 = vmul.f32 %v5728_v53, %v1921_v55 }
 0xef5   :  { %1925 = vrot.lane.b32.xlu0 %v1923_v56, %s5873_s24 }
 0xefa   :  { %v2033_v61 = vpop.permute.xlu1 %2032 }
 0xefb   :  { %v2035_v27 = vmul.f32 %v5730_v59, %v2033_v61 }
 0xefd   :  { %2037 = vrot.lane.b32.xlu1 %v2035_v27, %s5873_s24 }
 0xf4d   :  { %v1702_v0 = vpop.permute.xlu0 %1701 }
 0xf4e   :  { %v6450_v2 = vadd.f32 %v1702_v0, %v1694_v19 }
 0xf50   :  { %5731 = vtanh.f32 %v6450_v2 }
 0xf5d   :  { %v5732_v3 = vpop.eup %5731 }
 0xf5e   :  { %1707 = vrot.lane.b32.xlu0 %v5732_v3, %s5872_s23 }
 0xf5f   :  { %v1814_v9 = vpop.permute.xlu1 %1813 }
 0xf60   :  { %v6455_v57 = vadd.f32 %v1814_v9, %v1806_v54 }
 0xf62   :  { %5733 = vtanh.f32 %v6455_v57 }
 0xf67   :  { %v1926_v13 = vpop.permute.xlu0 %1925 }
 0xf68   :  { %v6459_v15 = vadd.f32 %v1926_v13, %v1918_v12 }
 0xf6a   :  { %5735 = vtanh.f32 %v6459_v15 }
 0xf6f   :  { %v2038_v60 = vpop.permute.xlu1 %2037  ;;  %v5734_v23 = vpop.eup %5733 }
 0xf70   :  { %v6463_v25 = vadd.f32 %v2038_v60, %v2030_v7  ;;  %1819 = vrot.lane.b32.xlu1 %v5734_v23, %s5872_s23  ;;  %v6568_v23 = vld [vmem:[%s7105_s4 + $0x2] ss:$0 sm:$0xff] }
 0xf72   :  { %5737 = vtanh.f32 %v6463_v25 }
 0xf77   :  { %v5736_v62 = vpop.eup %5735 }
 0xf78   :  { %1931 = vrot.lane.b32.xlu0 %v5736_v62, %s5872_s23 }
 0xf7f   :  { %v5738_v28 = vpop.eup %5737 }
 0xf80   :  { %2043 = vrot.lane.b32.xlu1 %v5738_v28, %s5872_s23 }
 0xfd0   :  { %v1708_v58 = vpop.permute.xlu0 %1707 }
 0xfd1   :  { %v1710_v29 = vmul.f32 %v5720_v48, %v1708_v58 }
 0xfd3   :  { %v2047_v5 = vpack.c.bf16 %v1710_v29, %v1710_v29 }
 0xfd5   :  { %2049 = vrot.lane.b32.xlu0 %v2047_v5, %s5873_s24 }
 0xfe2   :  { %v1820_v30 = vpop.permute.xlu1 %1819 }
 0xfe3   :  { %v1822_v4 = vmul.f32 %v5726_v26, %v1820_v30 }
 0xfe5   :  { %v2119_v31 = vpack.c.bf16 %v1822_v4, %v1822_v4 }
 0xfe7   :  { %2121 = vrot.lane.b32.xlu1 %v2119_v31, %s5873_s24 }
 0xfea   :  { %v1932_v10 = vpop.permute.xlu0 %1931 }
 0xfeb   :  { %v1934_v32 = vmul.f32 %v5728_v53, %v1932_v10 }
 0xfed   :  { %v2231_v33 = vpack.c.bf16 %v1934_v32, %v1934_v32  ;;  %v6574_v32 = vld [vmem:[%s7105_s4 + $0x3] ss:$0 sm:$0xff] }
 0xfef   :  { %2233 = vrot.lane.b32.xlu0 %v2231_v33, %s5873_s24 }
 0xff2   :  { %v2044_v35 = vpop.permute.xlu1 %2043 }
 0xff3   :  { %v2046_v36 = vmul.f32 %v5730_v59, %v2044_v35 }
 0xff5   :  { %v2343_v45 = vpack.c.bf16 %v2046_v36, %v2046_v36 }
 0xff7   :  { %2345 = vrot.lane.b32.xlu1 %v2343_v45, %s5873_s24 }
0x1047   :  { %v2050_v11 = vpop.permute.xlu0 %2049 }
0x1048   :  { %5285 = vmatmul.mubr.msk.bf16.vlgmr.msra.gmra.mxu0 %vm223_vm2, %v2050_v11 }
0x1049   :  { %5297 = vmatpush3.bf16.msra.mxu0 %v6364_v40  ;;  %5300 = vmatprep.mubr.msk.bf16.mxu0 %vm5870_vm1, %v5869_v1 }
0x104a   :  { %5298 = vmatprep.subr.bf16.mxu0 %v5869_v1 }
0x104d   :  { %5299 = vmatpush3.bf16.msra.mxu0 %v6373_v6 }
0x104e   :  { %5312 = vmatprep.subr.bf16.mxu0 %v5869_v1 }
0x1050   :  { %5301 = vmatmul.mubr.msk.bf16.vlgmr.msra.gmra.mxu0 %vm223_vm2, %v2050_v11 }
0x1051   :  { %5313 = vmatpush3.bf16.msra.mxu0 %v6484_v47  ;;  %5316 = vmatprep.mubr.msk.bf16.mxu0 %vm5870_vm1, %v5869_v1 }
0x1052   :  { %5314 = vmatprep.subr.bf16.mxu0 %v5869_v1 }
0x1055   :  { %5315 = vmatpush3.bf16.msra.mxu0 %v6493_v34 }
0x1056   :  { %5328 = vmatprep.subr.bf16.mxu0 %v5869_v1 }
0x1059   :  { %v2122_v37 = vpop.permute.xlu1 %2121 }
0x105a   :  { %5293 = vmatmul.mubr.msk.bf16.vlgmr.msra.gmra.mxu1 %vm223_vm2, %v2122_v37  ;;  %5317 = vmatmul.mubr.msk.bf16.vlgmr.msra.gmra.mxu0 %vm223_vm2, %v2122_v37 }
0x105b   :  { %5305 = vmatpush3.bf16.msra.mxu1 %v6502_v38  ;;  %5329 = vmatpush3.bf16.msra.mxu0 %v6508_v44 }
0x105c   :  { %5306 = vmatprep.subr.bf16.mxu1 %v5869_v1  ;;  %5330 = vmatprep.subr.bf16.mxu0 %v5869_v1 }
0x105d   :  { %5308 = vmatprep.mubr.msk.bf16.mxu1 %vm5870_vm1, %v5869_v1  ;;  %5332 = vmatprep.mubr.msk.bf16.mxu0 %vm5870_vm1, %v5869_v1 }
0x105f   :  { %5307 = vmatpush3.bf16.msra.mxu1 %v6520_v63  ;;  %5331 = vmatpush3.bf16.msra.mxu0 %v6526_v42 }
0x1060   :  { %5320 = vmatprep.subr.bf16.mxu1 %v5869_v1  ;;  %5344 = vmatprep.subr.bf16.mxu0 %v5869_v1 }
0x1061   :  { %v2234_v48 = vpop.permute.xlu0 %2233 }
0x1062   :  { %5309 = vmatmul.mubr.msk.bf16.vlgmr.msra.gmra.mxu1 %vm223_vm2, %v2234_v48  ;;  %5333 = vmatmul.mubr.msk.bf16.vlgmr.msra.gmra.mxu0 %vm223_vm2, %v2234_v48 }
0x1063   :  { %5321 = vmatpush3.bf16.msra.mxu1 %v6536_v16  ;;  %5324 = vmatprep.mubr.msk.bf16.mxu1 %vm5870_vm1, %v5869_v1 }
0x1064   :  { %5322 = vmatprep.subr.bf16.mxu1 %v5869_v1  ;;  %5345 = vmatpush3.bf16.msra.mxu0 %v6407_v43 }
0x1065   :  { %5346 = vmatprep.subr.bf16.mxu0 %v5869_v1  ;;  %5348 = vmatprep.mubr.msk.bf16.mxu0 %vm5870_vm1, %v5869_v1 }
0x1067   :  { %5323 = vmatpush3.bf16.msra.mxu1 %v6549_v18 }
0x1068   :  { %5336 = vmatprep.subr.bf16.mxu1 %v5869_v1  ;;  %5347 = vmatpush3.bf16.msra.mxu0 %v6418_v46 }
0x1069   :  { %v2346_v20 = vpop.permute.xlu1 %2345  ;;  %5360 = vmatprep.subr.bf16.mxu0 %v5869_v1 }
0x106a   :  { %5325 = vmatmul.mubr.msk.bf16.vlgmr.msra.gmra.mxu1 %vm223_vm2, %v2346_v20 }
0x106b   :  { %5337 = vmatpush3.bf16.msra.mxu1 %v6311_v39  ;;  %5340 = vmatprep.mubr.msk.bf16.mxu1 %vm5870_vm1, %v5869_v1 }
0x106c   :  { %5338 = vmatprep.subr.bf16.mxu1 %v5869_v1 }
0x106f   :  { %5339 = vmatpush3.bf16.msra.mxu1 %v6320_v41 }
0x1070   :  { %5352 = vmatprep.subr.bf16.mxu1 %v5869_v1 }
0x1108   :  { %v2088_v14 = vpop.f32.mrf.mxu0 }
0x1109   :  { %v2094_v24 = vadd.f32 %v2088_v14, %v5984_v17 }
0x110a   :  { %v5286_v49 = vpop.f32.mrf.mxu0 }
0x110b   :  { %5739 = vtanh.f32 %v2094_v24  ;;  %v4653_v37 = vmul.f32 -1.442695, %v2094_v24 }
0x110c   :  { %v2091_v50 = vpop.f32.mrf.mxu0 }
0x110e   :  { %v5287_v26 = vpop.f32.mrf.mxu0 }
0x1110   :  { %v2200_v51 = vpop.f32.mrf.mxu0 }
0x1112   :  { %v5302_v52 = vpop.f32.mrf.mxu0 }
0x1114   :  { %v2203_v53 = vpop.f32.mrf.mxu0 }
0x1116   :  { %v5303_v39 = vpop.f32.mrf.mxu0 }
0x1118   :  { %v5740_v55 = vpop.eup %5739 }
0x1119   :  { %2104 = vrot.lane.b32.xlu0 %v5740_v55, %s5872_s23 }
0x111a   :  { %v2160_v56 = vpop.f32.mrf.mxu1  ;;  %v2312_v59 = vpop.f32.mrf.mxu0 }
0x111b   :  { %v2201_v61 = vadd.f32 %v2200_v51, %v2160_v56 }
0x111c   :  { %v5294_v41 = vpop.f32.mrf.mxu1  ;;  %v5318_v27 = vpop.f32.mrf.mxu0 }
0x111d   :  { %v2206_v19 = vadd.f32 %v6437_v22, %v2201_v61 }
0x111e   :  { %v2163_v0 = vpop.f32.mrf.mxu1  ;;  %v2315_v17 = vpop.f32.mrf.mxu0 }
0x111f   :  { %5741 = vtanh.f32 %v2206_v19  ;;  %v4656_v14 = vmul.f32 -1.442695, %v2206_v19 }
0x1120   :  { %v5295_v3 = vpop.f32.mrf.mxu1  ;;  %v5319_v54 = vpop.f32.mrf.mxu0 }
0x1122   :  { %v2272_v9 = vpop.f32.mrf.mxu1  ;;  %v2424_v12 = vpop.f32.mrf.mxu0 }
0x1123   :  { %v2313_v13 = vadd.f32 %v2312_v59, %v2272_v9 }
0x1124   :  { %v5310_v7 = vpop.f32.mrf.mxu1  ;;  %v5334_v60 = vpop.f32.mrf.mxu0 }
0x1125   :  { %v2318_v62 = vadd.f32 %v6568_v23, %v2313_v13 }
0x1126   :  { %v2275_v28 = vpop.f32.mrf.mxu1  ;;  %v2427_v58 = vpop.f32.mrf.mxu0 }
0x1127   :  { %5743 = vtanh.f32 %v2318_v62  ;;  %v4659_v49 = vmul.f32 -1.442695, %v2318_v62 }
0x1128   :  { %v5311_v29 = vpop.f32.mrf.mxu1  ;;  %v5335_v5 = vpop.f32.mrf.mxu0 }
0x112a   :  { %v2384_v30 = vpop.f32.mrf.mxu1 }
0x112b   :  { %v2425_v4 = vadd.f32 %v2424_v12, %v2384_v30 }
0x112c   :  { %v5742_v31 = vpop.eup %5741  ;;  %v5326_v10 = vpop.f32.mrf.mxu1 }
0x112d   :  { %v2430_v33 = vadd.f32 %v6574_v32, %v2425_v4  ;;  %2216 = vrot.lane.b32.xlu1 %v5742_v31, %s5872_s23 }
0x112e   :  { %v2387_v35 = vpop.f32.mrf.mxu1 }
0x112f   :  { %5745 = vtanh.f32 %v2430_v33  ;;  %v4662_v26 = vmul.f32 -1.442695, %v2430_v33 }
0x1130   :  { %v5327_v36 = vpop.f32.mrf.mxu1  ;;  %5747 = vpow2.f32 %v4653_v37 }
0x1134   :  { %v5744_v45 = vpop.eup %5743 }
0x1135   :  { %2328 = vrot.lane.b32.xlu0 %v5744_v45, %s5872_s23 }
0x113c   :  { %v5746_v11 = vpop.eup %5745 }
0x113d   :  { %2440 = vrot.lane.b32.xlu1 %v5746_v11, %s5872_s23  ;;  %v5748_v48 = vpop.eup %5747 }
0x113e   :  { %v2098_v20 = vadd.f32 1.0, %v5748_v48 }
0x1140   :  { %5749 = vrcp.f32 %v2098_v20 }
0x1141   :  { %5751 = vpow2.f32 %v4656_v14 }
0x1142   :  { %5753 = vpow2.f32 %v4659_v49 }
0x1143   :  { %5755 = vpow2.f32 %v4662_v26 }
0x114d   :  { %v5750_v50 = vpop.eup %5749 }
0x114e   :  { %v5752_v52 = vpop.eup %5751  ;;  %v2102_v12 = vmul.f32 %v5750_v50, %v6450_v2 }
0x114f   :  { %v2210_v39 = vadd.f32 1.0, %v5752_v52  ;;  %v5754_v55 = vpop.eup %5753 }
0x1150   :  { %v2322_v24 = vadd.f32 1.0, %v5754_v55  ;;  %v5756_v56 = vpop.eup %5755 }
0x1151   :  { %5757 = vrcp.f32 %v2210_v39  ;;  %v2434_v59 = vadd.f32 1.0, %v5756_v56 }
0x1152   :  { %5759 = vrcp.f32 %v2322_v24 }
0x1153   :  { %5761 = vrcp.f32 %v2434_v59 }
0x115e   :  { %v5758_v61 = vpop.eup %5757 }
0x115f   :  { %v5760_v19 = vpop.eup %5759  ;;  %v2214_v62 = vmul.f32 %v5758_v61, %v6455_v57 }
0x1160   :  { %v5762_v3 = vpop.eup %5761  ;;  %v2326_v29 = vmul.f32 %v5760_v19, %v6459_v15 }
0x1161   :  { %v2438_v2 = vmul.f32 %v5762_v3, %v6463_v25 }
0x118b   :  { %v2105_v51 = vpop.permute.xlu0 %2104 }
0x118c   :  { %v2107_v53 = vmul.f32 %v5750_v50, %v2105_v51 }
0x118e   :  { %2109 = vrot.lane.b32.xlu0 %v2107_v53, %s5873_s24 }
0x119f   :  { %v2217_v41 = vpop.permute.xlu1 %2216 }
0x11a0   :  { %v2219_v27 = vmul.f32 %v5758_v61, %v2217_v41 }
0x11a2   :  { %2221 = vrot.lane.b32.xlu1 %v2219_v27, %s5873_s24 }
0x11a7   :  { %v2329_v0 = vpop.permute.xlu0 %2328 }
0x11a8   :  { %v2331_v17 = vmul.f32 %v5760_v19, %v2329_v0 }
0x11aa   :  { %2333 = vrot.lane.b32.xlu0 %v2331_v17, %s5873_s24 }
0x11af   :  { %v2441_v54 = vpop.permute.xlu1 %2440 }
0x11b0   :  { %v2443_v9 = vmul.f32 %v5762_v3, %v2441_v54 }
0x11b2   :  { %2445 = vrot.lane.b32.xlu1 %v2443_v9, %s5873_s24 }
0x1200   :  { %v2110_v13 = vpop.permute.xlu0 %2109 }
0x1201   :  { %v6585_v7 = vadd.f32 %v2110_v13, %v2102_v12 }
0x1203   :  { %5763 = vtanh.f32 %v6585_v7 }
0x1210   :  { %v5764_v60 = vpop.eup %5763 }
0x1211   :  { %2115 = vrot.lane.b32.xlu0 %v5764_v60, %s5872_s23 }
0x1214   :  { %v2222_v28 = vpop.permute.xlu1 %2221 }
0x1215   :  { %v6590_v58 = vadd.f32 %v2222_v28, %v2214_v62 }
0x1217   :  { %5765 = vtanh.f32 %v6590_v58 }
0x121c   :  { %v2334_v5 = vpop.permute.xlu0 %2333 }
0x121d   :  { %v6594_v30 = vadd.f32 %v2334_v5, %v2326_v29 }
0x121f   :  { %5767 = vtanh.f32 %v6594_v30 }
0x1224   :  { %v5766_v4 = vpop.eup %5765  ;;  %v2446_v31 = vpop.permute.xlu1 %2445 }
0x1225   :  { %v6598_v10 = vadd.f32 %v2446_v31, %v2438_v2  ;;  %2227 = vrot.lane.b32.xlu1 %v5766_v4, %s5872_s23 }
0x1227   :  { %5769 = vtanh.f32 %v6598_v10 }
0x122c   :  { %v5768_v57 = vpop.eup %5767 }
0x122d   :  { %2339 = vrot.lane.b32.xlu0 %v5768_v57, %s5872_s23 }
0x1234   :  { %v5770_v33 = vpop.eup %5769 }
0x1235   :  { %2451 = vrot.lane.b32.xlu1 %v5770_v33, %s5872_s23 }
0x1283   :  { %v2116_v15 = vpop.permute.xlu0 %2115 }
0x1284   :  { %v2118_v35 = vmul.f32 %v5750_v50, %v2116_v15 }
0x1286   :  { %v2455_v36 = vpack.c.bf16 %v2118_v35, %v2118_v35 }
0x1288   :  { %2457 = vrot.lane.b32.xlu0 %v2455_v36, %s5873_s24 }
0x1297   :  { %v2228_v25 = vpop.permute.xlu1 %2227 }
0x1298   :  { %v2230_v45 = vmul.f32 %v5758_v61, %v2228_v25 }
0x129a   :  { %v2527_v11 = vpack.c.bf16 %v2230_v45, %v2230_v45 }
0x129c   :  { %2529 = vrot.lane.b32.xlu1 %v2527_v11, %s5873_s24 }
0x129f   :  { %v2340_v37 = vpop.permute.xlu0 %2339 }
0x12a0   :  { %v2342_v48 = vmul.f32 %v5760_v19, %v2340_v37 }
0x12a2   :  { %v2639_v20 = vpack.c.bf16 %v2342_v48, %v2342_v48 }
0x12a4   :  { %2641 = vrot.lane.b32.xlu0 %v2639_v20, %s5873_s24 }
0x12a7   :  { %v2452_v14 = vpop.permute.xlu1 %2451 }
0x12a8   :  { %v2454_v49 = vmul.f32 %v5762_v3, %v2452_v14 }
0x12aa   :  { %v2751_v26 = vpack.c.bf16 %v2454_v49, %v2454_v49 }
0x12ac   :  { %2753 = vrot.lane.b32.xlu1 %v2751_v26, %s5873_s24 }
0x12fa   :  { %v2458_v51 = vpop.permute.xlu0 %2457 }
0x12fb   :  { %5341 = vmatmul.mubr.msk.bf16.vlgmr.msra.gmra.mxu1 %vm223_vm2, %v2458_v51 }
0x12fc   :  { %5353 = vmatpush3.bf16.msra.mxu1 %v6364_v40  ;;  %5356 = vmatprep.mubr.msk.bf16.mxu1 %vm5870_vm1, %v5869_v1 }
0x12fd   :  { %5354 = vmatprep.subr.bf16.mxu1 %v5869_v1 }
0x1300   :  { %5355 = vmatpush3.bf16.msra.mxu1 %v6373_v6 }
0x1301   :  { %5368 = vmatprep.subr.bf16.mxu1 %v5869_v1 }
0x1303   :  { %5357 = vmatmul.mubr.msk.bf16.vlgmr.msra.gmra.mxu1 %vm223_vm2, %v2458_v51 }
0x1304   :  { %5369 = vmatpush3.bf16.msra.mxu1 %v6484_v47  ;;  %5372 = vmatprep.mubr.msk.bf16.mxu1 %vm5870_vm1, %v5869_v1 }
0x1305   :  { %5370 = vmatprep.subr.bf16.mxu1 %v5869_v1 }
0x1308   :  { %5371 = vmatpush3.bf16.msra.mxu1 %v6493_v34 }
0x1309   :  { %5384 = vmatprep.subr.bf16.mxu1 %v5869_v1 }
0x130e   :  { %v2530_v50 = vpop.permute.xlu1 %2529 }
0x130f   :  { %5349 = vmatmul.mubr.msk.bf16.vlgmr.msra.gmra.mxu0 %vm223_vm2, %v2530_v50  ;;  %5373 = vmatmul.mubr.msk.bf16.vlgmr.msra.gmra.mxu1 %vm223_vm2, %v2530_v50 }
0x1310   :  { %5361 = vmatpush3.bf16.msra.mxu0 %v6502_v38  ;;  %5385 = vmatpush3.bf16.msra.mxu1 %v6508_v44 }
0x1311   :  { %5362 = vmatprep.subr.bf16.mxu0 %v5869_v1  ;;  %5386 = vmatprep.subr.bf16.mxu1 %v5869_v1 }
0x1312   :  { %5364 = vmatprep.mubr.msk.bf16.mxu0 %vm5870_vm1, %v5869_v1  ;;  %5388 = vmatprep.mubr.msk.bf16.mxu1 %vm5870_vm1, %v5869_v1 }
0x1314   :  { %5363 = vmatpush3.bf16.msra.mxu0 %v6520_v63  ;;  %5387 = vmatpush3.bf16.msra.mxu1 %v6526_v42 }
0x1315   :  { %5376 = vmatprep.subr.bf16.mxu0 %v5869_v1  ;;  %5400 = vmatprep.subr.bf16.mxu1 %v5869_v1 }
0x1316   :  { %v2642_v52 = vpop.permute.xlu0 %2641 }
0x1317   :  { %5365 = vmatmul.mubr.msk.bf16.vlgmr.msra.gmra.mxu0 %vm223_vm2, %v2642_v52  ;;  %5389 = vmatmul.mubr.msk.bf16.vlgmr.msra.gmra.mxu1 %vm223_vm2, %v2642_v52 }
0x1318   :  { %5377 = vmatpush3.bf16.msra.mxu0 %v6536_v16  ;;  %5380 = vmatprep.mubr.msk.bf16.mxu0 %vm5870_vm1, %v5869_v1 }
0x1319   :  { %5378 = vmatprep.subr.bf16.mxu0 %v5869_v1  ;;  %5401 = vmatpush3.bf16.msra.mxu1 %v6364_v40 }
0x131a   :  { %5402 = vmatprep.subr.bf16.mxu1 %v5869_v1  ;;  %5404 = vmatprep.mubr.msk.bf16.mxu1 %vm5870_vm1, %v5869_v1 }
0x131c   :  { %5379 = vmatpush3.bf16.msra.mxu0 %v6549_v18 }
0x131d   :  { %5403 = vmatpush3.bf16.msra.mxu1 %v6373_v6  ;;  %5392 = vmatprep.subr.bf16.mxu0 %v5869_v1 }
0x131e   :  { %v2754_v53 = vpop.permute.xlu1 %2753  ;;  %5416 = vmatprep.subr.bf16.mxu1 %v5869_v1 }
0x131f   :  { %5381 = vmatmul.mubr.msk.bf16.vlgmr.msra.gmra.mxu0 %vm223_vm2, %v2754_v53 }
0x1320   :  { %5393 = vmatpush3.bf16.msra.mxu0 %v6407_v43  ;;  %5396 = vmatprep.mubr.msk.bf16.mxu0 %vm5870_vm1, %v5869_v1 }
0x1321   :  { %5394 = vmatprep.subr.bf16.mxu0 %v5869_v1 }
0x1324   :  { %5395 = vmatpush3.bf16.msra.mxu0 %v6418_v46 }
0x1325   :  { %5408 = vmatprep.subr.bf16.mxu0 %v5869_v1 }
0x13bb   :  { %v2496_v40 = vpop.f32.mrf.mxu1 }
0x13bc   :  { %v2502_v6 = vadd.f32 %v2496_v40, %v5990_v21 }
0x13bd   :  { %v5342_v39 = vpop.f32.mrf.mxu1 }
0x13be   :  { %5771 = vtanh.f32 %v2502_v6  ;;  %v4664_v20 = vmul.f32 -1.442695, %v2502_v6 }
0x13bf   :  { %v2499_v55 = vpop.f32.mrf.mxu1 }
0x13c1   :  { %v5343_v24 = vpop.f32.mrf.mxu1 }
0x13c3   :  { %v2608_v56 = vpop.f32.mrf.mxu1 }
0x13c5   :  { %v5358_v59 = vpop.f32.mrf.mxu1 }
0x13c7   :  { %v2611_v61 = vpop.f32.mrf.mxu1 }
0x13c9   :  { %v5359_v43 = vpop.f32.mrf.mxu1 }
0x13cb   :  { %v5772_v41 = vpop.eup %5771 }
0x13cc   :  { %2512 = vrot.lane.b32.xlu0 %v5772_v41, %s5872_s23 }
0x13cf   :  { %v2568_v27 = vpop.f32.mrf.mxu0  ;;  %v2720_v19 = vpop.f32.mrf.mxu1 }
0x13d0   :  { %v2609_v0 = vadd.f32 %v2608_v56, %v2568_v27 }
0x13d1   :  { %v5350_v46 = vpop.f32.mrf.mxu0  ;;  %v5374_v17 = vpop.f32.mrf.mxu1 }
0x13d2   :  { %v2614_v3 = vadd.f32 %v6437_v22, %v2609_v0 }
0x13d3   :  { %v2571_v54 = vpop.f32.mrf.mxu0  ;;  %v2723_v21 = vpop.f32.mrf.mxu1 }
0x13d4   :  { %5773 = vtanh.f32 %v2614_v3  ;;  %v4667_v26 = vmul.f32 -1.442695, %v2614_v3 }
0x13d5   :  { %v5351_v9 = vpop.f32.mrf.mxu0  ;;  %v5375_v12 = vpop.f32.mrf.mxu1 }
0x13d7   :  { %v2680_v13 = vpop.f32.mrf.mxu0  ;;  %v2832_v60 = vpop.f32.mrf.mxu1 }
0x13d8   :  { %v2721_v62 = vadd.f32 %v2720_v19, %v2680_v13 }
0x13d9   :  { %v5366_v28 = vpop.f32.mrf.mxu0  ;;  %v5390_v29 = vpop.f32.mrf.mxu1 }
0x13da   :  { %v2726_v5 = vadd.f32 %v6568_v23, %v2721_v62 }
0x13db   :  { %v2683_v2 = vpop.f32.mrf.mxu0  ;;  %v2835_v4 = vpop.f32.mrf.mxu1 }
0x13dc   :  { %5775 = vtanh.f32 %v2726_v5  ;;  %v4670_v51 = vmul.f32 -1.442695, %v2726_v5 }
0x13dd   :  { %v5367_v31 = vpop.f32.mrf.mxu0  ;;  %v5391_v57 = vpop.f32.mrf.mxu1 }
0x13df   :  { %v2792_v33 = vpop.f32.mrf.mxu0 }
0x13e0   :  { %v2833_v15 = vadd.f32 %v2832_v60, %v2792_v33 }
0x13e1   :  { %v5774_v35 = vpop.eup %5773  ;;  %v5382_v36 = vpop.f32.mrf.mxu0 }
0x13e2   :  { %v2838_v25 = vadd.f32 %v6574_v32, %v2833_v15  ;;  %2624 = vrot.lane.b32.xlu1 %v5774_v35, %s5872_s23 }
0x13e3   :  { %v2795_v45 = vpop.f32.mrf.mxu0 }
0x13e4   :  { %5777 = vtanh.f32 %v2838_v25  ;;  %v4673_v40 = vmul.f32 -1.442695, %v2838_v25 }
0x13e5   :  { %v5383_v11 = vpop.f32.mrf.mxu0  ;;  %5779 = vpow2.f32 %v4664_v20 }
0x13e9   :  { %v5776_v37 = vpop.eup %5775 }
0x13ea   :  { %2736 = vrot.lane.b32.xlu0 %v5776_v37, %s5872_s23 }
0x13f1   :  { %v5778_v48 = vpop.eup %5777 }
0x13f2   :  { %2848 = vrot.lane.b32.xlu1 %v5778_v48, %s5872_s23  ;;  %v5780_v14 = vpop.eup %5779 }
0x13f3   :  { %v2506_v49 = vadd.f32 1.0, %v5780_v14 }
0x13f5   :  { %5781 = vrcp.f32 %v2506_v49 }
0x13f6   :  { %5783 = vpow2.f32 %v4667_v26 }
0x13f7   :  { %5785 = vpow2.f32 %v4670_v51 }
0x13f8   :  { %5787 = vpow2.f32 %v4673_v40 }
0x1402   :  { %v5782_v50 = vpop.eup %5781 }
0x1403   :  { %v5784_v39 = vpop.eup %5783  ;;  %v2510_v54 = vmul.f32 %v5782_v50, %v6585_v7 }
0x1404   :  { %v2618_v55 = vadd.f32 1.0, %v5784_v39  ;;  %v5786_v24 = vpop.eup %5785 }
0x1405   :  { %v2730_v6 = vadd.f32 1.0, %v5786_v24  ;;  %v5788_v56 = vpop.eup %5787 }
0x1406   :  { %5789 = vrcp.f32 %v2618_v55  ;;  %v2842_v59 = vadd.f32 1.0, %v5788_v56 }
0x1407   :  { %5791 = vrcp.f32 %v2730_v6 }
0x1408   :  { %5793 = vrcp.f32 %v2842_v59 }
0x1413   :  { %v5790_v61 = vpop.eup %5789 }
0x1414   :  { %v5792_v27 = vpop.eup %5791  ;;  %v2622_v13 = vmul.f32 %v5790_v61, %v6590_v58 }
0x1415   :  { %v5794_v46 = vpop.eup %5793  ;;  %v2734_v28 = vmul.f32 %v5792_v27, %v6594_v30 }
0x1416   :  { %v2846_v7 = vmul.f32 %v5794_v46, %v6598_v10 }
0x143e   :  { %v2513_v52 = vpop.permute.xlu0 %2512 }
0x143f   :  { %v2515_v53 = vmul.f32 %v5782_v50, %v2513_v52 }
0x1441   :  { %2517 = vrot.lane.b32.xlu0 %v2515_v53, %s5873_s24 }
0x1454   :  { %v2625_v43 = vpop.permute.xlu1 %2624 }
0x1455   :  { %v2627_v41 = vmul.f32 %v5790_v61, %v2625_v43 }
0x1457   :  { %2629 = vrot.lane.b32.xlu1 %v2627_v41, %s5873_s24 }
0x145c   :  { %v2737_v19 = vpop.permute.xlu0 %2736 }
0x145d   :  { %v2739_v0 = vmul.f32 %v5792_v27, %v2737_v19 }
0x145f   :  { %2741 = vrot.lane.b32.xlu0 %v2739_v0, %s5873_s24 }
0x1464   :  { %v2849_v17 = vpop.permute.xlu1 %2848 }
0x1465   :  { %v2851_v3 = vmul.f32 %v5794_v46, %v2849_v17 }
0x1467   :  { %2853 = vrot.lane.b32.xlu1 %v2851_v3, %s5873_s24 }
0x14b3   :  { %v2518_v21 = vpop.permute.xlu0 %2517 }
0x14b4   :  { %v2520_v9 = vadd.f32 %v2518_v21, %v2510_v54 }
0x14b6   :  { %5795 = vtanh.f32 %v2520_v9 }
0x14c3   :  { %v5796_v12 = vpop.eup %5795 }
0x14c4   :  { %2523 = vrot.lane.b32.xlu0 %v5796_v12, %s5872_s23 }
0x14c9   :  { %v2630_v60 = vpop.permute.xlu1 %2629 }
0x14ca   :  { %v6672_v62 = vadd.f32 %v2630_v60, %v2622_v13 }
0x14cc   :  { %5797 = vtanh.f32 %v6672_v62 }
0x14d1   :  { %v2742_v29 = vpop.permute.xlu0 %2741 }
0x14d2   :  { %v6676_v5 = vadd.f32 %v2742_v29, %v2734_v28 }
0x14d4   :  { %5799 = vtanh.f32 %v6676_v5 }
0x14d9   :  { %v5798_v2 = vpop.eup %5797  ;;  %v2854_v4 = vpop.permute.xlu1 %2853 }
0x14da   :  { %v6680_v31 = vadd.f32 %v2854_v4, %v2846_v7  ;;  %2635 = vrot.lane.b32.xlu1 %v5798_v2, %s5872_s23 }
0x14dc   :  { %5801 = vtanh.f32 %v6680_v31 }
0x14e1   :  { %v5800_v58 = vpop.eup %5799 }
0x14e2   :  { %2747 = vrot.lane.b32.xlu0 %v5800_v58, %s5872_s23 }
0x14e9   :  { %v5802_v57 = vpop.eup %5801 }
0x14ea   :  { %2859 = vrot.lane.b32.xlu1 %v5802_v57, %s5872_s23 }
0x1536   :  { %v2524_v30 = vpop.permute.xlu0 %2523 }
0x1537   :  { %v6686_v33 = vmul.f32 %v5782_v50, %v2524_v30 }
0x1539   :  { %v2910_v10 = vpack.c.bf16 %v6686_v33, %v6686_v33 }
0x153b   :  { %2912 = vrot.lane.b32.xlu1 %v2910_v10, %s5873_s24 }
0x154c   :  { %v2636_v15 = vpop.permute.xlu1 %2635 }
0x154d   :  { %v2638_v35 = vmul.f32 %v5790_v61, %v2636_v15 }
0x154f   :  { %v2863_v36 = vpack.c.bf16 %v2638_v35, %v2638_v35 }
0x1551   :  { %2865 = vrot.lane.b32.xlu0 %v2863_v36, %s5873_s24 }
0x1554   :  { %v2748_v25 = vpop.permute.xlu0 %2747 }
0x1555   :  { %v2750_v45 = vmul.f32 %v5792_v27, %v2748_v25 }
0x1557   :  { %v2982_v11 = vpack.c.bf16 %v2750_v45, %v2750_v45 }
0x1559   :  { %2984 = vrot.lane.b32.xlu0 %v2982_v11, %s5873_s24 }
0x155c   :  { %v2860_v37 = vpop.permute.xlu1 %2859 }
0x155d   :  { %v2862_v48 = vmul.f32 %v5794_v46, %v2860_v37 }
0x155f   :  { %v3094_v20 = vpack.c.bf16 %v2862_v48, %v2862_v48 }
0x1561   :  { %3096 = vrot.lane.b32.xlu1 %v3094_v20, %s5873_s24 }
0x15ad   :  { %v2913_v14 = vpop.permute.xlu1 %2912 }
0x15ae   :  { %5405 = vmatmul.mubr.msk.bf16.vlgmr.msra.gmra.mxu1 %vm223_vm2, %v2913_v14 }
0x15af   :  { %5417 = vmatpush3.bf16.msra.mxu1 %v6484_v47  ;;  %5420 = vmatprep.mubr.msk.bf16.mxu1 %vm5870_vm1, %v5869_v1 }
0x15b0   :  { %5418 = vmatprep.subr.bf16.mxu1 %v5869_v1 }
0x15b3   :  { %5419 = vmatpush3.bf16.msra.mxu1 %v6493_v34 }
0x15b4   :  { %5432 = vmatprep.subr.bf16.mxu1 %v5869_v1 }
0x15c3   :  { %v2866_v49 = vpop.permute.xlu0 %2865 }
0x15c4   :  { %5397 = vmatmul.mubr.msk.bf16.vlgmr.msra.gmra.mxu0 %vm223_vm2, %v2866_v49  ;;  %5421 = vmatmul.mubr.msk.bf16.vlgmr.msra.gmra.mxu1 %vm223_vm2, %v2866_v49 }
0x15c5   :  { %5409 = vmatpush3.bf16.msra.mxu0 %v6502_v38  ;;  %5433 = vmatpush3.bf16.msra.mxu1 %v6508_v44 }
0x15c6   :  { %5410 = vmatprep.subr.bf16.mxu0 %v5869_v1  ;;  %5434 = vmatprep.subr.bf16.mxu1 %v5869_v1 }
0x15c7   :  { %5412 = vmatprep.mubr.msk.bf16.mxu0 %vm5870_vm1, %v5869_v1  ;;  %5436 = vmatprep.mubr.msk.bf16.mxu1 %vm5870_vm1, %v5869_v1 }
0x15c9   :  { %5411 = vmatpush3.bf16.msra.mxu0 %v6520_v63  ;;  %5435 = vmatpush3.bf16.msra.mxu1 %v6526_v42 }
0x15ca   :  { %5424 = vmatprep.subr.bf16.mxu0 %v5869_v1  ;;  %5448 = vmatprep.subr.bf16.mxu1 %v5869_v1 }
0x15cb   :  { %v2985_v26 = vpop.permute.xlu0 %2984 }
0x15cc   :  { %5413 = vmatmul.mubr.msk.bf16.vlgmr.msra.gmra.mxu0 %vm223_vm2, %v2985_v26  ;;  %5437 = vmatmul.mubr.msk.bf16.vlgmr.msra.gmra.mxu1 %vm223_vm2, %v2985_v26 }
0x15cd   :  { %5425 = vmatpush3.bf16.msra.mxu0 %v6536_v16  ;;  %5428 = vmatprep.mubr.msk.bf16.mxu0 %vm5870_vm1, %v5869_v1 }
0x15ce   :  { %5426 = vmatprep.subr.bf16.mxu0 %v5869_v1  ;;  %5449 = vmatpush3.bf16.msra.mxu1 %v6484_v47 }
0x15cf   :  { %5450 = vmatprep.subr.bf16.mxu1 %v5869_v1  ;;  %5452 = vmatprep.mubr.msk.bf16.mxu1 %vm5870_vm1, %v5869_v1 }
0x15d1   :  { %5427 = vmatpush3.bf16.msra.mxu0 %v6549_v18 }
0x15d2   :  { %5451 = vmatpush3.bf16.msra.mxu1 %v6493_v34  ;;  %5440 = vmatprep.subr.bf16.mxu0 %v5869_v1 }
0x15d3   :  { %v3097_v51 = vpop.permute.xlu1 %3096  ;;  %5464 = vmatprep.subr.bf16.mxu1 %v5869_v1 }
0x15d4   :  { %5429 = vmatmul.mubr.msk.bf16.vlgmr.msra.gmra.mxu0 %vm223_vm2, %v3097_v51 }
0x15d5   :  { %5441 = vmatpush3.bf16.msra.mxu0 %v6502_v38  ;;  %5444 = vmatprep.mubr.msk.bf16.mxu0 %vm5870_vm1, %v5869_v1 }
0x15d6   :  { %5442 = vmatprep.subr.bf16.mxu0 %v5869_v1 }
0x15d9   :  { %5443 = vmatpush3.bf16.msra.mxu0 %v6520_v63 }
0x15da   :  { %5456 = vmatprep.subr.bf16.mxu0 %v5869_v1 }
0x166e   :  { %v2951_v47 = vpop.f32.mrf.mxu1 }
0x1670   :  { %v5406_v34 = vpop.f32.mrf.mxu1 }
0x1672   :  { %v2954_v50 = vpop.f32.mrf.mxu1 }
0x1674   :  { %v5407_v52 = vpop.f32.mrf.mxu1 }
0x1684   :  { %v2904_v53 = vpop.f32.mrf.mxu0  ;;  %v3063_v40 = vpop.f32.mrf.mxu1 }
0x1685   :  { %v2952_v39 = vadd.f32 %v2951_v47, %v2904_v53 }
0x1686   :  { %v5398_v55 = vpop.f32.mrf.mxu0  ;;  %v5422_v24 = vpop.f32.mrf.mxu1 }
0x1687   :  { %v2957_v38 = vadd.f32 %v6437_v22, %v2952_v39 }
0x1688   :  { %v2907_v6 = vpop.f32.mrf.mxu0  ;;  %v3066_v56 = vpop.f32.mrf.mxu1 }
0x1689   :  { %5803 = vtanh.f32 %v2957_v38  ;;  %v4676_v2 = vmul.f32 -1.442695, %v2957_v38  ;;  %v3556_v56 = vmax.f32 %v6686_v33, 0.0 }
0x168a   :  { %v5399_v59 = vpop.f32.mrf.mxu0  ;;  %v5423_v61 = vpop.f32.mrf.mxu1 }
0x168c   :  { %v3023_v43 = vpop.f32.mrf.mxu0  ;;  %v3175_v63 = vpop.f32.mrf.mxu1 }
0x168d   :  { %v3064_v41 = vadd.f32 %v3063_v40, %v3023_v43 }
0x168e   :  { %v5414_v27 = vpop.f32.mrf.mxu0  ;;  %v5438_v19 = vpop.f32.mrf.mxu1 }
0x168f   :  { %v3069_v0 = vadd.f32 %v6568_v23, %v3064_v41 }
0x1690   :  { %v3026_v46 = vpop.f32.mrf.mxu0  ;;  %v3178_v17 = vpop.f32.mrf.mxu1 }
0x1691   :  { %5805 = vtanh.f32 %v3069_v0  ;;  %v4679_v4 = vmul.f32 -1.442695, %v3069_v0 }
0x1692   :  { %v5415_v3 = vpop.f32.mrf.mxu0  ;;  %v5439_v54 = vpop.f32.mrf.mxu1 }
0x1694   :  { %v3135_v21 = vpop.f32.mrf.mxu0 }
0x1695   :  { %v3176_v9 = vadd.f32 %v3175_v63, %v3135_v21 }
0x1696   :  { %v5804_v22 = vpop.eup %5803  ;;  %v5430_v12 = vpop.f32.mrf.mxu0 }
0x1697   :  { %v3181_v13 = vadd.f32 %v6574_v32, %v3176_v9  ;;  %2967 = vrot.lane.b32.xlu0 %v5804_v22, %s5872_s23 }
0x1698   :  { %v3138_v60 = vpop.f32.mrf.mxu0 }
0x1699   :  { %5807 = vtanh.f32 %v3181_v13  ;;  %v4682_v58 = vmul.f32 -1.442695, %v3181_v13 }
0x169a   :  { %v5431_v28 = vpop.f32.mrf.mxu0  ;;  %5809 = vpow2.f32 %v4676_v2 }
0x169b   :  { %5811 = vpow2.f32 %v4679_v4 }
0x169c   :  { %5813 = vpow2.f32 %v4682_v58 }
0x169e   :  { %v5806_v29 = vpop.eup %5805 }
0x169f   :  { %3079 = vrot.lane.b32.xlu1 %v5806_v29, %s5872_s23 }
0x16a6   :  { %v5808_v7 = vpop.eup %5807 }
0x16a7   :  { %3191 = vrot.lane.b32.xlu0 %v5808_v7, %s5872_s23  ;;  %v5810_v57 = vpop.eup %5809 }
0x16a8   :  { %v2961_v30 = vadd.f32 1.0, %v5810_v57  ;;  %v5812_v10 = vpop.eup %5811 }
0x16a9   :  { %v3073_v15 = vadd.f32 1.0, %v5812_v10  ;;  %v5814_v35 = vpop.eup %5813 }
0x16aa   :  { %5815 = vrcp.f32 %v2961_v30  ;;  %v3185_v36 = vadd.f32 1.0, %v5814_v35 }
0x16ab   :  { %5817 = vrcp.f32 %v3073_v15 }
0x16ac   :  { %5819 = vrcp.f32 %v3185_v36 }
0x16b7   :  { %v5816_v25 = vpop.eup %5815 }
0x16b8   :  { %v5818_v37 = vpop.eup %5817  ;;  %v2965_v51 = vmul.f32 %v5816_v25, %v6672_v62 }
0x16b9   :  { %v5820_v14 = vpop.eup %5819  ;;  %v3077_v50 = vmul.f32 %v5818_v37, %v6676_v5 }
0x16ba   :  { %v3189_v40 = vmul.f32 %v5820_v14, %v6680_v31 }
0x1709   :  { %v2968_v45 = vpop.permute.xlu0 %2967 }
0x170a   :  { %v2970_v11 = vmul.f32 %v5816_v25, %v2968_v45 }
0x170c   :  { %2972 = vrot.lane.b32.xlu1 %v2970_v11, %s5873_s24 }
0x1711   :  { %v3080_v48 = vpop.permute.xlu1 %3079 }
0x1712   :  { %v3082_v20 = vmul.f32 %v5818_v37, %v3080_v48 }
0x1714   :  { %3084 = vrot.lane.b32.xlu0 %v3082_v20, %s5873_s24 }
0x1719   :  { %v3192_v49 = vpop.permute.xlu0 %3191 }
0x171a   :  { %v3194_v26 = vmul.f32 %v5820_v14, %v3192_v49 }
0x171c   :  { %3196 = vrot.lane.b32.xlu1 %v3194_v26, %s5873_s24 }
0x177e   :  { %v2973_v47 = vpop.permute.xlu1 %2972 }
0x177f   :  { %v2975_v34 = vadd.f32 %v2973_v47, %v2965_v51 }
0x1781   :  { %5821 = vtanh.f32 %v2975_v34 }
0x1786   :  { %v3085_v52 = vpop.permute.xlu0 %3084 }
0x1787   :  { %v6747_v53 = vadd.f32 %v3085_v52, %v3077_v50 }
0x1789   :  { %5823 = vtanh.f32 %v6747_v53 }
0x178e   :  { %v5822_v39 = vpop.eup %5821  ;;  %v3197_v55 = vpop.permute.xlu1 %3196 }
0x178f   :  { %v6751_v24 = vadd.f32 %v3197_v55, %v3189_v40  ;;  %2978 = vrot.lane.b32.xlu0 %v5822_v39, %s5872_s23 }
0x1791   :  { %5825 = vtanh.f32 %v6751_v24 }
0x1796   :  { %v5824_v62 = vpop.eup %5823 }
0x1797   :  { %3090 = vrot.lane.b32.xlu1 %v5824_v62, %s5872_s23 }
0x179e   :  { %v5826_v38 = vpop.eup %5825 }
0x179f   :  { %3202 = vrot.lane.b32.xlu0 %v5826_v38, %s5872_s23 }
0x1801   :  { %v2979_v5 = vpop.permute.xlu0 %2978 }
0x1802   :  { %v2981_v6 = vmul.f32 %v5816_v25, %v2979_v5 }
0x1804   :  { %v3253_v59 = vpack.c.bf16 %v2981_v6, %v2981_v6  ;;  %v3557_v31 = vmax.f32 %v2981_v6, 0.0 }
0x1806   :  { %v6758_v61 = vpack.c.bf16 %v3557_v31, %v3556_v56  ;;  %3255 = vrot.lane.b32.xlu0 %v3253_v59, %s5873_s24 }
0x1809   :  { %v3091_v43 = vpop.permute.xlu1 %3090 }
0x180a   :  { %v3093_v63 = vmul.f32 %v5818_v37, %v3091_v43 }
0x180c   :  { %v3206_v41 = vpack.c.bf16 %v3093_v63, %v3093_v63 }
0x180e   :  { %3208 = vrot.lane.b32.xlu1 %v3206_v41, %s5873_s24 }
0x1811   :  { %v3203_v27 = vpop.permute.xlu0 %3202 }
0x1812   :  { %v3205_v19 = vmul.f32 %v5820_v14, %v3203_v27 }
0x1814   :  { %v3325_v0 = vpack.c.bf16 %v3205_v19, %v3205_v19 }
0x1816   :  { %3327 = vrot.lane.b32.xlu1 %v3325_v0, %s5873_s24 }
0x1878   :  { %v3256_v46 = vpop.permute.xlu0 %3255 }
0x1879   :  { %5453 = vmatmul.mubr.msk.bf16.vlgmr.msra.gmra.mxu1 %vm223_vm2, %v3256_v46 }
0x187a   :  { %5465 = vmatpush3.bf16.msra.mxu1 %v6508_v44  ;;  %5468 = vmatprep.mubr.msk.bf16.mxu1 %vm5870_vm1, %v5869_v1 }
0x187b   :  { %5466 = vmatprep.subr.bf16.mxu1 %v5869_v1 }
0x187e   :  { %5467 = vmatpush3.bf16.msra.mxu1 %v6526_v42 }
0x187f   :  { %5480 = vmatprep.subr.bf16.mxu1 %v5869_v1 }
0x1880   :  { %v3209_v33 = vpop.permute.xlu1 %3208 }
0x1881   :  { %5445 = vmatmul.mubr.msk.bf16.vlgmr.msra.gmra.mxu0 %vm223_vm2, %v3209_v33  ;;  %5469 = vmatmul.mubr.msk.bf16.vlgmr.msra.gmra.mxu1 %vm223_vm2, %v3209_v33 }
0x1882   :  { %5457 = vmatpush3.bf16.msra.mxu0 %v6536_v16  ;;  %5460 = vmatprep.mubr.msk.bf16.mxu0 %vm5870_vm1, %v5869_v1 }
0x1883   :  { %5458 = vmatprep.subr.bf16.mxu0 %v5869_v1  ;;  %5481 = vmatpush3.bf16.msra.mxu1 %v6508_v44 }
0x1884   :  { %5482 = vmatprep.subr.bf16.mxu1 %v5869_v1  ;;  %5484 = vmatprep.mubr.msk.bf16.mxu1 %vm5870_vm1, %v5869_v1 }
0x1886   :  { %5459 = vmatpush3.bf16.msra.mxu0 %v6549_v18 }
0x1887   :  { %5483 = vmatpush3.bf16.msra.mxu1 %v6526_v42  ;;  %5472 = vmatprep.subr.bf16.mxu0 %v5869_v1 }
0x1888   :  { %v3328_v17 = vpop.permute.xlu1 %3327 }
0x1889   :  { %5461 = vmatmul.mubr.msk.bf16.vlgmr.msra.gmra.mxu0 %vm223_vm2, %v3328_v17  ;;  %v5526_v17 = vld [vmem:[%s7107_s5 + $0x38] ss:$28 sps:$4 sm:$0xff]  }
0x188a   :  { %5473 = vmatpush3.bf16.msra.mxu0 %v6536_v16  ;;  %5476 = vmatprep.mubr.msk.bf16.mxu0 %vm5870_vm1, %v5869_v1 }
0x188b   :  { %5474 = vmatprep.subr.bf16.mxu0 %v5869_v1 }
0x188e   :  { %5475 = vmatpush3.bf16.msra.mxu0 %v6549_v18 }
0x1939   :  { %v3294_v44 = vpop.f32.mrf.mxu1 }
0x193b   :  { %v5454_v3 = vpop.f32.mrf.mxu1 }
0x193c   :  { %v5529_v3 = vld [vmem:[%s7107_s5 + $0x40] ss:$28 sps:$4 sm:$0xff]  }
0x193d   :  { %v3297_v54 = vpop.f32.mrf.mxu1 }
0x193e   :  { %v5531_v54 = vld [vmem:[%s7107_s5 + $0x44] ss:$28 sps:$4 sm:$0xff]  }
0x193f   :  { %v5455_v21 = vpop.f32.mrf.mxu1  ;;  %3764 = vmatprep.subr.bf16.mxu1 %v5531_v54  ;;  %v5557_v54 = vld [vmem:[%s7108_s7 + $0xa8] sm:$0xff]  }
0x1941   :  { %v3247_v9 = vpop.f32.mrf.mxu0  ;;  %v3406_v42 = vpop.f32.mrf.mxu1 }
0x1942   :  { %v3295_v22 = vadd.f32 %v3294_v44, %v3247_v9  ;;  %v5528_v44 = vld [vmem:[%s7107_s5 + $0x3c] ss:$28 sps:$4 sm:$0xff]  }
0x1943   :  { %v5446_v12 = vpop.f32.mrf.mxu0  ;;  %v5470_v13 = vpop.f32.mrf.mxu1  ;;  %3711 = vmatprep.subr.bf16.mxu0 %v5528_v44 }
0x1944   :  { %v3300_v60 = vadd.f32 %v6568_v23, %v3295_v22  ;;  %v5534_v22 = vld [vmem:[%s7107_s5 + $0x4] ss:$28 sps:$4 sm:$0xff]   ;;  %v5537_v12 = vld [vmem:[%s7107_s5 + $0xc] ss:$28 sps:$4 sm:$0xff]  }
0x1945   :  { %v3250_v28 = vpop.f32.mrf.mxu0  ;;  %v3409_v16 = vpop.f32.mrf.mxu1  ;;  %v5532_v13 = vld [vmem:[%s7107_s5] ss:$28 sps:$4 sm:$0xff]  }
0x1946   :  { %5827 = vtanh.f32 %v3300_v60  ;;  %v4685_v23 = vmul.f32 -1.442695, %v3300_v60  ;;  %v5535_v60 = vld [vmem:[%s7107_s5 + $0x8] ss:$28 sps:$4 sm:$0xff]  }
0x1947   :  { %v5447_v29 = vpop.f32.mrf.mxu0  ;;  %v5471_v7 = vpop.f32.mrf.mxu1 }
0x1949   :  { %v3366_v2 = vpop.f32.mrf.mxu0 }
0x194a   :  { %v3407_v1 = vadd.f32 %v3406_v42, %v3366_v2 }
0x194b   :  { %v5462_v4 = vpop.f32.mrf.mxu0 }
0x194c   :  { %v3412_v18 = vadd.f32 %v6574_v32, %v3407_v1 }
0x194d   :  { %v3369_v58 = vpop.f32.mrf.mxu0 }
0x194e   :  { %5829 = vtanh.f32 %v3412_v18  ;;  %v4688_v15 = vmul.f32 -1.442695, %v3412_v18  ;;  %v5540_v58 = vld [vmem:[%s7107_s5 + $0x4c] ss:$28 sps:$4 sm:$0xff]  }
0x194f   :  { %v5463_v57 = vpop.f32.mrf.mxu0  ;;  %5831 = vpow2.f32 %v4685_v23  ;;  %v5545_v23 = vld [vmem:[%s7107_s5 + $0x18] ss:$28 sps:$4 sm:$0xff]  }
0x1950   :  { %5833 = vpow2.f32 %v4688_v15  ;;  %v5541_v57 = vld [vmem:[%s7107_s5 + $0x50] ss:$28 sps:$4 sm:$0xff]   ;;  %v5546_v15 = vld [vmem:[%s7108_s7 + $0x78] sm:$0xff]  }
0x1953   :  { %v5828_v30 = vpop.eup %5827 }
0x1954   :  { %3310 = vrot.lane.b32.xlu0 %v5828_v30, %s5872_s23  ;;  %v5542_v30 = vld [vmem:[%s7107_s5 + $0x10] ss:$28 sps:$4 sm:$0xff]  }
0x195b   :  { %v5830_v10 = vpop.eup %5829 }
0x195c   :  { %3422 = vrot.lane.b32.xlu1 %v5830_v10, %s5872_s23  ;;  %v5832_v35 = vpop.eup %5831  ;;  %v5544_v10 = vld [vmem:[%s7107_s5 + $0x14] ss:$28 sps:$4 sm:$0xff]  }
0x195d   :  { %v3304_v36 = vadd.f32 1.0, %v5832_v35  ;;  %v5834_v25 = vpop.eup %5833  ;;  %v5547_v35 = vld [vmem:[%s7108_s7 + $0xf8] sm:$0xff]  }
0x195e   :  { %v3416_v45 = vadd.f32 1.0, %v5834_v25 }
0x195f   :  { %5835 = vrcp.f32 %v3304_v36 }
0x1960   :  { %5837 = vrcp.f32 %v3416_v45 }
0x196c   :  { %v5836_v11 = vpop.eup %5835 }
0x196d   :  { %v5838_v20 = vpop.eup %5837  ;;  %v3308_v26 = vmul.f32 %v5836_v11, %v6747_v53 }
0x196e   :  { %v3420_v34 = vmul.f32 %v5838_v20, %v6751_v24 }
0x19c6   :  { %v3311_v37 = vpop.permute.xlu0 %3310 }
0x19c7   :  { %v3313_v48 = vmul.f32 %v5836_v11, %v3311_v37 }
0x19c9   :  { %3315 = vrot.lane.b32.xlu0 %v3313_v48, %s5873_s24 }
0x19ce   :  { %v3423_v14 = vpop.permute.xlu1 %3422 }
0x19cf   :  { %v3425_v49 = vmul.f32 %v5838_v20, %v3423_v14 }
0x19d1   :  { %3427 = vrot.lane.b32.xlu1 %v3425_v49, %s5873_s24 }
0x1a3b   :  { %v3316_v51 = vpop.permute.xlu0 %3315 }
0x1a3c   :  { %v3318_v47 = vadd.f32 %v3316_v51, %v3308_v26 }
0x1a3e   :  { %5839 = vtanh.f32 %v3318_v47 }
0x1a43   :  { %v3428_v50 = vpop.permute.xlu1 %3427 }
0x1a44   :  { %v3430_v52 = vadd.f32 %v3428_v50, %v3420_v34  ;;  %v6885_v34 = vld [vmem:[%s7109_s6] sm:$0x7f] }
0x1a46   :  { %5841 = vtanh.f32 %v3430_v52 }
0x1a4b   :  { %v5840_v40 = vpop.eup %5839 }
0x1a4c   :  { %3321 = vrot.lane.b32.xlu0 %v5840_v40, %s5872_s23 }
0x1a53   :  { %v5842_v39 = vpop.eup %5841 }
0x1a54   :  { %3433 = vrot.lane.b32.xlu1 %v5842_v39, %s5872_s23 }
0x1abe   :  { %v3322_v55 = vpop.permute.xlu0 %3321 }
0x1abf   :  { %v6799_v62 = vmul.f32 %v5836_v11, %v3322_v55 }
0x1ac1   :  { %v3484_v53 = vpack.c.bf16 %v6799_v62, %v6799_v62  ;;  %v3558_v45 = vmax.f32 %v6799_v62, 0.0 }
0x1ac3   :  { %3486 = vrot.lane.b32.xlu1 %v3484_v53, %s5873_s24 }
0x1ac6   :  { %v3434_v38 = vpop.permute.xlu1 %3433 }
0x1ac7   :  { %v3436_v5 = vmul.f32 %v5838_v20, %v3434_v38  ;;  %v3580_v20 = vlaneseq }
0x1ac9   :  { %v3437_v24 = vpack.c.bf16 %v3436_v5, %v3436_v5  ;;  %v6875_v49 = vshrl.u32 %v3580_v20, 7 }
0x1acb   :  { %3439 = vrot.lane.b32.xlu0 %v3437_v24, %s5873_s24  ;;  %v3594_v47 = vsub.s32 3, %v6875_v49  ;;  %v3586_v53 = vsub.s32 1, %v6875_v49 }
0x1acd   :  { %v6888_v40 = vrot.slane %v6885_v34, %v3594_v47  ;;  %v5579_v47 = vld [vmem:[%s7108_s7 + $0x138] sm:$0xff]  }
0x1b35   :  { %v3487_v6 = vpop.permute.xlu1 %3486 }
0x1b36   :  { %5485 = vmatmul.mubr.msk.bf16.vlgmr.msra.gmra.mxu1 %vm223_vm2, %v3487_v6  ;;  %v5548_v6 = vld [vmem:[%s7108_s7 + $0x38] sm:$0xff]  }
0x1b37   :  { %3784 = vmatprep.mubr.bf16.mxu1 %v5871_v8  ;;  %3765 = vmatpush1.bf16.msra.mxu1 %v5529_v3  ;;  %v5556_v3 = vld [vmem:[%s7108_s7 + $0x28] sm:$0xff]  }
0x1b38   :  { %3766 = vmatprep.subr.bf16.mxu1 %v5537_v12  ;;  %v5562_v12 = vld [vmem:[%s7108_s7 + $0x58] sm:$0xff]  }
0x1b3b   :  { %3767 = vmatpush1.bf16.msra.mxu1 %v5535_v60  ;;  %v5564_v60 = vld [vmem:[%s7108_s7 + $0x18] sm:$0xff]  }
0x1b3c   :  { %5488 = vmatprep.subr.bf16.mxu1 %v5541_v57 }
0x1b3d   :  { %v3440_v56 = vpop.permute.xlu0 %3439 }
0x1b3e   :  { %5477 = vmatmul.mubr.msk.bf16.vlgmr.msra.gmra.mxu0 %vm223_vm2, %v3440_v56  ;;  %v5549_v56 = vld [vmem:[%s7108_s7 + $0xb8] sm:$0xff]  }
0x1b3f   :  { %3731 = vmatprep.mubr.bf16.mxu0 %v5871_v8  ;;  %3712 = vmatpush1.bf16.msra.mxu0 %v5526_v17  ;;  %v5555_v17 = vld [vmem:[%s7108_s7 + $0xe8] sm:$0xff]  }
0x1b40   :  { %3713 = vmatprep.subr.bf16.mxu0 %v5534_v22  ;;  %v5561_v22 = vld [vmem:[%s7108_s7 + $0xa0] sm:$0xff]  }
0x1b43   :  { %3714 = vmatpush1.bf16.msra.mxu0 %v5532_v13  ;;  %v5563_v13 = vld [vmem:[%s7108_s7 + $0xd8] sm:$0xff]  }
0x1b44   :  { %3817 = vmatprep.subr.bf16.mxu0 %v5540_v58 }
0x1bf6   :  { %v3525_v59 = vpop.f32.mrf.mxu1 }
0x1bf8   :  { %v5486_v31 = vpop.f32.mrf.mxu1 }
0x1bfa   :  { %v3528_v43 = vpop.f32.mrf.mxu1 }
0x1bfb   :  { %v5550_v43 = vld [vmem:[%s7108_s7 + $0x70] sm:$0xff]  }
0x1bfc   :  { %v5487_v63 = vpop.f32.mrf.mxu1 }
0x1bfd   :  { %v5551_v63 = vld [vmem:[%s7108_s7 + $0xf0] sm:$0xff]  }
0x1bfe   :  { %v3478_v41 = vpop.f32.mrf.mxu0 }
0x1bff   :  { %v3526_v27 = vadd.f32 %v3525_v59, %v3478_v41  ;;  %v6907_v59 = vrot.slane %v6885_v34, %v3586_v53  ;;  %v5583_v53 = vld [vmem:[%s7108_s7 + $0x128] sm:$0xff]  }
0x1c00   :  { %v5478_v19 = vpop.f32.mrf.mxu0 }
0x1c01   :  { %v3531_v0 = vadd.f32 %v6574_v32, %v3526_v27  ;;  %v5552_v19 = vld [vmem:[%s7108_s7 + $0x30] sm:$0xff]  }
0x1c02   :  { %v3481_v46 = vpop.f32.mrf.mxu0 }
0x1c03   :  { %5843 = vtanh.f32 %v3531_v0  ;;  %v4691_v21 = vmul.f32 -1.442695, %v3531_v0  ;;  %v5553_v0 = vld [vmem:[%s7108_s7 + $0xb0] sm:$0xff]  }
0x1c04   :  { %v5479_v33 = vpop.f32.mrf.mxu0 }
0x1c05   :  { %5845 = vpow2.f32 %v4691_v21  ;;  %v5554_v33 = vld [vmem:[%s7108_s7 + $0x68] sm:$0xff]   ;;  %v5558_v21 = vld [vmem:[%s7108_s7 + $0x60] sm:$0xff]  }
0x1c10   :  { %v5844_v32 = vpop.eup %5843 }
0x1c11   :  { %3541 = vrot.lane.b32.xlu0 %v5844_v32, %s5872_s23 }
0x1c12   :  { %v5846_v9 = vpop.eup %5845 }
0x1c13   :  { %v3535_v42 = vadd.f32 1.0, %v5846_v9 }
0x1c15   :  { %5847 = vrcp.f32 %v3535_v42  ;;  %v5560_v42 = vld [vmem:[%s7108_s7 + $0x20] sm:$0xff]  }
0x1c22   :  { %v5848_v28 = vpop.eup %5847 }
0x1c23   :  { %v3539_v7 = vmul.f32 %v5848_v28, %v3430_v52 }
0x1c83   :  { %v3542_v16 = vpop.permute.xlu0 %3541 }
0x1c84   :  { %v3544_v29 = vmul.f32 %v5848_v28, %v3542_v16  ;;  %v5566_v16 = vld [vmem:[%s7108_s7 + $0x50] sm:$0xff]  }
0x1c86   :  { %3546 = vrot.lane.b32.xlu1 %v3544_v29, %s5873_s24  ;;  %v5567_v29 = vld [vmem:[%s7108_s7 + $0xd0] sm:$0xff]  }
0x1c8a   :  { %3617 = vrot.lane.b32.xlu1 %v6758_v61, %s5873_s24  ;;  %v5538_v61 = vld [vmem:[%s7107_s5 + $0x48] ss:$28 sps:$4 sm:$0xff]  }
0x1cf8   :  { %v3547_v2 = vpop.permute.xlu1 %3546 }
0x1cf9   :  { %v3549_v1 = vadd.f32 %v3547_v2, %v3539_v7  ;;  %v3582_v7 = vsub.s32 0, %v6875_v49  ;;  %v3590_v2 = vsub.s32 2, %v6875_v49 }
0x1cfb   :  { %5849 = vtanh.f32 %v3549_v1  ;;  %v5568_v1 = vld [vmem:[%s7108_s7 + $0x10] sm:$0xff]   ;;  %v6985_v58 = vrot.slane %v6885_v34, %v3582_v7 }
0x1cfc   :  { %v6838_v4 = vpop.permute.xlu1 %3617 }
0x1cfd   :  { %4706 = vmatmul.mubr.msk.bf16.vlgmr.msra.gmra.mxu0 %vm223_vm2, %v6838_v4  ;;  %4708 = vmatmul.mubr.msk.bf16.vlgmr.msra.gmra.mxu1 %vm223_vm2, %v6838_v4 }
0x1cfe   :  { %3741 = vmatprep.mubr.bf16.mxu0 %v5871_v8  ;;  %3794 = vmatprep.mubr.bf16.mxu1 %v5871_v8 }
0x1cff   :  { %3818 = vmatpush1.bf16.msra.mxu0 %v5538_v61  ;;  %5489 = vmatpush3.bf16.msra.mxu1 %v5541_v57  ;;  %v5571_v61 = vld [vmem:[%s7108_s7 + $0xc8] sm:$0xff]   ;;  %v6988_v57 = vrot.slane %v6885_v34, %v3590_v2 }
0x1d00   :  { %3819 = vmatprep.subr.bf16.mxu0 %v5544_v10  ;;  %5490 = vmatprep.subr.bf16.mxu1 %v5545_v23  ;;  %v5573_v10 = vld [vmem:[%s7108_s7 + $0x88] sm:$0xff]  }
0x1d03   :  { %3820 = vmatpush1.bf16.msra.mxu0 %v5542_v30  ;;  %5491 = vmatpush3.bf16.msra.mxu1 %v5545_v23  ;;  %v5572_v30 = vld [vmem:[%s7108_s7 + $0x8] sm:$0xff]  }
0x1d04   :  { %4943 = vmatprep.subr.bf16.mxu0 %v5546_v15  ;;  %4971 = vmatprep.subr.bf16.mxu1 %v5547_v35  ;;  %v5574_v35 = vld [vmem:[%s7108_s7 + $0x40] sm:$0xff]  }
0x1d08   :  { %v5850_v18 = vpop.eup %5849 }
0x1d09   :  { %3552 = vrot.lane.b32.xlu0 %v5850_v18, %s5872_s23  ;;  %v5570_v18 = vld [vmem:[%s7108_s7 + $0x48] sm:$0xff]  }
0x1d7b   :  { %v3553_v36 = vpop.permute.xlu0 %3552 }
0x1d7c   :  { %v3555_v25 = vmul.f32 %v5848_v28, %v3553_v36  ;;  %v5565_v28 = vld [vmem:[%s7108_s7 + $0x98] sm:$0xff]   ;;  %v5575_v36 = vld [vmem:[%s7108_s7 + $0xc0] sm:$0xff]  }
0x1d7e   :  { %v3559_v11 = vmax.f32 %v3555_v25, 0.0 }
0x1d80   :  { %v3561_v37 = vpack.c.bf16 %v3559_v11, %v3558_v45  ;;  %v5576_v11 = vld [vmem:[%s7108_s7] sm:$0xff]  }
0x1d82   :  { %3619 = vrot.lane.b32.xlu0 %v3561_v37, %s5873_s24  ;;  %v5577_v37 = vld [vmem:[%s7108_s7 + $0x80] sm:$0xff]  }
0x1dbd   :  { %v6873_v48 = vpop.f32.mrf.mxu1  ;;  %v6877_v26 = vpop.f32.mrf.mxu0 }
0x1dbe   :  { %v3734_v25 = vadd.f32 %v6877_v26, %v6985_v58  ;;  %v3787_v45 = vadd.f32 %v6873_v48, %v6988_v57  ;;  %v5578_v26 = vld [vmem:[%s7108_s7 + $0x178] sm:$0xff]  }
0x1dbf   :  { %v3788_v14 = vpop.f32.mrf.mxu1  ;;  %v3735_v50 = vpop.f32.mrf.mxu0 }
0x1dc0   :  { %v3789_v38 = vadd.f32 %v3788_v14, %v6888_v40  ;;  %v3736_v46 = vadd.f32 %v3735_v50, %v6907_v59  ;;  %v3909_v48 = vmax.f32 %v3787_v45, 0.0 }
0x1dc1   :  { %v6879_v51 = vpop.f32.mrf.mxu1  ;;  %v6893_v62 = vpop.f32.mrf.mxu0 }
0x1dc2   :  { %v3910_v31 = vmax.f32 %v3789_v38, 0.0  ;;  %v3908_v32 = vmax.f32 %v3736_v46, 0.0  ;;  %v3738_v23 = vadd.f32 %v6893_v62, %v6985_v58  ;;  %v3791_v15 = vadd.f32 %v6879_v51, %v6988_v57  ;;  %v5582_v62 = vld [vmem:[%s7108_s7 + $0x168] sm:$0xff]   ;;  %v5584_v38 = vld [vmem:[%s7108_s7 + $0x160] sm:$0xff]  }
0x1dc3   :  { %v3792_v52 = vpop.f32.mrf.mxu1  ;;  %v3739_v24 = vpop.f32.mrf.mxu0  ;;  %v3907_v51 = vmax.f32 %v3734_v25, 0.0 }
0x1dc4   :  { %v3793_v55 = vadd.f32 %v3792_v52, %v6888_v40  ;;  %v3740_v41 = vadd.f32 %v3739_v24, %v6907_v59  ;;  %v3914_v20 = vmax.f32 %v3738_v23, 0.0  ;;  %v3916_v14 = vmax.f32 %v3791_v15, 0.0  ;;  %v5586_v24 = vld [vmem:[%s7108_s7 + $0x158] sm:$0xff]  }
0x1dc6   :  { %v3917_v5 = vmax.f32 %v3793_v55, 0.0  ;;  %v3915_v44 = vmax.f32 %v3740_v41, 0.0  ;;  %v3935_v50 = vpack.c.bf16 %v3914_v20, %v3907_v51  ;;  %v3937_v52 = vpack.c.bf16 %v3916_v14, %v3909_v48  ;;  %v5581_v55 = vld [vmem:[%s7108_s7 + $0x130] sm:$0xff]   ;;  %v5592_v41 = vld [vmem:[%s7108_s7 + $0x140] sm:$0xff]  }
0x1dc8   :  { %v3938_v27 = vpack.c.bf16 %v3917_v5, %v3910_v31  ;;  %v3936_v9 = vpack.c.bf16 %v3915_v44, %v3908_v32  ;;  %v5585_v5 = vld [vmem:[%s7108_s7 + $0x120] sm:$0xff]   ;;  %v5589_v31 = vld [vmem:[%s7108_s7 + $0x110] sm:$0xff]  }
0x1df4   :  { %v3620_v39 = vpop.permute.xlu0 %3619 }
0x1df5   :  { %4707 = vmatmul.mubr.msk.bf16.gmra.mxu0 %vm223_vm2, %v3620_v39  ;;  %4709 = vmatmul.mubr.msk.bf16.gmra.mxu1 %vm223_vm2, %v3620_v39 }
0x1df6   :  { %5492 = vmatprep.mubr.msk.bf16.mxu1 %vm223_vm2, %v6838_v4  ;;  %3837 = vmatprep.mubr.bf16.mxu0 %v5871_v8 }
0x1dfd   :  { %4710 = vmatmul.mubr.msk.bf16.vlgmr.msra.gmra.mxu0 %vm223_vm2, %v6838_v4  ;;  %5493 = vmatmul.mubr.msk.bf16.vlgmr.msra.gmra.mxu1 %vm223_vm2, %v3620_v39  ;;  %v5569_v4 = vld [vmem:[%s7108_s7 + $0x90] sm:$0xff]  }
0x1dfe   :  { %4944 = vmatpush3.bf16.msra.mxu0 %v5548_v6  ;;  %4972 = vmatpush3.bf16.msra.mxu1 %v5549_v56  ;;  %v5587_v6 = vld [vmem:[%s7108_s7 + $0x118] sm:$0xff]   ;;  %v5588_v56 = vld [vmem:[%s7108_s7 + $0x150] sm:$0xff]  }
0x1dff   :  { %4435 = vmatprep.mubr.bf16.mxu1 %v3938_v27  ;;  %4945 = vmatprep.subr.bf16.mxu0 %v5550_v43  ;;  %v5590_v43 = vld [vmem:[%s7108_s7 + $0x148] sm:$0xff]   ;;  %v5593_v27 = vld [vmem:[%s7108_s7 + $0x180] sm:$0xff]  }
0x1e00   :  { %4973 = vmatprep.subr.bf16.mxu1 %v5551_v63  ;;  %3847 = vmatprep.mubr.bf16.mxu0 %v5871_v8  ;;  %v5559_v8 = vld [vmem:[%s7108_s7 + $0xe0] sm:$0xff]   ;;  %v5591_v63 = vld [vmem:[%s7108_s7 + $0x108] sm:$0xff]  }
0x1e02   :  { %4946 = vmatpush3.bf16.msra.mxu0 %v5552_v19  ;;  %4974 = vmatpush3.bf16.msra.mxu1 %v5553_v0  ;;  %v5594_v19 = vld [vmem:[%s7108_s7 + $0x100] sm:$0xff]  }
0x1e03   :  { %4947 = vmatprep.subr.bf16.mxu0 %v5554_v33  ;;  %4975 = vmatprep.subr.bf16.mxu1 %v5555_v17 }
0x1e05   :  { %4711 = vmatmul.mubr.msk.bf16.gmra.mxu0 %vm223_vm2, %v3620_v39  ;;  %v5580_v39 = vld [vmem:[%s7108_s7 + $0x170] sm:$0xff]  }
0x1e06   :  { %4948 = vmatpush3.bf16.msra.mxu0 %v5556_v3  ;;  %4976 = vmatpush3.bf16.msra.mxu1 %v5557_v54  ;;  %v3602_v54 = vsub.s32 5, %v6875_v49 }
0x1e07   :  { %4386 = vmatprep.mubr.bf16.mxu0 %v3936_v9  ;;  %4949 = vmatprep.subr.bf16.mxu0 %v5558_v21 }
0x1e08   :  { %4977 = vmatprep.subr.bf16.mxu1 %v5559_v8 }
0x1e0a   :  { %4950 = vmatpush3.bf16.msra.mxu0 %v5560_v42  ;;  %4978 = vmatpush3.bf16.msra.mxu1 %v5561_v22 }
0x1e0b   :  { %4951 = vmatprep.subr.bf16.mxu0 %v5562_v12  ;;  %4979 = vmatprep.subr.bf16.mxu1 %v5563_v13 }
0x1e0e   :  { %4952 = vmatpush3.bf16.msra.mxu0 %v5564_v60  ;;  %4980 = vmatpush3.bf16.msra.mxu1 %v5565_v28  ;;  %v3598_v60 = vsub.s32 4, %v6875_v49  ;;  %v3606_v28 = vsub.s32 6, %v6875_v49 }
0x1e0f   :  { %4953 = vmatprep.subr.bf16.mxu0 %v5566_v16  ;;  %4981 = vmatprep.subr.bf16.mxu1 %v5567_v29 }
0x1e10   :  { %v3599_v15 = vrot.slane %v6885_v34, %v3598_v60  ;;  %v3607_v49 = vrot.slane %v6885_v34, %v3606_v28 }
0x1e12   :  { %4954 = vmatpush3.bf16.msra.mxu0 %v5568_v1  ;;  %4982 = vmatpush3.bf16.msra.mxu1 %v5569_v4 }
0x1e13   :  { %4955 = vmatprep.subr.bf16.mxu0 %v5570_v18  ;;  %4983 = vmatprep.subr.bf16.mxu1 %v5571_v61  ;;  %v3603_v18 = vrot.slane %v6885_v34, %v3602_v54 }
0x1e16   :  { %4956 = vmatpush3.bf16.msra.mxu0 %v5572_v30  ;;  %4984 = vmatpush3.bf16.msra.mxu1 %v5573_v10 }
0x1e17   :  { %4957 = vmatprep.subr.bf16.mxu0 %v5574_v35  ;;  %4985 = vmatprep.subr.bf16.mxu1 %v5575_v36 }
0x1e1a   :  { %4958 = vmatpush3.bf16.msra.mxu0 %v5576_v11  ;;  %4986 = vmatpush3.bf16.msra.mxu1 %v5577_v37 }
0x1e1b   :  { %4999 = vmatprep.subr.bf16.mxu0 %v5578_v26  ;;  %5496 = vmatprep.subr.bf16.mxu1 %v5593_v27 }
0x1e1d   :  { %4387 = vmatmul.mubr.bf16.vlgmr.msra.gmra.mxu0 %v3935_v50  ;;  %4436 = vmatmul.mubr.bf16.vlgmr.msra.gmra.mxu1 %v3937_v52 }
0x1e1e   :  { %5000 = vmatpush3.bf16.msra.mxu0 %v5579_v47  ;;  %5497 = vmatpush3.bf16.msra.mxu1 %v5593_v27 }
0x1e1f   :  { %5001 = vmatprep.subr.bf16.mxu0 %v5580_v39 }
0x1e22   :  { %5002 = vmatpush3.bf16.msra.mxu0 %v5581_v55 }
0x1e23   :  { %5003 = vmatprep.subr.bf16.mxu0 %v5582_v62 }
0x1e26   :  { %5004 = vmatpush3.bf16.msra.mxu0 %v5583_v53 }
0x1e27   :  { %5005 = vmatprep.subr.bf16.mxu0 %v5584_v38 }
0x1e2a   :  { %5006 = vmatpush3.bf16.msra.mxu0 %v5585_v5 }
0x1e2b   :  { %5007 = vmatprep.subr.bf16.mxu0 %v5586_v24 }
0x1e2e   :  { %5008 = vmatpush3.bf16.msra.mxu0 %v5587_v6 }
0x1e2f   :  { %5009 = vmatprep.subr.bf16.mxu0 %v5588_v56 }
0x1e32   :  { %5010 = vmatpush3.bf16.msra.mxu0 %v5589_v31 }
0x1e33   :  { %5011 = vmatprep.subr.bf16.mxu0 %v5590_v43 }
0x1e36   :  { %5012 = vmatpush3.bf16.msra.mxu0 %v5591_v63 }
0x1e37   :  { %5013 = vmatprep.subr.bf16.mxu0 %v5592_v41 }
0x1e3a   :  { %5014 = vmatpush3.bf16.msra.mxu0 %v5594_v19 }
0x1eb5   :  { %v3743_v0 = vpop.f32.mrf.mxu0  ;;  %v3796_v46 = vpop.f32.mrf.mxu1 }
0x1eb6   :  { %v3744_v42 = vadd.f32 %v3743_v0, %v6985_v58  ;;  %v3797_v22 = vadd.f32 %v3796_v46, %v6988_v57 }
0x1eb7   :  { %v3745_v33 = vpop.f32.mrf.mxu0  ;;  %v3798_v17 = vpop.f32.mrf.mxu1 }
0x1eb8   :  { %v3746_v32 = vadd.f32 %v3745_v33, %v6907_v59  ;;  %v3799_v21 = vadd.f32 %v3798_v17, %v6888_v40  ;;  %v3921_v10 = vmax.f32 %v3744_v42, 0.0  ;;  %v3923_v23 = vmax.f32 %v3797_v22, 0.0 }
0x1eb9   :  { %v3747_v44 = vpop.f32.mrf.mxu0  ;;  %v3800_v3 = vpop.f32.mrf.mxu1 }
0x1eba   :  { %v3748_v8 = vadd.f32 %v3747_v44, %v6985_v58  ;;  %v3801_v9 = vadd.f32 %v3800_v3, %v6988_v57  ;;  %v3922_v61 = vmax.f32 %v3746_v32, 0.0  ;;  %v3924_v58 = vmax.f32 %v3799_v21, 0.0 }
0x1ebb   :  { %v3749_v12 = vpop.f32.mrf.mxu0  ;;  %v3802_v13 = vpop.f32.mrf.mxu1 }
0x1ebc   :  { %v3750_v16 = vadd.f32 %v3749_v12, %v6907_v59  ;;  %v3803_v29 = vadd.f32 %v3802_v13, %v6888_v40  ;;  %v3928_v7 = vmax.f32 %v3748_v8, 0.0  ;;  %v3930_v2 = vmax.f32 %v3801_v9, 0.0 }
0x1ebd   :  { %v3839_v1 = vpop.f32.mrf.mxu0  ;;  %v5494_v4 = vpop.f32.mrf.mxu1 }
0x1ebe   :  { %v3929_v30 = vmax.f32 %v3750_v16, 0.0  ;;  %v3931_v57 = vmax.f32 %v3803_v29, 0.0  ;;  %v3942_v25 = vpack.c.bf16 %v3928_v7, %v3921_v10  ;;  %v3944_v45 = vpack.c.bf16 %v3930_v2, %v3923_v23 }
0x1ebf   :  { %v3841_v35 = vpop.f32.mrf.mxu0  ;;  %v3892_v59 = vpop.f32.mrf.mxu1  ;;  %v3840_v48 = vadd.f32 %v3839_v1, %v3599_v15  ;;  %v3901_v47 = vadd.f32 %v5494_v4, %v3607_v49 }
0x1ec0   :  { %v3943_v36 = vpack.c.bf16 %v3929_v30, %v3922_v61  ;;  %v3945_v40 = vpack.c.bf16 %v3931_v57, %v3924_v58  ;;  %v3842_v11 = vadd.f32 %v3841_v35, %v3603_v18  ;;  %v3893_v14 = vadd.f32 %v3892_v59, %v3607_v49  ;;  %v4714_v58 = vld [vmem:[%s7110_s8] ss:$0 sm:$0xff] }
0x1ec1   :  { %v3843_v37 = vpop.f32.mrf.mxu0  ;;  %v5495_v20 = vpop.f32.mrf.mxu1  ;;  %v3911_v56 = vmax.f32 %v3840_v48, 0.0  ;;  %v3927_v31 = vmax.f32 %v3901_v47, 0.0 }
0x1ec2   :  { %v3844_v26 = vadd.f32 %v3843_v37, %v3599_v15  ;;  %v3904_v51 = vadd.f32 %v5495_v20, %v3607_v49  ;;  %4394 = vmatprep.mubr.bf16.mxu0 %v3943_v36  ;;  %4443 = vmatprep.mubr.bf16.mxu1 %v3945_v40  ;;  %v3912_v38 = vmax.f32 %v3842_v11, 0.0  ;;  %v3913_v5 = vmax.f32 %v3893_v14, 0.0 }
0x1ec3   :  { %v3845_v50 = vpop.f32.mrf.mxu0  ;;  %v3895_v52 = vpop.f32.mrf.mxu1  ;;  %4395 = vmatmul.mubr.bf16.gmra.mxu0 %v3942_v25  ;;  %4444 = vmatmul.mubr.bf16.gmra.mxu1 %v3944_v45 }
0x1ec4   :  { %v3846_v34 = vadd.f32 %v3845_v50, %v3603_v18  ;;  %v3896_v39 = vadd.f32 %v3895_v52, %v3607_v49  ;;  %v3918_v55 = vmax.f32 %v3844_v26, 0.0  ;;  %v3934_v62 = vmax.f32 %v3904_v51, 0.0 }
0x1ec5   :  { %v3849_v53 = vpop.f32.mrf.mxu0 }
0x1ec6   :  { %v3919_v24 = vmax.f32 %v3846_v34, 0.0  ;;  %v3920_v6 = vmax.f32 %v3896_v39, 0.0  ;;  %v3939_v27 = vpack.c.bf16 %v3918_v55, %v3911_v56  ;;  %v3948_v19 = vpack.c.bf16 %v3934_v62, %v3927_v31 }
0x1ec7   :  { %v3851_v43 = vpop.f32.mrf.mxu0  ;;  %v3850_v17 = vadd.f32 %v3849_v53, %v3599_v15 }
0x1ec8   :  { %v3940_v63 = vpack.c.bf16 %v3919_v24, %v3912_v38  ;;  %v3941_v41 = vpack.c.bf16 %v3920_v6, %v3913_v5  ;;  %v3852_v46 = vadd.f32 %v3851_v43, %v3603_v18 }
0x1ec9   :  { %v3853_v0 = vpop.f32.mrf.mxu0  ;;  %v3925_v8 = vmax.f32 %v3850_v17, 0.0 }
0x1eca   :  { %v3854_v33 = vadd.f32 %v3853_v0, %v3599_v15  ;;  %4484 = vmatprep.mubr.bf16.mxu0 %v3940_v63  ;;  %5498 = vmatprep.mubr.msk.bf16.mxu1 %vm76_vm0, %v3941_v41  ;;  %v3926_v32 = vmax.f32 %v3852_v46, 0.0 }
0x1ecb   :  { %v3855_v44 = vpop.f32.mrf.mxu0  ;;  %4485 = vmatmul.mubr.bf16.vlgmr.msra.gmra.mxu0 %v3939_v27  ;;  %5499 = vmatmul.mubr.msk.bf16.vlgmr.msra.gmra.mxu1 %vm76_vm0, %v3948_v19 }
0x1ecc   :  { %v3856_v3 = vadd.f32 %v3855_v44, %v3603_v18  ;;  %v3932_v54 = vmax.f32 %v3854_v33, 0.0 }
0x1ece   :  { %v3933_v21 = vmax.f32 %v3856_v3, 0.0  ;;  %v3946_v42 = vpack.c.bf16 %v3932_v54, %v3925_v8 }
0x1ed0   :  { %v3947_v9 = vpack.c.bf16 %v3933_v21, %v3926_v32 }
0x1ed2   :  { %4492 = vmatprep.mubr.bf16.mxu0 %v3947_v9 }
0x1ed3   :  { %4493 = vmatmul.mubr.bf16.gmra.mxu0 %v3946_v42 }
0x1edd   :  { %v4959_v22 = vpop.f32.mrf.mxu0  ;;  %v4987_v12 = vpop.f32.mrf.mxu1 }
0x1edf   :  { %v4960_v13 = vpop.f32.mrf.mxu0  ;;  %v4988_v60 = vpop.f32.mrf.mxu1 }
0x1ee0   :  { %v4961_v61 = vadd.f32 %v4960_v13, %v4959_v22  ;;  %v4989_v36 = vadd.f32 %v4988_v60, %v4987_v12 }
0x1ee1   :  { %v4962_v28 = vpop.f32.mrf.mxu0  ;;  %v4990_v16 = vpop.f32.mrf.mxu1 }
0x1ee2   :  { %v4389_v49 = vadd.f32 %v4961_v61, %v4714_v58 }
0x1ee3   :  { %v4963_v29 = vpop.f32.mrf.mxu0  ;;  %v4991_v7 = vpop.f32.mrf.mxu1 }
0x1ee4   :  { %v4964_v10 = vadd.f32 %v4963_v29, %v4962_v28  ;;  %v4438_v11 = vadd.f32 %v4989_v36, %v4389_v49  ;;  %v4992_v14 = vadd.f32 %v4991_v7, %v4990_v16 }
0x1ee6   :  { %v4392_v40 = vadd.f32 %v4964_v10, %v4714_v58 }
0x1ee8   :  { %v4441_v48 = vadd.f32 %v4992_v14, %v4392_v40 }
0x1f83   :  { %v4965_v2 = vpop.f32.mrf.mxu0  ;;  %v4993_v1 = vpop.f32.mrf.mxu1 }
0x1f85   :  { %v4966_v4 = vpop.f32.mrf.mxu0  ;;  %v4994_v18 = vpop.f32.mrf.mxu1 }
0x1f86   :  { %v4967_v37 = vadd.f32 %v4966_v4, %v4965_v2  ;;  %v4995_v53 = vadd.f32 %v4994_v18, %v4993_v1 }
0x1f87   :  { %v4968_v30 = vpop.f32.mrf.mxu0  ;;  %v4996_v57 = vpop.f32.mrf.mxu1 }
0x1f88   :  { %v4397_v52 = vadd.f32 %v4967_v37, %v4714_v58 }
0x1f89   :  { %v4969_v23 = vpop.f32.mrf.mxu0  ;;  %v4997_v15 = vpop.f32.mrf.mxu1 }
0x1f8a   :  { %v4970_v34 = vadd.f32 %v4969_v23, %v4968_v30  ;;  %v4446_v6 = vadd.f32 %v4995_v53, %v4397_v52  ;;  %v4998_v41 = vadd.f32 %v4997_v15, %v4996_v57 }
0x1f8b   :  { %v5015_v35 = vpop.f32.mrf.mxu0  ;;  %v5500_v59 = vpop.f32.mrf.mxu1 }
0x1f8c   :  { %v4400_v56 = vadd.f32 %v4970_v34, %v4714_v58 }
0x1f8d   :  { %v5016_v25 = vpop.f32.mrf.mxu0  ;;  %v4535_v45 = vpop.f32.mrf.mxu1 }
0x1f8e   :  { %v5017_v20 = vadd.f32 %v5016_v25, %v5015_v35  ;;  %v4449_v0 = vadd.f32 %v4998_v41, %v4400_v56 }
0x1f8f   :  { %v5018_v26 = vpop.f32.mrf.mxu0  ;;  %v5501_v47 = vpop.f32.mrf.mxu1 }
0x1f90   :  { %v4487_v51 = vadd.f32 %v5017_v20, %v4438_v11 }
0x1f91   :  { %v5019_v50 = vpop.f32.mrf.mxu0  ;;  %v4538_v5 = vpop.f32.mrf.mxu1 }
0x1f92   :  { %v4536_v39 = vadd.f32 %v4535_v45, %v4487_v51  ;;  %v5020_v55 = vadd.f32 %v5019_v50, %v5018_v26 }
0x1f93   :  { %v5021_v62 = vpop.f32.mrf.mxu0 }
0x1f94   :  { %4550 = vst.msk [vmem:[%s7111_s9] sm:$0xff] %vm76_vm0, %v4536_v39  ;;  %v4490_v38 = vadd.f32 %v5020_v55, %v4441_v48 }
0x1f95   :  { %v5022_v24 = vpop.f32.mrf.mxu0 }
0x1f96   :  { %v4539_v31 = vadd.f32 %v4538_v5, %v4490_v38  ;;  %v5023_v43 = vadd.f32 %v5022_v24, %v5021_v62 }
0x1f97   :  { %v5024_v63 = vpop.f32.mrf.mxu0 }
0x1f98   :  { %4551 = vst.msk [vmem:[%s7111_s9 + $0x8] sm:$0xff] %vm76_vm0, %v4539_v31  ;;  %v4495_v27 = vadd.f32 %v5023_v43, %v4446_v6 }
0x1f99   :  { %v5025_v19 = vpop.f32.mrf.mxu0 }
0x1f9a   :  { %v4544_v46 = vadd.f32 %v5500_v59, %v4495_v27  ;;  %v5026_v33 = vadd.f32 %v5025_v19, %v5024_v63 }
0x1f9c   :  { %4552 = vst.msk [vmem:[%s7111_s9 + $0x10] sm:$0xff] %vm76_vm0, %v4544_v46  ;;  %v4498_v17 = vadd.f32 %v5026_v33, %v4449_v0 }
0x1f9e   :  { %v4547_v44 = vadd.f32 %v5501_v47, %v4498_v17 }
0x1fa0   :  { %4553 = vst.msk [vmem:[%s7111_s9 + $0x18] sm:$0xff] %vm76_vm0, %v4547_v44 }

</bundles_post_ra>
